<compile_context>
chip_gen: v6e
topology: v6e:2x2x1
jax: 0.10.0
libtpu: 0.0.40
codegen_flags: <defaults>
</compile_context>

<pallas_src>
import functools

import jax
import jax.numpy as jnp
from jax import lax
from jax.experimental import pallas as pl
from jax.experimental.pallas import tpu as pltpu


# ----------------------------------------------------------------------------
# VMEM / tile-size helpers
# ----------------------------------------------------------------------------
def _vmem_limit(step_bytes):
    return int(min(max(2 * step_bytes, 32 << 20), 110 << 20))


def _conv_step_bytes(tco, cin, lp, m):
    x_blk = 2 * cin * lp * 2            # bf16 x block, double-buffered
    w_blk = 2 * 9 * tco * cin * 2       # bf16 weights, double-buffered
    b_blk = 2 * tco * 4
    o_blk = 2 * tco * m * 2             # bf16 output block, double-buffered
    acc = 3 * tco * m * 4               # f32 accumulator + live temporaries headroom
    return x_blk + w_blk + b_blk + o_blk + acc


def _pick_cout_tile(cout, cin, lp, m, budget=40 << 20, cap=256):
    """Cout tile: prefer the largest multiple-of-16 divisor (<= cap) whose per-step
    VMEM estimate fits the budget."""
    cands = [d for d in range(1, cout + 1)
             if cout % d == 0 and (d == cout or d % 16 == 0)]
    cands.sort(reverse=True)
    smallest = cands[-1]
    cands = [d for d in cands if d <= cap] or [smallest]
    for d in cands:
        if _conv_step_bytes(d, cin, lp, m) <= budget:
            return d
    return cands[-1]


def _unpool_step_bytes(r, w_in, w, x_bytes, out_bytes):
    return 2 * (r * w_in * x_bytes + r * w * 4 + r * 4 + r * 4 * w * out_bytes) + (1 << 16)


def _pick_row_tile(nrows, w_in, w, x_bytes, out_bytes, budget=24 << 20):
    """Rows per unpool grid step: biggest divisor of nrows (multiple of 16, else 8)
    whose double-buffered blocks fit ~budget bytes."""
    per_row = 2 * (w_in * x_bytes + w * 4 + 4 + 4 * w * out_bytes)
    cap = max(8, budget // max(per_row, 1))
    if nrows <= cap:
        return nrows
    for align in (16, 8):
        for r in range(min(cap, nrows - 1), align - 1, -1):
            if nrows % r == 0 and r % align == 0:
                return r
    return nrows


# ----------------------------------------------------------------------------
# Conv 3x3 (padding=1) + bias + ReLU, im2col fused in-kernel, bf16 MXU operands
# ----------------------------------------------------------------------------
def _conv3x3_relu_kernel(x_ref, w_ref, b_ref, o_ref, *, Wp):
    # x_ref: (1, Cin, Lp)  bf16 zero-padded image, flattened (row stride Wp), tail-padded
    # w_ref: (9, tco, Cin) bf16 weights for this Cout tile, tap-major (kh*3+kw)
    # b_ref: (tco, 1)      f32
    # o_ref: (1, tco, M)   M = H*Wp; columns [W:Wp) of each row are junk (masked downstream)
    M = o_ref.shape[2]
    xv = x_ref[0]                                               # (Cin, Lp)
    # tap 0 initialises the accumulator together with the bias (no memset, no extra add).
    acc = jnp.dot(w_ref[0], xv[:, 0:M],
                  preferred_element_type=jnp.float32) + b_ref[...]
    for t in range(1, 9):
        kh, kw = divmod(t, 3)
        off = kh * Wp + kw
        acc = acc + jnp.dot(w_ref[t], xv[:, off:off + M],
                            preferred_element_type=jnp.float32)
    o_ref[0] = jnp.maximum(acc, 0.0).astype(o_ref.dtype)


def conv3x3_relu(x, w, b):
    """x: (N, Cin, H, W); w: (Cout, Cin, 3, 3); b: (Cout,)
    -> (N, Cout, H, W+2) bf16.  The last 2 columns of every row are junk that the
    downstream unpool masks out (keeps the conv store lane-dense, no XLA slice pass)."""
    N, Cin, H, W = x.shape
    Cout = w.shape[0]
    Wp = W + 2
    M = H * Wp
    Lp = (H + 3) * Wp   # H + top pad + 2 bottom pad rows -> flat tail padding for free

    # one fused pad+cast pass (bf16 halves the bytes)
    xf = jnp.pad(x.astype(jnp.bfloat16),
                 ((0, 0), (0, 0), (1, 2), (1, 1))).reshape(N, Cin, Lp)
    wt = jnp.transpose(w, (2, 3, 0, 1)).reshape(9, Cout, Cin).astype(jnp.bfloat16)
    bias = b.reshape(Cout, 1).astype(jnp.float32)

    tco = _pick_cout_tile(Cout, Cin, Lp, M)
    n_co = Cout // tco
    vmem = _vmem_limit(_conv_step_bytes(tco, Cin, Lp, M))

    out = pl.pallas_call(
        functools.partial(_conv3x3_relu_kernel, Wp=Wp),
        out_shape=jax.ShapeDtypeStruct((N, Cout, M), jnp.bfloat16),
        grid=(N, n_co),
        in_specs=[
            pl.BlockSpec((1, Cin, Lp), lambda n, c: (n, 0, 0)),   # resident across c
            pl.BlockSpec((9, tco, Cin), lambda n, c: (0, c, 0)),
            pl.BlockSpec((tco, 1), lambda n, c: (c, 0)),
        ],
        out_specs=pl.BlockSpec((1, tco, M), lambda n, c: (n, c, 0)),
        compiler_params=pltpu.CompilerParams(
            dimension_semantics=("parallel", "parallel"),
            vmem_limit_bytes=vmem),
    )(xf, wt, bias)

    # free reshape -- junk columns retained, consumed/masked by max_unpool2x2
    return out.reshape(N, Cout, H, Wp)


# ----------------------------------------------------------------------------
# MaxUnpool2d(kernel=2, stride=2) with the 2x2 interleave fused in-kernel
# ----------------------------------------------------------------------------
def _unpool_kernel(x_ref, idx_ref, rb_ref, o_ref, *, W):
    # x_ref:   (R, Win)  values (Win >= W; extra columns are junk and ignored)
    # idx_ref: (R, W)    flat argmax indices into the (2H, 2W) plane (inside own 2x2 win)
    # rb_ref:  (R, 1)    per-row base: 4*W*h for this row's h
    # o_ref:   (R, 4W)   row h of the output plane: [even row 2h | odd row 2h+1]
    R = idx_ref.shape[0]
    xs = x_ref[:, 0:W]                                          # drop junk columns
    cols = lax.broadcasted_iota(jnp.int32, (R, W), 1)
    rel = idx_ref[...] - (rb_ref[...] + 2 * cols)               # 0, 1, 2W or 2W+1
    zero = jnp.zeros_like(xs)
    p00 = jnp.where(rel == 0, xs, zero)
    p01 = jnp.where(rel == 1, xs, zero)
    p10 = jnp.where(rel == 2 * W, xs, zero)
    p11 = jnp.where(rel == 2 * W + 1, xs, zero)
    # 0/1 expansion matrices: scatter input column w to output column 2w (E0) / 2w+1 (E1)
    r_i = lax.broadcasted_iota(jnp.int32, (W, 2 * W), 0)
    c_i = lax.broadcasted_iota(jnp.int32, (W, 2 * W), 1)
    e0 = (c_i == 2 * r_i).astype(xs.dtype)
    e1 = (c_i == 2 * r_i + 1).astype(xs.dtype)
    even = (jnp.dot(p00, e0, preferred_element_type=jnp.float32)
            + jnp.dot(p01, e1, preferred_element_type=jnp.float32))
    odd = (jnp.dot(p10, e0, preferred_element_type=jnp.float32)
           + jnp.dot(p11, e1, preferred_element_type=jnp.float32))
    o_ref[:, 0:2 * W] = even.astype(o_ref.dtype)
    o_ref[:, 2 * W:4 * W] = odd.astype(o_ref.dtype)


def max_unpool2x2(x, idx, out_dtype=None):
    """x: (N, C, H, Wx) with Wx >= W (extra columns are junk from the conv layout);
    idx: (N, C, H, W) flat offsets into the (2H)*(2W) plane, each inside its own 2x2
    window (nn.MaxPool2d(2,2,return_indices=True) convention) -> (N, C, 2H, 2W)."""
    N, C, H, W = idx.shape
    assert x.shape[:3] == (N, C, H) and x.shape[3] >= W
    Wx = x.shape[3]
    out_dtype = x.dtype if out_dtype is None else out_dtype
    rows = N * C * H

    xf = x.reshape(rows, Wx)                                    # free reshape
    idxf = idx.reshape(rows, W).astype(jnp.int32)               # assumes (2H)*(2W) < 2**31
    hh = jnp.arange(H, dtype=jnp.int32) * (4 * W)
    row_base = jnp.broadcast_to(hh[None, :], (N * C, H)).reshape(rows, 1)

    x_bytes = jnp.dtype(x.dtype).itemsize
    o_bytes = jnp.dtype(out_dtype).itemsize
    R = _pick_row_tile(rows, Wx, W, x_bytes, o_bytes)
    vmem = _vmem_limit(_unpool_step_bytes(R, Wx, W, x_bytes, o_bytes))

    out = pl.pallas_call(
        functools.partial(_unpool_kernel, W=W),
        out_shape=jax.ShapeDtypeStruct((rows, 4 * W), out_dtype),
        grid=(rows // R,),
        in_specs=[
            pl.BlockSpec((R, Wx), lambda i: (i, 0)),
            pl.BlockSpec((R, W), lambda i: (i, 0)),
            pl.BlockSpec((R, 1), lambda i: (i, 0)),
        ],
        out_specs=pl.BlockSpec((R, 4 * W), lambda i: (i, 0)),
        compiler_params=pltpu.CompilerParams(
            dimension_semantics=("parallel",),
            vmem_limit_bytes=vmem),
    )(xf, idxf, row_base)

    # (rows, 4W) has exactly the row-major layout of (N, C, 2H, 2W) -> free reshape
    return out.reshape(N, C, 2 * H, 2 * W)


# ----------------------------------------------------------------------------
# SegNetDecoder forward
# ----------------------------------------------------------------------------
def segnet_decoder_forward(x, indices, params):
    """params: list of (conv_weight, conv_bias); indices: list in encoder order
    (the forward reverses it, matching the PyTorch module)."""
    indices = indices[::-1]
    last = len(params) - 1
    for i, (w, b) in enumerate(params):
        x = conv3x3_relu(x, w, b)
        x = max_unpool2x2(x, indices[i],
                          out_dtype=jnp.float32 if i == last else jnp.bfloat16)
    return x


# ----------------------------------------------------------------------------
# Pure-JAX reference (correctness check only)
# ----------------------------------------------------------------------------
def _ref_conv3x3_relu(x, w, b):
    y = lax.conv_general_dilated(
        x, w, window_strides=(1, 1), padding="SAME",
        dimension_numbers=("NCHW", "OIHW", "NCHW"))
    return jnp.maximum(y + b.reshape(1, -1, 1, 1), 0.0)


def _ref_unpool(x, idx):
    N, C, H, W = x.shape
    flat = jnp.zeros((N * C, 4 * H * W), jnp.float32)
    rows = jnp.arange(N * C).reshape(N * C, 1, 1)
    flat = flat.at[rows, idx.reshape(N * C, H, W)].set(x.reshape(N * C, H, W))
    return flat.reshape(N, C, 2 * H, 2 * W)


def _ref_forward(x, indices, params):
    indices = indices[::-1]
    for i, (w, b) in enumerate(params):
        x = _ref_conv3x3_relu(x, w, b)
        x = _ref_unpool(x, indices[i])
    return x


def _make_indices(key, shape):
    """Valid MaxPool2d(2,2,return_indices=True)-style indices of given NCHW shape."""
    N, C, H, W = shape
    k1, k2 = jax.random.split(key)
    dr = jax.random.randint(k1, shape, 0, 2)
    dc = jax.random.randint(k2, shape, 0, 2)
    hh = jnp.arange(H).reshape(1, 1, H, 1)
    ww = jnp.arange(W).reshape(1, 1, 1, W)
    return ((2 * hh + dr) * (2 * W) + (2 * ww + dc)).astype(jnp.int32)


if __name__ == "__main__":
    key = jax.random.PRNGKey(0)
    kx, kw0, kb0, kw1, kb1, ki0, ki1 = jax.random.split(key, 7)

    # Decoder with 2 layers: Conv(4->4)+ReLU+Unpool, then Conv(4->3)+ReLU+Unpool.
    N, C_in, H, W = 2, 4, 16, 16
    C0, C1 = 4, 3

    x = jax.random.normal(kx, (N, C_in, H, W), jnp.float32)
    w0 = 0.1 * jax.random.normal(kw0, (C0, C_in, 3, 3), jnp.float32)
    b0 = 0.1 * jax.random.normal(kb0, (C0,), jnp.float32)
    w1 = 0.1 * jax.random.normal(kw1, (C1, C0, 3, 3), jnp.float32)
    b1 = 0.1 * jax.random.normal(kb1, (C1,), jnp.float32)
    params = [(w0, b0), (w1, b1)]

    # Encoder-order indices (forward reverses the list: last element is used first).
    idx_stage0 = _make_indices(ki0, (N, C0, H, W))            # first unpool: 16x16 -> 32x32
    idx_stage1 = _make_indices(ki1, (N, C1, 2 * H, 2 * W))    # second unpool: 32x32 -> 64x64
    indices = [idx_stage1, idx_stage0]

    fwd = jax.jit(segnet_decoder_forward)
    out = jax.block_until_ready(fwd(x, indices, params))

    ref = _ref_forward(x, indices, params)
    assert out.shape == (N, C1, 4 * H, 4 * W), out.shape
    assert out.dtype == jnp.float32, out.dtype
    max_err = float(jnp.max(jnp.abs(out - ref)))
    # bf16 activations/weights with f32 accumulation -> loosened tolerance vs f32 reference
    assert jnp.allclose(out, ref, atol=3e-2, rtol=3e-2), f"mismatch vs reference (max abs err {max_err})"

    print("KERNEL_OK")
</pallas_src>

<mosaic_0001>
module attributes {stable_mosaic.version = 11 : i64} {
  func.func @_conv3x3_relu_kernel(%arg0: i32, %arg1: i32, %arg2: memref<1x4x342xbf16, #tpu.memory_space<vmem>>, %arg3: memref<9x4x4xbf16, #tpu.memory_space<vmem>>, %arg4: memref<4x1xf32, #tpu.memory_space<vmem>>, %arg5: memref<1x4x288xbf16, #tpu.memory_space<vmem>>) attributes {dimension_semantics = [#tpu.dimension_semantics<parallel>, #tpu.dimension_semantics<parallel>], iteration_bounds = array<i64: 2, 1>, scalar_prefetch = 0 : i64, scratch_operands = 0 : i64, tpu.core_type = #tpu.core_type<tc>, window_params = [{transform_indices = @transform_0, window_bounds = array<i64: 1, 4, 342>}, {transform_indices = @transform_1, window_bounds = array<i64: 9, 4, 4>}, {transform_indices = @transform_2, window_bounds = array<i64: 4, 1>}, {transform_indices = @transform_3, window_bounds = array<i64: 1, 4, 288>}]} {
    %c0 = arith.constant 0 : index
    %c0_0 = arith.constant 0 : index
    %c0_1 = arith.constant 0 : index
    %0 = vector.load %arg2[%c0, %c0_0, %c0_1] : memref<1x4x342xbf16, #tpu.memory_space<vmem>>, vector<1x4x342xbf16>
    %1 = vector.shape_cast %0 : vector<1x4x342xbf16> to vector<4x342xbf16>
    %c0_2 = arith.constant 0 : index
    %c0_3 = arith.constant 0 : index
    %c0_4 = arith.constant 0 : index
    %2 = vector.load %arg3[%c0_2, %c0_3, %c0_4] : memref<9x4x4xbf16, #tpu.memory_space<vmem>>, vector<1x4x4xbf16>
    %3 = vector.shape_cast %2 : vector<1x4x4xbf16> to vector<4x4xbf16>
    %4 = vector.extract_strided_slice %1 {offsets = [0, 0], sizes = [4, 288], strides = [1, 1]} : vector<4x342xbf16> to vector<4x288xbf16>
    %cst = arith.constant dense<0.000000e+00> : vector<4x288xf32>
    %5 = tpu.matmul %3, %4, %cst {dimension_numbers = #tpu.dot_dimension_numbers<[1], [0], [0], [1], [0, 0, 1, 1], [], []>} : vector<4x4xbf16>, vector<4x288xbf16>, vector<4x288xf32> -> vector<4x288xf32>
    %c0_5 = arith.constant 0 : index
    %c0_6 = arith.constant 0 : index
    %6 = vector.load %arg4[%c0_5, %c0_6] : memref<4x1xf32, #tpu.memory_space<vmem>>, vector<4x1xf32>
    %7 = vector.broadcast %6 : vector<4x1xf32> to vector<4x288xf32>
    %8 = arith.addf %5, %7 : vector<4x288xf32>
    %c1 = arith.constant 1 : index
    %c0_7 = arith.constant 0 : index
    %c0_8 = arith.constant 0 : index
    %9 = vector.load %arg3[%c1, %c0_7, %c0_8] : memref<9x4x4xbf16, #tpu.memory_space<vmem>>, vector<1x4x4xbf16>
    %10 = vector.shape_cast %9 : vector<1x4x4xbf16> to vector<4x4xbf16>
    %11 = vector.extract_strided_slice %1 {offsets = [0, 1], sizes = [4, 288], strides = [1, 1]} : vector<4x342xbf16> to vector<4x288xbf16>
    %cst_9 = arith.constant dense<0.000000e+00> : vector<4x288xf32>
    %12 = tpu.matmul %10, %11, %cst_9 {dimension_numbers = #tpu.dot_dimension_numbers<[1], [0], [0], [1], [0, 0, 1, 1], [], []>} : vector<4x4xbf16>, vector<4x288xbf16>, vector<4x288xf32> -> vector<4x288xf32>
    %13 = arith.addf %8, %12 : vector<4x288xf32>
    %c2 = arith.constant 2 : index
    %c0_10 = arith.constant 0 : index
    %c0_11 = arith.constant 0 : index
    %14 = vector.load %arg3[%c2, %c0_10, %c0_11] : memref<9x4x4xbf16, #tpu.memory_space<vmem>>, vector<1x4x4xbf16>
    %15 = vector.shape_cast %14 : vector<1x4x4xbf16> to vector<4x4xbf16>
    %16 = vector.extract_strided_slice %1 {offsets = [0, 2], sizes = [4, 288], strides = [1, 1]} : vector<4x342xbf16> to vector<4x288xbf16>
    %cst_12 = arith.constant dense<0.000000e+00> : vector<4x288xf32>
    %17 = tpu.matmul %15, %16, %cst_12 {dimension_numbers = #tpu.dot_dimension_numbers<[1], [0], [0], [1], [0, 0, 1, 1], [], []>} : vector<4x4xbf16>, vector<4x288xbf16>, vector<4x288xf32> -> vector<4x288xf32>
    %18 = arith.addf %13, %17 : vector<4x288xf32>
    %c3 = arith.constant 3 : index
    %c0_13 = arith.constant 0 : index
    %c0_14 = arith.constant 0 : index
    %19 = vector.load %arg3[%c3, %c0_13, %c0_14] : memref<9x4x4xbf16, #tpu.memory_space<vmem>>, vector<1x4x4xbf16>
    %20 = vector.shape_cast %19 : vector<1x4x4xbf16> to vector<4x4xbf16>
    %21 = vector.extract_strided_slice %1 {offsets = [0, 18], sizes = [4, 288], strides = [1, 1]} : vector<4x342xbf16> to vector<4x288xbf16>
    %cst_15 = arith.constant dense<0.000000e+00> : vector<4x288xf32>
    %22 = tpu.matmul %20, %21, %cst_15 {dimension_numbers = #tpu.dot_dimension_numbers<[1], [0], [0], [1], [0, 0, 1, 1], [], []>} : vector<4x4xbf16>, vector<4x288xbf16>, vector<4x288xf32> -> vector<4x288xf32>
    %23 = arith.addf %18, %22 : vector<4x288xf32>
    %c4 = arith.constant 4 : index
    %c0_16 = arith.constant 0 : index
    %c0_17 = arith.constant 0 : index
    %24 = vector.load %arg3[%c4, %c0_16, %c0_17] : memref<9x4x4xbf16, #tpu.memory_space<vmem>>, vector<1x4x4xbf16>
    %25 = vector.shape_cast %24 : vector<1x4x4xbf16> to vector<4x4xbf16>
    %26 = vector.extract_strided_slice %1 {offsets = [0, 19], sizes = [4, 288], strides = [1, 1]} : vector<4x342xbf16> to vector<4x288xbf16>
    %cst_18 = arith.constant dense<0.000000e+00> : vector<4x288xf32>
    %27 = tpu.matmul %25, %26, %cst_18 {dimension_numbers = #tpu.dot_dimension_numbers<[1], [0], [0], [1], [0, 0, 1, 1], [], []>} : vector<4x4xbf16>, vector<4x288xbf16>, vector<4x288xf32> -> vector<4x288xf32>
    %28 = arith.addf %23, %27 : vector<4x288xf32>
    %c5 = arith.constant 5 : index
    %c0_19 = arith.constant 0 : index
    %c0_20 = arith.constant 0 : index
    %29 = vector.load %arg3[%c5, %c0_19, %c0_20] : memref<9x4x4xbf16, #tpu.memory_space<vmem>>, vector<1x4x4xbf16>
    %30 = vector.shape_cast %29 : vector<1x4x4xbf16> to vector<4x4xbf16>
    %31 = vector.extract_strided_slice %1 {offsets = [0, 20], sizes = [4, 288], strides = [1, 1]} : vector<4x342xbf16> to vector<4x288xbf16>
    %cst_21 = arith.constant dense<0.000000e+00> : vector<4x288xf32>
    %32 = tpu.matmul %30, %31, %cst_21 {dimension_numbers = #tpu.dot_dimension_numbers<[1], [0], [0], [1], [0, 0, 1, 1], [], []>} : vector<4x4xbf16>, vector<4x288xbf16>, vector<4x288xf32> -> vector<4x288xf32>
    %33 = arith.addf %28, %32 : vector<4x288xf32>
    %c6 = arith.constant 6 : index
    %c0_22 = arith.constant 0 : index
    %c0_23 = arith.constant 0 : index
    %34 = vector.load %arg3[%c6, %c0_22, %c0_23] : memref<9x4x4xbf16, #tpu.memory_space<vmem>>, vector<1x4x4xbf16>
    %35 = vector.shape_cast %34 : vector<1x4x4xbf16> to vector<4x4xbf16>
    %36 = vector.extract_strided_slice %1 {offsets = [0, 36], sizes = [4, 288], strides = [1, 1]} : vector<4x342xbf16> to vector<4x288xbf16>
    %cst_24 = arith.constant dense<0.000000e+00> : vector<4x288xf32>
    %37 = tpu.matmul %35, %36, %cst_24 {dimension_numbers = #tpu.dot_dimension_numbers<[1], [0], [0], [1], [0, 0, 1, 1], [], []>} : vector<4x4xbf16>, vector<4x288xbf16>, vector<4x288xf32> -> vector<4x288xf32>
    %38 = arith.addf %33, %37 : vector<4x288xf32>
    %c7 = arith.constant 7 : index
    %c0_25 = arith.constant 0 : index
    %c0_26 = arith.constant 0 : index
    %39 = vector.load %arg3[%c7, %c0_25, %c0_26] : memref<9x4x4xbf16, #tpu.memory_space<vmem>>, vector<1x4x4xbf16>
    %40 = vector.shape_cast %39 : vector<1x4x4xbf16> to vector<4x4xbf16>
    %41 = vector.extract_strided_slice %1 {offsets = [0, 37], sizes = [4, 288], strides = [1, 1]} : vector<4x342xbf16> to vector<4x288xbf16>
    %cst_27 = arith.constant dense<0.000000e+00> : vector<4x288xf32>
    %42 = tpu.matmul %40, %41, %cst_27 {dimension_numbers = #tpu.dot_dimension_numbers<[1], [0], [0], [1], [0, 0, 1, 1], [], []>} : vector<4x4xbf16>, vector<4x288xbf16>, vector<4x288xf32> -> vector<4x288xf32>
    %43 = arith.addf %38, %42 : vector<4x288xf32>
    %c8 = arith.constant 8 : index
    %c0_28 = arith.constant 0 : index
    %c0_29 = arith.constant 0 : index
    %44 = vector.load %arg3[%c8, %c0_28, %c0_29] : memref<9x4x4xbf16, #tpu.memory_space<vmem>>, vector<1x4x4xbf16>
    %45 = vector.shape_cast %44 : vector<1x4x4xbf16> to vector<4x4xbf16>
    %46 = vector.extract_strided_slice %1 {offsets = [0, 38], sizes = [4, 288], strides = [1, 1]} : vector<4x342xbf16> to vector<4x288xbf16>
    %cst_30 = arith.constant dense<0.000000e+00> : vector<4x288xf32>
    %47 = tpu.matmul %45, %46, %cst_30 {dimension_numbers = #tpu.dot_dimension_numbers<[1], [0], [0], [1], [0, 0, 1, 1], [], []>} : vector<4x4xbf16>, vector<4x288xbf16>, vector<4x288xf32> -> vector<4x288xf32>
    %48 = arith.addf %43, %47 : vector<4x288xf32>
    %cst_31 = arith.constant 0.000000e+00 : f32
    %49 = vector.broadcast %cst_31 : f32 to vector<4x288xf32>
    %50 = arith.maximumf %48, %49 : vector<4x288xf32>
    %51 = arith.truncf %50 : vector<4x288xf32> to vector<4x288xbf16>
    %c0_32 = arith.constant 0 : index
    %c0_33 = arith.constant 0 : index
    %c0_34 = arith.constant 0 : index
    %52 = vector.load %arg5[%c0_32, %c0_33, %c0_34] : memref<1x4x288xbf16, #tpu.memory_space<vmem>>, vector<1x4x288xbf16>
    %53 = vector.shape_cast %52 : vector<1x4x288xbf16> to vector<4x288xbf16>
    %54 = vector.shape_cast %51 : vector<4x288xbf16> to vector<1x4x288xbf16>
    tpu.vector_store %arg5[%c0_32, %c0_33, %c0_34], %54 {strides = array<i32>} : memref<1x4x288xbf16, #tpu.memory_space<vmem>>, vector<1x4x288xbf16>,
    return
  }
  func.func @transform_0(%arg0: i32, %arg1: i32) -> (i32, i32, i32) {
    %c0_i32 = arith.constant 0 : i32
    %c0_i32_0 = arith.constant 0 : i32
    %c0_i32_1 = arith.constant 0 : i32
    return %arg0, %c0_i32, %c0_i32_0 : i32, i32, i32
  }
  func.func @transform_1(%arg0: i32, %arg1: i32) -> (i32, i32, i32) {
    %c0_i32 = arith.constant 0 : i32
    %c0_i32_0 = arith.constant 0 : i32
    %c0_i32_1 = arith.constant 0 : i32
    return %c0_i32, %arg1, %c0_i32_0 : i32, i32, i32
  }
  func.func @transform_2(%arg0: i32, %arg1: i32) -> (i32, i32) {
    %c0_i32 = arith.constant 0 : i32
    %c0_i32_0 = arith.constant 0 : i32
    return %arg1, %c0_i32 : i32, i32
  }
  func.func @transform_3(%arg0: i32, %arg1: i32) -> (i32, i32, i32) {
    %c0_i32 = arith.constant 0 : i32
    %c0_i32_0 = arith.constant 0 : i32
    return %arg0, %arg1, %c0_i32 : i32, i32, i32
  }
}

module attributes {stable_mosaic.version = 11 : i64} {
  func.func @_unpool_kernel(%arg0: i32, %arg1: memref<128x18xbf16, #tpu.memory_space<vmem>>, %arg2: memref<128x16xi32, #tpu.memory_space<vmem>>, %arg3: memref<128x1xi32, #tpu.memory_space<vmem>>, %arg4: memref<128x64xbf16, #tpu.memory_space<vmem>>) attributes {dimension_semantics = [#tpu.dimension_semantics<parallel>], iteration_bounds = array<i64: 1>, scalar_prefetch = 0 : i64, scratch_operands = 0 : i64, tpu.core_type = #tpu.core_type<tc>, window_params = [{transform_indices = @transform_0, window_bounds = array<i64: 128, 18>}, {transform_indices = @transform_1, window_bounds = array<i64: 128, 16>}, {transform_indices = @transform_2, window_bounds = array<i64: 128, 1>}, {transform_indices = @transform_3, window_bounds = array<i64: 128, 64>}]} {
    %c0 = arith.constant 0 : index
    %c0_0 = arith.constant 0 : index
    %0 = vector.load %arg1[%c0, %c0_0] : memref<128x18xbf16, #tpu.memory_space<vmem>>, vector<128x16xbf16>
    %1 = tpu.iota {dimensions = array<i32: 1>} : vector<128x16xi32>
    %c0_1 = arith.constant 0 : index
    %c0_2 = arith.constant 0 : index
    %2 = vector.load %arg2[%c0_1, %c0_2] : memref<128x16xi32, #tpu.memory_space<vmem>>, vector<128x16xi32>
    %c0_3 = arith.constant 0 : index
    %c0_4 = arith.constant 0 : index
    %3 = vector.load %arg3[%c0_3, %c0_4] : memref<128x1xi32, #tpu.memory_space<vmem>>, vector<128x1xi32>
    %c2_i32 = arith.constant 2 : i32
    %4 = vector.broadcast %c2_i32 : i32 to vector<128x16xi32>
    %5 = arith.muli %4, %1 : vector<128x16xi32>
    %6 = vector.broadcast %3 : vector<128x1xi32> to vector<128x16xi32>
    %7 = arith.addi %6, %5 : vector<128x16xi32>
    %8 = arith.subi %2, %7 : vector<128x16xi32>
    %cst = arith.constant 0.000000e+00 : bf16
    %9 = vector.broadcast %cst : bf16 to vector<128x16xbf16>
    %c0_i32 = arith.constant 0 : i32
    %10 = vector.broadcast %c0_i32 : i32 to vector<128x16xi32>
    %11 = arith.cmpi eq, %8, %10 : vector<128x16xi32>
    %12 = arith.select %11, %0, %9 : vector<128x16xi1>, vector<128x16xbf16>
    %c1_i32 = arith.constant 1 : i32
    %13 = vector.broadcast %c1_i32 : i32 to vector<128x16xi32>
    %14 = arith.cmpi eq, %8, %13 : vector<128x16xi32>
    %15 = arith.select %14, %0, %9 : vector<128x16xi1>, vector<128x16xbf16>
    %c32_i32 = arith.constant 32 : i32
    %16 = vector.broadcast %c32_i32 : i32 to vector<128x16xi32>
    %17 = arith.cmpi eq, %8, %16 : vector<128x16xi32>
    %18 = arith.select %17, %0, %9 : vector<128x16xi1>, vector<128x16xbf16>
    %c33_i32 = arith.constant 33 : i32
    %19 = vector.broadcast %c33_i32 : i32 to vector<128x16xi32>
    %20 = arith.cmpi eq, %8, %19 : vector<128x16xi32>
    %21 = arith.select %20, %0, %9 : vector<128x16xi1>, vector<128x16xbf16>
    %22 = tpu.iota {dimensions = array<i32: 0>} : vector<16x32xi32>
    %23 = tpu.iota {dimensions = array<i32: 1>} : vector<16x32xi32>
    %c2_i32_5 = arith.constant 2 : i32
    %24 = vector.broadcast %c2_i32_5 : i32 to vector<16x32xi32>
    %25 = arith.muli %24, %22 : vector<16x32xi32>
    %26 = arith.cmpi eq, %23, %25 : vector<16x32xi32>
    %27 = arith.extui %26 : vector<16x32xi1> to vector<16x32xi32>
    %28 = arith.sitofp %27 : vector<16x32xi32> to vector<16x32xf32>
    %29 = arith.truncf %28 : vector<16x32xf32> to vector<16x32xbf16>
    %c2_i32_6 = arith.constant 2 : i32
    %30 = vector.broadcast %c2_i32_6 : i32 to vector<16x32xi32>
    %31 = arith.muli %30, %22 : vector<16x32xi32>
    %c1_i32_7 = arith.constant 1 : i32
    %32 = vector.broadcast %c1_i32_7 : i32 to vector<16x32xi32>
    %33 = arith.addi %31, %32 : vector<16x32xi32>
    %34 = arith.cmpi eq, %23, %33 : vector<16x32xi32>
    %35 = arith.extui %34 : vector<16x32xi1> to vector<16x32xi32>
    %36 = arith.sitofp %35 : vector<16x32xi32> to vector<16x32xf32>
    %37 = arith.truncf %36 : vector<16x32xf32> to vector<16x32xbf16>
    %cst_8 = arith.constant dense<0.000000e+00> : vector<128x32xf32>
    %38 = tpu.matmul %12, %29, %cst_8 {dimension_numbers = #tpu.dot_dimension_numbers<[1], [0], [0], [1], [0, 0, 1, 1], [], []>} : vector<128x16xbf16>, vector<16x32xbf16>, vector<128x32xf32> -> vector<128x32xf32>
    %cst_9 = arith.constant dense<0.000000e+00> : vector<128x32xf32>
    %39 = tpu.matmul %15, %37, %cst_9 {dimension_numbers = #tpu.dot_dimension_numbers<[1], [0], [0], [1], [0, 0, 1, 1], [], []>} : vector<128x16xbf16>, vector<16x32xbf16>, vector<128x32xf32> -> vector<128x32xf32>
    %40 = arith.addf %38, %39 : vector<128x32xf32>
    %cst_10 = arith.constant dense<0.000000e+00> : vector<128x32xf32>
    %41 = tpu.matmul %18, %29, %cst_10 {dimension_numbers = #tpu.dot_dimension_numbers<[1], [0], [0], [1], [0, 0, 1, 1], [], []>} : vector<128x16xbf16>, vector<16x32xbf16>, vector<128x32xf32> -> vector<128x32xf32>
    %cst_11 = arith.constant dense<0.000000e+00> : vector<128x32xf32>
    %42 = tpu.matmul %21, %37, %cst_11 {dimension_numbers = #tpu.dot_dimension_numbers<[1], [0], [0], [1], [0, 0, 1, 1], [], []>} : vector<128x16xbf16>, vector<16x32xbf16>, vector<128x32xf32> -> vector<128x32xf32>
    %43 = arith.addf %41, %42 : vector<128x32xf32>
    %44 = arith.truncf %40 : vector<128x32xf32> to vector<128x32xbf16>
    %c0_12 = arith.constant 0 : index
    %c0_13 = arith.constant 0 : index
    %45 = vector.load %arg4[%c0_12, %c0_13] : memref<128x64xbf16, #tpu.memory_space<vmem>>, vector<128x32xbf16>
    tpu.vector_store %arg4[%c0_12, %c0_13], %44 {strides = array<i32>} : memref<128x64xbf16, #tpu.memory_space<vmem>>, vector<128x32xbf16>,
    %46 = arith.truncf %43 : vector<128x32xf32> to vector<128x32xbf16>
    %c0_14 = arith.constant 0 : index
    %c32 = arith.constant 32 : index
    %47 = vector.load %arg4[%c0_14, %c32] : memref<128x64xbf16, #tpu.memory_space<vmem>>, vector<128x32xbf16>
    tpu.vector_store %arg4[%c0_14, %c32], %46 {strides = array<i32>} : memref<128x64xbf16, #tpu.memory_space<vmem>>, vector<128x32xbf16>,
    return
  }
  func.func @transform_0(%arg0: i32) -> (i32, i32) {
    %c0_i32 = arith.constant 0 : i32
    %c0_i32_0 = arith.constant 0 : i32
    return %arg0, %c0_i32 : i32, i32
  }
  func.func @transform_1(%arg0: i32) -> (i32, i32) {
    %c0_i32 = arith.constant 0 : i32
    %c0_i32_0 = arith.constant 0 : i32
    return %arg0, %c0_i32 : i32, i32
  }
  func.func @transform_2(%arg0: i32) -> (i32, i32) {
    %c0_i32 = arith.constant 0 : i32
    %c0_i32_0 = arith.constant 0 : i32
    return %arg0, %c0_i32 : i32, i32
  }
  func.func @transform_3(%arg0: i32) -> (i32, i32) {
    %c0_i32 = arith.constant 0 : i32
    %c0_i32_0 = arith.constant 0 : i32
    return %arg0, %c0_i32 : i32, i32
  }
}

module attributes {stable_mosaic.version = 11 : i64} {
  func.func @_conv3x3_relu_kernel(%arg0: i32, %arg1: i32, %arg2: memref<1x4x1190xbf16, #tpu.memory_space<vmem>>, %arg3: memref<9x3x4xbf16, #tpu.memory_space<vmem>>, %arg4: memref<3x1xf32, #tpu.memory_space<vmem>>, %arg5: memref<1x3x1088xbf16, #tpu.memory_space<vmem>>) attributes {dimension_semantics = [#tpu.dimension_semantics<parallel>, #tpu.dimension_semantics<parallel>], iteration_bounds = array<i64: 2, 1>, scalar_prefetch = 0 : i64, scratch_operands = 0 : i64, tpu.core_type = #tpu.core_type<tc>, window_params = [{transform_indices = @transform_0, window_bounds = array<i64: 1, 4, 1190>}, {transform_indices = @transform_1, window_bounds = array<i64: 9, 3, 4>}, {transform_indices = @transform_2, window_bounds = array<i64: 3, 1>}, {transform_indices = @transform_3, window_bounds = array<i64: 1, 3, 1088>}]} {
    %c0 = arith.constant 0 : index
    %c0_0 = arith.constant 0 : index
    %c0_1 = arith.constant 0 : index
    %0 = vector.load %arg2[%c0, %c0_0, %c0_1] : memref<1x4x1190xbf16, #tpu.memory_space<vmem>>, vector<1x4x1190xbf16>
    %1 = vector.shape_cast %0 : vector<1x4x1190xbf16> to vector<4x1190xbf16>
    %c0_2 = arith.constant 0 : index
    %c0_3 = arith.constant 0 : index
    %c0_4 = arith.constant 0 : index
    %2 = vector.load %arg3[%c0_2, %c0_3, %c0_4] : memref<9x3x4xbf16, #tpu.memory_space<vmem>>, vector<1x3x4xbf16>
    %3 = vector.shape_cast %2 : vector<1x3x4xbf16> to vector<3x4xbf16>
    %4 = vector.extract_strided_slice %1 {offsets = [0, 0], sizes = [4, 1088], strides = [1, 1]} : vector<4x1190xbf16> to vector<4x1088xbf16>
    %cst = arith.constant dense<0.000000e+00> : vector<3x1088xf32>
    %5 = tpu.matmul %3, %4, %cst {dimension_numbers = #tpu.dot_dimension_numbers<[1], [0], [0], [1], [0, 0, 1, 1], [], []>} : vector<3x4xbf16>, vector<4x1088xbf16>, vector<3x1088xf32> -> vector<3x1088xf32>
    %c0_5 = arith.constant 0 : index
    %c0_6 = arith.constant 0 : index
    %6 = vector.load %arg4[%c0_5, %c0_6] : memref<3x1xf32, #tpu.memory_space<vmem>>, vector<3x1xf32>
    %7 = vector.broadcast %6 : vector<3x1xf32> to vector<3x1088xf32>
    %8 = arith.addf %5, %7 : vector<3x1088xf32>
    %c1 = arith.constant 1 : index
    %c0_7 = arith.constant 0 : index
    %c0_8 = arith.constant 0 : index
    %9 = vector.load %arg3[%c1, %c0_7, %c0_8] : memref<9x3x4xbf16, #tpu.memory_space<vmem>>, vector<1x3x4xbf16>
    %10 = vector.shape_cast %9 : vector<1x3x4xbf16> to vector<3x4xbf16>
    %11 = vector.extract_strided_slice %1 {offsets = [0, 1], sizes = [4, 1088], strides = [1, 1]} : vector<4x1190xbf16> to vector<4x1088xbf16>
    %cst_9 = arith.constant dense<0.000000e+00> : vector<3x1088xf32>
    %12 = tpu.matmul %10, %11, %cst_9 {dimension_numbers = #tpu.dot_dimension_numbers<[1], [0], [0], [1], [0, 0, 1, 1], [], []>} : vector<3x4xbf16>, vector<4x1088xbf16>, vector<3x1088xf32> -> vector<3x1088xf32>
    %13 = arith.addf %8, %12 : vector<3x1088xf32>
    %c2 = arith.constant 2 : index
    %c0_10 = arith.constant 0 : index
    %c0_11 = arith.constant 0 : index
    %14 = vector.load %arg3[%c2, %c0_10, %c0_11] : memref<9x3x4xbf16, #tpu.memory_space<vmem>>, vector<1x3x4xbf16>
    %15 = vector.shape_cast %14 : vector<1x3x4xbf16> to vector<3x4xbf16>
    %16 = vector.extract_strided_slice %1 {offsets = [0, 2], sizes = [4, 1088], strides = [1, 1]} : vector<4x1190xbf16> to vector<4x1088xbf16>
    %cst_12 = arith.constant dense<0.000000e+00> : vector<3x1088xf32>
    %17 = tpu.matmul %15, %16, %cst_12 {dimension_numbers = #tpu.dot_dimension_numbers<[1], [0], [0], [1], [0, 0, 1, 1], [], []>} : vector<3x4xbf16>, vector<4x1088xbf16>, vector<3x1088xf32> -> vector<3x1088xf32>
    %18 = arith.addf %13, %17 : vector<3x1088xf32>
    %c3 = arith.constant 3 : index
    %c0_13 = arith.constant 0 : index
    %c0_14 = arith.constant 0 : index
    %19 = vector.load %arg3[%c3, %c0_13, %c0_14] : memref<9x3x4xbf16, #tpu.memory_space<vmem>>, vector<1x3x4xbf16>
    %20 = vector.shape_cast %19 : vector<1x3x4xbf16> to vector<3x4xbf16>
    %21 = vector.extract_strided_slice %1 {offsets = [0, 34], sizes = [4, 1088], strides = [1, 1]} : vector<4x1190xbf16> to vector<4x1088xbf16>
    %cst_15 = arith.constant dense<0.000000e+00> : vector<3x1088xf32>
    %22 = tpu.matmul %20, %21, %cst_15 {dimension_numbers = #tpu.dot_dimension_numbers<[1], [0], [0], [1], [0, 0, 1, 1], [], []>} : vector<3x4xbf16>, vector<4x1088xbf16>, vector<3x1088xf32> -> vector<3x1088xf32>
    %23 = arith.addf %18, %22 : vector<3x1088xf32>
    %c4 = arith.constant 4 : index
    %c0_16 = arith.constant 0 : index
    %c0_17 = arith.constant 0 : index
    %24 = vector.load %arg3[%c4, %c0_16, %c0_17] : memref<9x3x4xbf16, #tpu.memory_space<vmem>>, vector<1x3x4xbf16>
    %25 = vector.shape_cast %24 : vector<1x3x4xbf16> to vector<3x4xbf16>
    %26 = vector.extract_strided_slice %1 {offsets = [0, 35], sizes = [4, 1088], strides = [1, 1]} : vector<4x1190xbf16> to vector<4x1088xbf16>
    %cst_18 = arith.constant dense<0.000000e+00> : vector<3x1088xf32>
    %27 = tpu.matmul %25, %26, %cst_18 {dimension_numbers = #tpu.dot_dimension_numbers<[1], [0], [0], [1], [0, 0, 1, 1], [], []>} : vector<3x4xbf16>, vector<4x1088xbf16>, vector<3x1088xf32> -> vector<3x1088xf32>
    %28 = arith.addf %23, %27 : vector<3x1088xf32>
    %c5 = arith.constant 5 : index
    %c0_19 = arith.constant 0 : index
    %c0_20 = arith.constant 0 : index
    %29 = vector.load %arg3[%c5, %c0_19, %c0_20] : memref<9x3x4xbf16, #tpu.memory_space<vmem>>, vector<1x3x4xbf16>
    %30 = vector.shape_cast %29 : vector<1x3x4xbf16> to vector<3x4xbf16>
    %31 = vector.extract_strided_slice %1 {offsets = [0, 36], sizes = [4, 1088], strides = [1, 1]} : vector<4x1190xbf16> to vector<4x1088xbf16>
    %cst_21 = arith.constant dense<0.000000e+00> : vector<3x1088xf32>
    %32 = tpu.matmul %30, %31, %cst_21 {dimension_numbers = #tpu.dot_dimension_numbers<[1], [0], [0], [1], [0, 0, 1, 1], [], []>} : vector<3x4xbf16>, vector<4x1088xbf16>, vector<3x1088xf32> -> vector<3x1088xf32>
    %33 = arith.addf %28, %32 : vector<3x1088xf32>
    %c6 = arith.constant 6 : index
    %c0_22 = arith.constant 0 : index
    %c0_23 = arith.constant 0 : index
    %34 = vector.load %arg3[%c6, %c0_22, %c0_23] : memref<9x3x4xbf16, #tpu.memory_space<vmem>>, vector<1x3x4xbf16>
    %35 = vector.shape_cast %34 : vector<1x3x4xbf16> to vector<3x4xbf16>
    %36 = vector.extract_strided_slice %1 {offsets = [0, 68], sizes = [4, 1088], strides = [1, 1]} : vector<4x1190xbf16> to vector<4x1088xbf16>
    %cst_24 = arith.constant dense<0.000000e+00> : vector<3x1088xf32>
    %37 = tpu.matmul %35, %36, %cst_24 {dimension_numbers = #tpu.dot_dimension_numbers<[1], [0], [0], [1], [0, 0, 1, 1], [], []>} : vector<3x4xbf16>, vector<4x1088xbf16>, vector<3x1088xf32> -> vector<3x1088xf32>
    %38 = arith.addf %33, %37 : vector<3x1088xf32>
    %c7 = arith.constant 7 : index
    %c0_25 = arith.constant 0 : index
    %c0_26 = arith.constant 0 : index
    %39 = vector.load %arg3[%c7, %c0_25, %c0_26] : memref<9x3x4xbf16, #tpu.memory_space<vmem>>, vector<1x3x4xbf16>
    %40 = vector.shape_cast %39 : vector<1x3x4xbf16> to vector<3x4xbf16>
    %41 = vector.extract_strided_slice %1 {offsets = [0, 69], sizes = [4, 1088], strides = [1, 1]} : vector<4x1190xbf16> to vector<4x1088xbf16>
    %cst_27 = arith.constant dense<0.000000e+00> : vector<3x1088xf32>
    %42 = tpu.matmul %40, %41, %cst_27 {dimension_numbers = #tpu.dot_dimension_numbers<[1], [0], [0], [1], [0, 0, 1, 1], [], []>} : vector<3x4xbf16>, vector<4x1088xbf16>, vector<3x1088xf32> -> vector<3x1088xf32>
    %43 = arith.addf %38, %42 : vector<3x1088xf32>
    %c8 = arith.constant 8 : index
    %c0_28 = arith.constant 0 : index
    %c0_29 = arith.constant 0 : index
    %44 = vector.load %arg3[%c8, %c0_28, %c0_29] : memref<9x3x4xbf16, #tpu.memory_space<vmem>>, vector<1x3x4xbf16>
    %45 = vector.shape_cast %44 : vector<1x3x4xbf16> to vector<3x4xbf16>
    %46 = vector.extract_strided_slice %1 {offsets = [0, 70], sizes = [4, 1088], strides = [1, 1]} : vector<4x1190xbf16> to vector<4x1088xbf16>
    %cst_30 = arith.constant dense<0.000000e+00> : vector<3x1088xf32>
    %47 = tpu.matmul %45, %46, %cst_30 {dimension_numbers = #tpu.dot_dimension_numbers<[1], [0], [0], [1], [0, 0, 1, 1], [], []>} : vector<3x4xbf16>, vector<4x1088xbf16>, vector<3x1088xf32> -> vector<3x1088xf32>
    %48 = arith.addf %43, %47 : vector<3x1088xf32>
    %cst_31 = arith.constant 0.000000e+00 : f32
    %49 = vector.broadcast %cst_31 : f32 to vector<3x1088xf32>
    %50 = arith.maximumf %48, %49 : vector<3x1088xf32>
    %51 = arith.truncf %50 : vector<3x1088xf32> to vector<3x1088xbf16>
    %c0_32 = arith.constant 0 : index
    %c0_33 = arith.constant 0 : index
    %c0_34 = arith.constant 0 : index
    %52 = vector.load %arg5[%c0_32, %c0_33, %c0_34] : memref<1x3x1088xbf16, #tpu.memory_space<vmem>>, vector<1x3x1088xbf16>
    %53 = vector.shape_cast %52 : vector<1x3x1088xbf16> to vector<3x1088xbf16>
    %54 = vector.shape_cast %51 : vector<3x1088xbf16> to vector<1x3x1088xbf16>
    tpu.vector_store %arg5[%c0_32, %c0_33, %c0_34], %54 {strides = array<i32>} : memref<1x3x1088xbf16, #tpu.memory_space<vmem>>, vector<1x3x1088xbf16>,
    return
  }
  func.func @transform_0(%arg0: i32, %arg1: i32) -> (i32, i32, i32) {
    %c0_i32 = arith.constant 0 : i32
    %c0_i32_0 = arith.constant 0 : i32
    %c0_i32_1 = arith.constant 0 : i32
    return %arg0, %c0_i32, %c0_i32_0 : i32, i32, i32
  }
  func.func @transform_1(%arg0: i32, %arg1: i32) -> (i32, i32, i32) {
    %c0_i32 = arith.constant 0 : i32
    %c0_i32_0 = arith.constant 0 : i32
    %c0_i32_1 = arith.constant 0 : i32
    return %c0_i32, %arg1, %c0_i32_0 : i32, i32, i32
  }
  func.func @transform_2(%arg0: i32, %arg1: i32) -> (i32, i32) {
    %c0_i32 = arith.constant 0 : i32
    %c0_i32_0 = arith.constant 0 : i32
    return %arg1, %c0_i32 : i32, i32
  }
  func.func @transform_3(%arg0: i32, %arg1: i32) -> (i32, i32, i32) {
    %c0_i32 = arith.constant 0 : i32
    %c0_i32_0 = arith.constant 0 : i32
    return %arg0, %arg1, %c0_i32 : i32, i32, i32
  }
}

module attributes {stable_mosaic.version = 11 : i64} {
  func.func @_unpool_kernel(%arg0: i32, %arg1: memref<192x34xbf16, #tpu.memory_space<vmem>>, %arg2: memref<192x32xi32, #tpu.memory_space<vmem>>, %arg3: memref<192x1xi32, #tpu.memory_space<vmem>>, %arg4: memref<192x128xf32, #tpu.memory_space<vmem>>) attributes {dimension_semantics = [#tpu.dimension_semantics<parallel>], iteration_bounds = array<i64: 1>, scalar_prefetch = 0 : i64, scratch_operands = 0 : i64, tpu.core_type = #tpu.core_type<tc>, window_params = [{transform_indices = @transform_0, window_bounds = array<i64: 192, 34>}, {transform_indices = @transform_1, window_bounds = array<i64: 192, 32>}, {transform_indices = @transform_2, window_bounds = array<i64: 192, 1>}, {transform_indices = @transform_3, window_bounds = array<i64: 192, 128>}]} {
    %c0 = arith.constant 0 : index
    %c0_0 = arith.constant 0 : index
    %0 = vector.load %arg1[%c0, %c0_0] : memref<192x34xbf16, #tpu.memory_space<vmem>>, vector<192x32xbf16>
    %1 = tpu.iota {dimensions = array<i32: 1>} : vector<192x32xi32>
    %c0_1 = arith.constant 0 : index
    %c0_2 = arith.constant 0 : index
    %2 = vector.load %arg2[%c0_1, %c0_2] : memref<192x32xi32, #tpu.memory_space<vmem>>, vector<192x32xi32>
    %c0_3 = arith.constant 0 : index
    %c0_4 = arith.constant 0 : index
    %3 = vector.load %arg3[%c0_3, %c0_4] : memref<192x1xi32, #tpu.memory_space<vmem>>, vector<192x1xi32>
    %c2_i32 = arith.constant 2 : i32
    %4 = vector.broadcast %c2_i32 : i32 to vector<192x32xi32>
    %5 = arith.muli %4, %1 : vector<192x32xi32>
    %6 = vector.broadcast %3 : vector<192x1xi32> to vector<192x32xi32>
    %7 = arith.addi %6, %5 : vector<192x32xi32>
    %8 = arith.subi %2, %7 : vector<192x32xi32>
    %cst = arith.constant 0.000000e+00 : bf16
    %9 = vector.broadcast %cst : bf16 to vector<192x32xbf16>
    %c0_i32 = arith.constant 0 : i32
    %10 = vector.broadcast %c0_i32 : i32 to vector<192x32xi32>
    %11 = arith.cmpi eq, %8, %10 : vector<192x32xi32>
    %12 = arith.select %11, %0, %9 : vector<192x32xi1>, vector<192x32xbf16>
    %c1_i32 = arith.constant 1 : i32
    %13 = vector.broadcast %c1_i32 : i32 to vector<192x32xi32>
    %14 = arith.cmpi eq, %8, %13 : vector<192x32xi32>
    %15 = arith.select %14, %0, %9 : vector<192x32xi1>, vector<192x32xbf16>
    %c64_i32 = arith.constant 64 : i32
    %16 = vector.broadcast %c64_i32 : i32 to vector<192x32xi32>
    %17 = arith.cmpi eq, %8, %16 : vector<192x32xi32>
    %18 = arith.select %17, %0, %9 : vector<192x32xi1>, vector<192x32xbf16>
    %c65_i32 = arith.constant 65 : i32
    %19 = vector.broadcast %c65_i32 : i32 to vector<192x32xi32>
    %20 = arith.cmpi eq, %8, %19 : vector<192x32xi32>
    %21 = arith.select %20, %0, %9 : vector<192x32xi1>, vector<192x32xbf16>
    %22 = tpu.iota {dimensions = array<i32: 0>} : vector<32x64xi32>
    %23 = tpu.iota {dimensions = array<i32: 1>} : vector<32x64xi32>
    %c2_i32_5 = arith.constant 2 : i32
    %24 = vector.broadcast %c2_i32_5 : i32 to vector<32x64xi32>
    %25 = arith.muli %24, %22 : vector<32x64xi32>
    %26 = arith.cmpi eq, %23, %25 : vector<32x64xi32>
    %27 = arith.extui %26 : vector<32x64xi1> to vector<32x64xi32>
    %28 = arith.sitofp %27 : vector<32x64xi32> to vector<32x64xf32>
    %29 = arith.truncf %28 : vector<32x64xf32> to vector<32x64xbf16>
    %c2_i32_6 = arith.constant 2 : i32
    %30 = vector.broadcast %c2_i32_6 : i32 to vector<32x64xi32>
    %31 = arith.muli %30, %22 : vector<32x64xi32>
    %c1_i32_7 = arith.constant 1 : i32
    %32 = vector.broadcast %c1_i32_7 : i32 to vector<32x64xi32>
    %33 = arith.addi %31, %32 : vector<32x64xi32>
    %34 = arith.cmpi eq, %23, %33 : vector<32x64xi32>
    %35 = arith.extui %34 : vector<32x64xi1> to vector<32x64xi32>
    %36 = arith.sitofp %35 : vector<32x64xi32> to vector<32x64xf32>
    %37 = arith.truncf %36 : vector<32x64xf32> to vector<32x64xbf16>
    %cst_8 = arith.constant dense<0.000000e+00> : vector<192x64xf32>
    %38 = tpu.matmul %12, %29, %cst_8 {dimension_numbers = #tpu.dot_dimension_numbers<[1], [0], [0], [1], [0, 0, 1, 1], [], []>} : vector<192x32xbf16>, vector<32x64xbf16>, vector<192x64xf32> -> vector<192x64xf32>
    %cst_9 = arith.constant dense<0.000000e+00> : vector<192x64xf32>
    %39 = tpu.matmul %15, %37, %cst_9 {dimension_numbers = #tpu.dot_dimension_numbers<[1], [0], [0], [1], [0, 0, 1, 1], [], []>} : vector<192x32xbf16>, vector<32x64xbf16>, vector<192x64xf32> -> vector<192x64xf32>
    %40 = arith.addf %38, %39 : vector<192x64xf32>
    %cst_10 = arith.constant dense<0.000000e+00> : vector<192x64xf32>
    %41 = tpu.matmul %18, %29, %cst_10 {dimension_numbers = #tpu.dot_dimension_numbers<[1], [0], [0], [1], [0, 0, 1, 1], [], []>} : vector<192x32xbf16>, vector<32x64xbf16>, vector<192x64xf32> -> vector<192x64xf32>
    %cst_11 = arith.constant dense<0.000000e+00> : vector<192x64xf32>
    %42 = tpu.matmul %21, %37, %cst_11 {dimension_numbers = #tpu.dot_dimension_numbers<[1], [0], [0], [1], [0, 0, 1, 1], [], []>} : vector<192x32xbf16>, vector<32x64xbf16>, vector<192x64xf32> -> vector<192x64xf32>
    %43 = arith.addf %41, %42 : vector<192x64xf32>
    %c0_12 = arith.constant 0 : index
    %c0_13 = arith.constant 0 : index
    %44 = vector.load %arg4[%c0_12, %c0_13] : memref<192x128xf32, #tpu.memory_space<vmem>>, vector<192x64xf32>
    tpu.vector_store %arg4[%c0_12, %c0_13], %40 {strides = array<i32>} : memref<192x128xf32, #tpu.memory_space<vmem>>, vector<192x64xf32>,
    %c0_14 = arith.constant 0 : index
    %c64 = arith.constant 64 : index
    %45 = vector.load %arg4[%c0_14, %c64] : memref<192x128xf32, #tpu.memory_space<vmem>>, vector<192x64xf32>
    tpu.vector_store %arg4[%c0_14, %c64], %43 {strides = array<i32>} : memref<192x128xf32, #tpu.memory_space<vmem>>, vector<192x64xf32>,
    return
  }
  func.func @transform_0(%arg0: i32) -> (i32, i32) {
    %c0_i32 = arith.constant 0 : i32
    %c0_i32_0 = arith.constant 0 : i32
    return %arg0, %c0_i32 : i32, i32
  }
  func.func @transform_1(%arg0: i32) -> (i32, i32) {
    %c0_i32 = arith.constant 0 : i32
    %c0_i32_0 = arith.constant 0 : i32
    return %arg0, %c0_i32 : i32, i32
  }
  func.func @transform_2(%arg0: i32) -> (i32, i32) {
    %c0_i32 = arith.constant 0 : i32
    %c0_i32_0 = arith.constant 0 : i32
    return %arg0, %c0_i32 : i32, i32
  }
  func.func @transform_3(%arg0: i32) -> (i32, i32) {
    %c0_i32 = arith.constant 0 : i32
    %c0_i32_0 = arith.constant 0 : i32
    return %arg0, %c0_i32 : i32, i32
  }
}

</mosaic_0001>

<bundles_post_ra>
// kernel: segnet_decoder_forward.4
= control target key start
LH: loop header
LB: loop body
LE: loop exit
PB: predicated region body
PF: predicated region fallthrough
CT: control target
= control target key end

     0   :  { %s1563_s12 = smov 0   ;;  %s1565_s13 = smov 0   ;;  %s1724_s0 = inlined_call_operand.vmem [shape: bf16[2,4,342], index: 0, kind: input, shape index: {}]   ;;  %s1725_s1 = inlined_call_operand.vmem [shape: bf16[9,4,4], index: 1, kind: input, shape index: {}]   ;;  %s1726_s2 = inlined_call_operand.vmem [shape: f32[4,1], index: 2, kind: input, shape index: {}]   ;;  %s1727_s3 = inlined_call_operand.vmem [shape: bf16[2,4,288], index: 3, kind: output, shape index: {}]  }
   0x1   :  { %s1567_s14 = smov 0  }
   0x2 LB: > { %s25_s15 = sadd.s32 1, %s1525_s13  ;;  %p1355_p0 = scmp.ge.s32.totalorder %s1529_s14, 1  ;;  %s1529_s14 = sphi %s1567_s14, %s13_s14   ;;  %s1525_s13 = sphi %s1565_s13, %s1729_s13   ;;  %s1521_s12 = sphi %s1563_s12, %s1728_s12  }
   0x3   : > { %p27_p1 = scmp.ge.s32.totalorder %s25_s15, 2  ;;  %p169_p2 = scmp.lt.s32.totalorder %s1529_s14, 3 }
   0x5   : > { %s1731_s15 = smov (%p27_p1, %s25_s15), 0  ;;  %p170_p3 = pnand %p1355_p0, %p169_p2 }
   0x6   : > { %p205_p4 = scmp.lt.s32.totalorder (!%p170_p3), %s1521_s12, 1  ;;  %s1535_s20 = smov (!%p170_p3), 127  }
   0x7   : > { %173 = sbr.rel (%p170_p3) target bundleno = 407 (0x197), region = 32  ;;  %s1536_s23 = smov (!%p170_p3), 126  }
   0x8   : > { %s1537_s24 = smov (!%p170_p3), 110   ;;  %s1538_s25 = smov (!%p170_p3), 109  }
   0x9   : > { %s1539_s26 = smov (!%p170_p3), 108   ;;  %s1540_s27 = smov (!%p170_p3), 92  }
   0xa   : > { %s1541_s28 = smov (!%p170_p3), 91   ;;  %s1542_s29 = smov (!%p170_p3), 90  }
   0xc   : > { %v241_v0 = vlaneseq  ;;  %v1531_v1 = vmov 1983009808   ;;  %v1532_v3 = vmov 0.0   ;;  %s1733_s12 = smov (!%p205_p4, %s1521_s12), 1  ;;  %vm1533_vm0 = vmmov 0  }
   0xd   : > { %v239_v2 = vunpack.c.l.s4 %v1531_v1  ;;  %1414 = vmatprep.subr.bf16.mxu1 %v1532_v3  ;;  %1416 = vmatprep.mubr.msk.bf16.mxu1 %vm1533_vm0, %v1532_v3  ;;  %v1534_v6 = vmov 0   ;;  %s1468_s16 = smul.u32 6, %s1733_s12  ;;  %vm257_vm1 = vcmask 1041408   ;;  %v229_v15 = vld [vmem:[%s1725_s1] sm:$0x3]  ;;  %vm253_vm2 = vcmask 31744  }
   0xe   : > { %v242_v4 = vshrl.u32 %v241_v0, 7  ;;  %299 = vmatprep.mubr.bf16.mxu0 %v1534_v6  ;;  %1505 = vset.pattern.permute.xlu0 %v1534_v6  ;;  %v230_v16 = vld [vmem:[%s1726_s2] sm:$0xf]  ;;  %vm356_vm3 = vcmask 1039360   ;;  %vm463_vm4 = vcmask 1031168   ;;  %vm570_vm5 = vcmask 900096  }
   0xf   : > { %v240_v5 = vunpack.c.0.s8 %v239_v2  ;;  %s209_s19 = scalar_lea.vmem %s1724_s0, %s1468_s16  ;;  %v1361_v21 = vld [vmem:[%s1725_s1 + $0x2] sm:$0x3]  ;;  %v1365_v33 = vld [vmem:[%s1725_s1 + $0x4] sm:$0x3]  ;;  %vm677_vm6 = vcmask 891904   ;;  %vm784_vm7 = vcmask 883712  }
  0x10   : > { %v228_v8 = vld [vmem:[%s209_s19] sm:$0x3f]  ;;  %v1369_v41 = vld [vmem:[%s1725_s1 + $0x6] sm:$0x3]  ;;  %v1373_v50 = vld [vmem:[%s1725_s1 + $0x8] sm:$0x3] }
  0x11   : > { %v1589_v7 = vsub.s32 %v240_v5, %v242_v4  ;;  %v237_v10 = vcombine.high %v228_v8, %v228_v8  ;;  %vm891_vm8 = vcmask 752640   ;;  %v1377_v60 = vld [vmem:[%s1725_s1 + $0xa] sm:$0x3]  ;;  %vm998_vm9 = vcmask 744448  }
  0x12   : > { %vm1105_vm10 = vcmask 736256   ;;  %vm1230_vm11 = vcmask 1043458   ;;  %vm1232_vm13 = vcmask 259076  }
  0x13   : > { %v244_v9 = vrot.slane %v228_v8, %v1589_v7  ;;  %v251_v11 = vrot.slane %v237_v10, %v1589_v7  ;;  %v1381_v8 = vld [vmem:[%s1725_s1 + $0xc] sm:$0x3]  ;;  %vm1231_vm12 = vmor %vm1230_vm11, %vm257_vm1 }
  0x14   : > { %vm1233_vm14 = vmor %vm1232_vm13, %vm1231_vm12 }
  0x15   : > { %350 = vrot.lane.b32.xlu0 %v244_v9, %s1535_s20  ;;  %v252_v12 = vcombine.high %v244_v9, %v244_v9  ;;  %v259_v13 = vsel %vm257_vm1, %v244_v9, 0  ;;  %354 = vrot.lane.b32.xlu1 %v251_v11, %s1535_s20  ;;  %v265_v14 = vsel %vm257_vm1, %v251_v11, 0 }
  0x16   : > { %1415 = vmatpush3.bf16.msra.mxu1 %v265_v14 }
  0x17   : > { %1358 = vmatprep.subr.msk.bf16.mxu0 %vm257_vm1, %v252_v12  ;;  %1420 = vmatprep.subr.bf16.mxu1 %v1532_v3 }
  0x18   : > { %282 = vmatpush1.bf16.msra.mxu0 %v259_v13 }
  0x19   : > { %352 = vrot.lane.b32.xlu0 %v252_v12, %s1535_s20  ;;  %457 = vrot.lane.b32.xlu1 %v244_v9, %s1536_s23 }
  0x1a   : > { %1417 = vmatmul.mubr.msk.bf16.vlgmr.msra.gmra.mxu1 %vm253_vm2, %v229_v15 }
  0x1b   : > { %1359 = vmatmul.mubr.msk.bf16.vlgmr.msra.gmra.mxu0 %vm253_vm2, %v229_v15  ;;  %1422 = vmatprep.mubr.msk.bf16.mxu1 %vm1533_vm0, %v1532_v3  ;;  %v1385_v15 = vld [vmem:[%s1725_s1 + $0xe] sm:$0x3] }
  0x1c   : > { %403 = vmatprep.mubr.bf16.mxu0 %v1534_v6 }
  0x1d   : > { %459 = vrot.lane.b32.xlu0 %v252_v12, %s1536_s23  ;;  %461 = vrot.lane.b32.xlu1 %v251_v11, %s1536_s23 }
  0x21   : > { %564 = vrot.lane.b32.xlu0 %v244_v9, %s1537_s24  ;;  %566 = vrot.lane.b32.xlu1 %v252_v12, %s1537_s24 }
  0x25   : > { %568 = vrot.lane.b32.xlu0 %v251_v11, %s1537_s24  ;;  %671 = vrot.lane.b32.xlu1 %v244_v9, %s1538_s25 }
  0x29   : > { %673 = vrot.lane.b32.xlu0 %v252_v12, %s1538_s25  ;;  %675 = vrot.lane.b32.xlu1 %v251_v11, %s1538_s25 }
  0x2d   : > { %778 = vrot.lane.b32.xlu0 %v244_v9, %s1539_s26  ;;  %780 = vrot.lane.b32.xlu1 %v252_v12, %s1539_s26 }
  0x31   : > { %782 = vrot.lane.b32.xlu0 %v251_v11, %s1539_s26  ;;  %885 = vrot.lane.b32.xlu1 %v244_v9, %s1540_s27 }
  0x35   : > { %887 = vrot.lane.b32.xlu0 %v252_v12, %s1540_s27  ;;  %889 = vrot.lane.b32.xlu1 %v251_v11, %s1540_s27 }
  0x39   : > { %992 = vrot.lane.b32.xlu0 %v244_v9, %s1541_s28  ;;  %994 = vrot.lane.b32.xlu1 %v252_v12, %s1541_s28 }
  0x3d   : > { %996 = vrot.lane.b32.xlu0 %v251_v11, %s1541_s28  ;;  %1099 = vrot.lane.b32.xlu1 %v244_v9, %s1542_s29  ;;  %s226_s28 = scalar_lea.vmem %s1727_s3, %s1468_s16 }
  0x41   : > { %1101 = vrot.lane.b32.xlu0 %v252_v12, %s1542_s29  ;;  %1103 = vrot.lane.b32.xlu1 %v251_v11, %s1542_s29 }
  0x45   : > { %233 = vperm.xlu0 %1505, %v230_v16  }
  0x87   : > { %v351_v17 = vpop.permute.xlu0 %350  ;;  %v355_v18 = vpop.permute.xlu1 %354 }
  0x88   : > { %v369_v19 = vsel %vm257_vm1, %v355_v18, 0 }
  0x89   : > { %1421 = vmatpush3.bf16.msra.mxu1 %v369_v19  ;;  %v1389_v19 = vld [vmem:[%s1725_s1 + $0x10] sm:$0x3] }
  0x8a   : > { %1426 = vmatprep.subr.bf16.mxu1 %v1532_v3 }
  0x8b   : > { %v353_v20 = vpop.permute.xlu0 %352  ;;  %v458_v25 = vpop.permute.xlu1 %457 }
  0x8c   : > { %v357_v22 = vsel %vm356_vm3, %v351_v17, %v353_v20  ;;  %v358_v23 = vsel %vm356_vm3, %v353_v20, %v355_v18  ;;  %1423 = vmatmul.mubr.msk.bf16.vlgmr.msra.gmra.mxu1 %vm253_vm2, %v1361_v21 }
  0x8d   : > { %v363_v24 = vsel %vm257_vm1, %v357_v22, 0  ;;  %1362 = vmatprep.subr.msk.bf16.mxu0 %vm257_vm1, %v358_v23  ;;  %1428 = vmatprep.mubr.msk.bf16.mxu1 %vm1533_vm0, %v1532_v3 }
  0x8e   : > { %386 = vmatpush1.bf16.msra.mxu0 %v363_v24 }
  0x8f   : > { %v460_v26 = vpop.permute.xlu0 %459  ;;  %v462_v28 = vpop.permute.xlu1 %461 }
  0x90   : > { %v464_v27 = vsel %vm463_vm4, %v458_v25, %v460_v26  ;;  %v465_v29 = vsel %vm463_vm4, %v460_v26, %v462_v28  ;;  %v476_v30 = vsel %vm257_vm1, %v462_v28, 0 }
  0x91   : > { %1363 = vmatmul.mubr.msk.bf16.vlgmr.msra.gmra.mxu0 %vm253_vm2, %v1361_v21  ;;  %v470_v31 = vsel %vm257_vm1, %v464_v27, 0  ;;  %1366 = vmatprep.subr.msk.bf16.mxu0 %vm257_vm1, %v465_v29 }
  0x92   : > { %510 = vmatprep.mubr.bf16.mxu0 %v1534_v6  ;;  %1427 = vmatpush3.bf16.msra.mxu1 %v476_v30 }
  0x93   : > { %v565_v32 = vpop.permute.xlu0 %564  ;;  %493 = vmatpush1.bf16.msra.mxu0 %v470_v31  ;;  %1432 = vmatprep.subr.bf16.mxu1 %v1532_v3  ;;  %v567_v34 = vpop.permute.xlu1 %566 }
  0x94   : > { %v571_v35 = vsel %vm570_vm5, %v565_v32, %v567_v34 }
  0x95   : > { %1429 = vmatmul.mubr.msk.bf16.vlgmr.msra.gmra.mxu1 %vm253_vm2, %v1365_v33  ;;  %v577_v37 = vsel %vm257_vm1, %v571_v35, 0 }
  0x96   : > { %1434 = vmatprep.mubr.msk.bf16.mxu1 %vm1533_vm0, %v1532_v3 }
  0x97   : > { %v569_v36 = vpop.permute.xlu0 %568  ;;  %v672_v40 = vpop.permute.xlu1 %671 }
  0x98   : > { %v583_v38 = vsel %vm257_vm1, %v569_v36, 0  ;;  %v572_v39 = vsel %vm570_vm5, %v567_v34, %v569_v36 }
  0x99   : > { %1367 = vmatmul.mubr.msk.bf16.vlgmr.msra.gmra.mxu0 %vm253_vm2, %v1365_v33  ;;  %1370 = vmatprep.subr.msk.bf16.mxu0 %vm257_vm1, %v572_v39 }
  0x9a   : > { %600 = vmatpush1.bf16.msra.mxu0 %v577_v37  ;;  %1433 = vmatpush3.bf16.msra.mxu1 %v583_v38 }
  0x9b   : > { %v674_v42 = vpop.permute.xlu0 %673  ;;  %617 = vmatprep.mubr.bf16.mxu0 %v1534_v6  ;;  %1438 = vmatprep.subr.bf16.mxu1 %v1532_v3  ;;  %v676_v44 = vpop.permute.xlu1 %675 }
  0x9c   : > { %v678_v43 = vsel %vm677_vm6, %v672_v40, %v674_v42  ;;  %v679_v45 = vsel %vm677_vm6, %v674_v42, %v676_v44  ;;  %v690_v46 = vsel %vm257_vm1, %v676_v44, 0 }
  0x9d   : > { %1435 = vmatmul.mubr.msk.bf16.vlgmr.msra.gmra.mxu1 %vm253_vm2, %v1369_v41  ;;  %v684_v47 = vsel %vm257_vm1, %v678_v43, 0  ;;  %1374 = vmatprep.subr.msk.bf16.mxu0 %vm257_vm1, %v679_v45 }
  0x9e   : > { %1439 = vmatpush3.bf16.msra.mxu1 %v690_v46  ;;  %1440 = vmatprep.mubr.msk.bf16.mxu1 %vm1533_vm0, %v1532_v3 }
  0x9f   : > { %v779_v48 = vpop.permute.xlu0 %778  ;;  %1444 = vmatprep.subr.bf16.mxu1 %v1532_v3  ;;  %v781_v49 = vpop.permute.xlu1 %780 }
  0xa0   : > { %v785_v53 = vsel %vm784_vm7, %v779_v48, %v781_v49 }
  0xa1   : > { %1371 = vmatmul.mubr.msk.bf16.vlgmr.msra.gmra.mxu0 %vm253_vm2, %v1369_v41  ;;  %v791_v56 = vsel %vm257_vm1, %v785_v53, 0 }
  0xa2   : > { %707 = vmatpush1.bf16.msra.mxu0 %v684_v47  ;;  %724 = vmatprep.mubr.bf16.mxu0 %v1534_v6 }
  0xa3   : > { %v783_v51 = vpop.permute.xlu0 %782  ;;  %v886_v55 = vpop.permute.xlu1 %885 }
  0xa4   : > { %v797_v52 = vsel %vm257_vm1, %v783_v51, 0  ;;  %v786_v54 = vsel %vm784_vm7, %v781_v49, %v783_v51 }
  0xa5   : > { %1378 = vmatprep.subr.msk.bf16.mxu0 %vm257_vm1, %v786_v54  ;;  %1441 = vmatmul.mubr.msk.bf16.vlgmr.msra.gmra.mxu1 %vm253_vm2, %v1373_v50 }
  0xa6   : > { %1445 = vmatpush3.bf16.msra.mxu1 %v797_v52  ;;  %1446 = vmatprep.mubr.msk.bf16.mxu1 %vm1533_vm0, %v1532_v3 }
  0xa7   : > { %v888_v57 = vpop.permute.xlu0 %887  ;;  %1450 = vmatprep.subr.bf16.mxu1 %v1532_v3  ;;  %v890_v58 = vpop.permute.xlu1 %889 }
  0xa8   : > { %v893_v59 = vsel %vm891_vm8, %v888_v57, %v890_v58  ;;  %v892_v62 = vsel %vm891_vm8, %v886_v55, %v888_v57  ;;  %v904_v63 = vsel %vm257_vm1, %v890_v58, 0 }
  0xa9   : > { %1375 = vmatmul.mubr.msk.bf16.vlgmr.msra.gmra.mxu0 %vm253_vm2, %v1373_v50  ;;  %v898_v1 = vsel %vm257_vm1, %v892_v62, 0 }
  0xaa   : > { %814 = vmatpush1.bf16.msra.mxu0 %v791_v56  ;;  %831 = vmatprep.mubr.bf16.mxu0 %v1534_v6 }
  0xab   : > { %1382 = vmatprep.subr.msk.bf16.mxu0 %vm257_vm1, %v893_v59  ;;  %v993_v61 = vpop.permute.xlu0 %992  ;;  %v995_v0 = vpop.permute.xlu1 %994 }
  0xac   : > { %v999_v10 = vsel %vm998_vm9, %v993_v61, %v995_v0 }
  0xad   : > { %1447 = vmatmul.mubr.msk.bf16.vlgmr.msra.gmra.mxu1 %vm253_vm2, %v1377_v60  ;;  %v1005_v13 = vsel %vm257_vm1, %v999_v10, 0 }
  0xae   : > { %1451 = vmatpush3.bf16.msra.mxu1 %v904_v63  ;;  %1452 = vmatprep.mubr.msk.bf16.mxu1 %vm1533_vm0, %v1532_v3 }
  0xaf   : > { %v997_v2 = vpop.permute.xlu0 %996  ;;  %1456 = vmatprep.subr.bf16.mxu1 %v1532_v3  ;;  %v1100_v5 = vpop.permute.xlu1 %1099 }
  0xb0   : > { %v1000_v4 = vsel %vm998_vm9, %v995_v0, %v997_v2  ;;  %v1011_v9 = vsel %vm257_vm1, %v997_v2, 0 }
  0xb1   : > { %1379 = vmatmul.mubr.msk.bf16.vlgmr.msra.gmra.mxu0 %vm253_vm2, %v1377_v60 }
  0xb2   : > { %921 = vmatpush1.bf16.msra.mxu0 %v898_v1  ;;  %938 = vmatprep.mubr.bf16.mxu0 %v1534_v6 }
  0xb3   : > { %1386 = vmatprep.subr.msk.bf16.mxu0 %vm257_vm1, %v1000_v4  ;;  %v1102_v11 = vpop.permute.xlu0 %1101  ;;  %v1104_v12 = vpop.permute.xlu1 %1103 }
  0xb4   : > { %v1107_v14 = vsel %vm1105_vm10, %v1102_v11, %v1104_v12  ;;  %v1106_v16 = vsel %vm1105_vm10, %v1100_v5, %v1102_v11  ;;  %v1118_v17 = vsel %vm257_vm1, %v1104_v12, 0 }
  0xb5   : > { %1453 = vmatmul.mubr.msk.bf16.vlgmr.msra.gmra.mxu1 %vm253_vm2, %v1381_v8  ;;  %v1112_v18 = vsel %vm257_vm1, %v1106_v16, 0 }
  0xb6   : > { %1457 = vmatpush3.bf16.msra.mxu1 %v1011_v9  ;;  %1458 = vmatprep.mubr.msk.bf16.mxu1 %vm1533_vm0, %v1532_v3 }
  0xb7   : > { %1462 = vmatprep.subr.bf16.mxu1 %v1532_v3 }
  0xb9   : > { %1383 = vmatmul.mubr.msk.bf16.vlgmr.msra.gmra.mxu0 %vm253_vm2, %v1381_v8 }
  0xba   : > { %1028 = vmatpush1.bf16.msra.mxu0 %v1005_v13  ;;  %1045 = vmatprep.mubr.bf16.mxu0 %v1534_v6 }
  0xbb   : > { %1390 = vmatprep.subr.msk.bf16.mxu0 %vm257_vm1, %v1107_v14 }
  0xbd   : > { %1459 = vmatmul.mubr.msk.bf16.vlgmr.msra.gmra.mxu1 %vm253_vm2, %v1385_v15 }
  0xbe   : > { %1463 = vmatpush3.bf16.msra.mxu1 %v1118_v17  ;;  %1464 = vmatprep.mubr.msk.bf16.mxu1 %vm1533_vm0, %v1532_v3 }
  0xc0   : > { %v234_v63 = vpop.permute.xlu0 %233 }
  0xc1   : > { %1387 = vmatmul.mubr.msk.bf16.vlgmr.msra.gmra.mxu0 %vm253_vm2, %v1385_v15 }
  0xc2   : > { %1135 = vmatpush1.bf16.msra.mxu0 %v1112_v18  ;;  %1152 = vmatprep.mubr.bf16.mxu0 %v1534_v6 }
  0xc5   : > { %1465 = vmatmul.mubr.msk.bf16.vlgmr.msra.gmra.mxu1 %vm253_vm2, %v1389_v19 }
  0xc9   : > { %1391 = vmatmul.mubr.msk.bf16.vlgmr.msra.gmra.mxu0 %vm253_vm2, %v1389_v19 }
  0xda   : > { %v342_v20 = vpop.f32.mrf.mxu1 }
  0xdb   : > { %v301_v21 = vpop.f32.mrf.mxu0  ;;  %v343_v1 = vadd.f32 %v342_v20, %v234_v63 }
  0xdc   : > { %v1418_v22 = vpop.f32.mrf.mxu1  ;;  %v302_v11 = vadd.f32 %v301_v21, %v234_v63 }
  0xdd   : > { %v303_v23 = vpop.f32.mrf.mxu0 }
  0xde   : > { %v345_v24 = vpop.f32.mrf.mxu1  ;;  %v304_v15 = vadd.f32 %v303_v23, %v234_v63 }
  0xdf   : > { %v305_v25 = vpop.f32.mrf.mxu0 }
  0xe0   : > { %v1419_v3 = vpop.f32.mrf.mxu1 }
  0xe1   : > { %v306_v26 = vpop.f32.mrf.mxu0 }
 0x14c   : > { %v446_v27 = vpop.f32.mrf.mxu1 }
 0x14d   : > { %v454_v9 = vadd.f32 %v446_v27, %v343_v1 }
 0x14e   : > { %v1424_v28 = vpop.f32.mrf.mxu1 }
 0x150   : > { %v449_v6 = vpop.f32.mrf.mxu1 }
 0x151   : > { %v405_v29 = vpop.f32.mrf.mxu0 }
 0x152   : > { %v1425_v31 = vpop.f32.mrf.mxu1  ;;  %v452_v16 = vadd.f32 %v405_v29, %v302_v11 }
 0x153   : > { %v407_v30 = vpop.f32.mrf.mxu0 }
 0x154   : > { %v453_v22 = vadd.f32 %v407_v30, %v304_v15 }
 0x155   : > { %v409_v32 = vpop.f32.mrf.mxu0  ;;  %v553_v33 = vpop.f32.mrf.mxu1 }
 0x156   : > { %v561_v13 = vadd.f32 %v553_v33, %v454_v9 }
 0x157   : > { %v410_v34 = vpop.f32.mrf.mxu0  ;;  %v1430_v35 = vpop.f32.mrf.mxu1 }
 0x159   : > { %v512_v36 = vpop.f32.mrf.mxu0  ;;  %v556_v37 = vpop.f32.mrf.mxu1 }
 0x15a   : > { %v559_v24 = vadd.f32 %v512_v36, %v452_v16 }
 0x15b   : > { %v514_v38 = vpop.f32.mrf.mxu0  ;;  %v1431_v39 = vpop.f32.mrf.mxu1 }
 0x15c   : > { %v560_v26 = vadd.f32 %v514_v38, %v453_v22 }
 0x15d   : > { %v516_v40 = vpop.f32.mrf.mxu0  ;;  %v660_v41 = vpop.f32.mrf.mxu1 }
 0x15e   : > { %v668_v18 = vadd.f32 %v660_v41, %v561_v13 }
 0x15f   : > { %v517_v42 = vpop.f32.mrf.mxu0  ;;  %v1436_v43 = vpop.f32.mrf.mxu1 }
 0x161   : > { %v619_v44 = vpop.f32.mrf.mxu0  ;;  %v663_v45 = vpop.f32.mrf.mxu1 }
 0x162   : > { %v666_v28 = vadd.f32 %v619_v44, %v559_v24 }
 0x163   : > { %v621_v46 = vpop.f32.mrf.mxu0  ;;  %v1437_v47 = vpop.f32.mrf.mxu1 }
 0x164   : > { %v667_v32 = vadd.f32 %v621_v46, %v560_v26 }
 0x165   : > { %v623_v48 = vpop.f32.mrf.mxu0  ;;  %v767_v49 = vpop.f32.mrf.mxu1 }
 0x166   : > { %v775_v3 = vadd.f32 %v767_v49, %v668_v18 }
 0x167   : > { %v624_v50 = vpop.f32.mrf.mxu0  ;;  %v1442_v51 = vpop.f32.mrf.mxu1 }
 0x169   : > { %v726_v52 = vpop.f32.mrf.mxu0  ;;  %v770_v53 = vpop.f32.mrf.mxu1 }
 0x16a   : > { %v773_v21 = vadd.f32 %v726_v52, %v666_v28 }
 0x16b   : > { %v728_v54 = vpop.f32.mrf.mxu0  ;;  %v1443_v55 = vpop.f32.mrf.mxu1 }
 0x16c   : > { %v774_v23 = vadd.f32 %v728_v54, %v667_v32 }
 0x16d   : > { %v730_v56 = vpop.f32.mrf.mxu0  ;;  %v874_v57 = vpop.f32.mrf.mxu1 }
 0x16e   : > { %v882_v31 = vadd.f32 %v874_v57, %v775_v3 }
 0x16f   : > { %v731_v58 = vpop.f32.mrf.mxu0  ;;  %v1448_v59 = vpop.f32.mrf.mxu1 }
 0x171   : > { %v833_v60 = vpop.f32.mrf.mxu0  ;;  %v877_v61 = vpop.f32.mrf.mxu1 }
 0x172   : > { %v880_v29 = vadd.f32 %v833_v60, %v773_v21 }
 0x173   : > { %v835_v62 = vpop.f32.mrf.mxu0  ;;  %v1449_v0 = vpop.f32.mrf.mxu1 }
 0x174   : > { %v881_v30 = vadd.f32 %v835_v62, %v774_v23 }
 0x175   : > { %v837_v2 = vpop.f32.mrf.mxu0  ;;  %v981_v4 = vpop.f32.mrf.mxu1 }
 0x176   : > { %v989_v33 = vadd.f32 %v981_v4, %v882_v31 }
 0x177   : > { %v838_v5 = vpop.f32.mrf.mxu0  ;;  %v1454_v8 = vpop.f32.mrf.mxu1 }
 0x179   : > { %v940_v10 = vpop.f32.mrf.mxu0  ;;  %v984_v12 = vpop.f32.mrf.mxu1 }
 0x17a   : > { %v987_v36 = vadd.f32 %v940_v10, %v880_v29 }
 0x17b   : > { %v942_v14 = vpop.f32.mrf.mxu0  ;;  %v1455_v17 = vpop.f32.mrf.mxu1 }
 0x17c   : > { %v988_v38 = vadd.f32 %v942_v14, %v881_v30 }
 0x17d   : > { %v944_v19 = vpop.f32.mrf.mxu0  ;;  %v1088_v25 = vpop.f32.mrf.mxu1 }
 0x17e   : > { %v1096_v39 = vadd.f32 %v1088_v25, %v989_v33 }
 0x17f   : > { %v945_v20 = vpop.f32.mrf.mxu0  ;;  %v1460_v6 = vpop.f32.mrf.mxu1 }
 0x181   : > { %v1047_v27 = vpop.f32.mrf.mxu0  ;;  %v1091_v34 = vpop.f32.mrf.mxu1 }
 0x182   : > { %v1094_v44 = vadd.f32 %v1047_v27, %v987_v36 }
 0x183   : > { %v1049_v35 = vpop.f32.mrf.mxu0  ;;  %v1461_v37 = vpop.f32.mrf.mxu1 }
 0x184   : > { %v1095_v48 = vadd.f32 %v1049_v35, %v988_v38 }
 0x185   : > { %v1051_v40 = vpop.f32.mrf.mxu0  ;;  %v1195_v41 = vpop.f32.mrf.mxu1 }
 0x186   : > { %v1203_v42 = vadd.f32 %v1195_v41, %v1096_v39 }
 0x187   : > { %v1052_v43 = vpop.f32.mrf.mxu0  ;;  %v1466_v45 = vpop.f32.mrf.mxu1 }
 0x188   : > { %v1206_v46 = vmax.f32 %v1203_v42, 0.0 }
 0x189   : > { %v1154_v47 = vpop.f32.mrf.mxu0  ;;  %v1198_v50 = vpop.f32.mrf.mxu1 }
 0x18a   : > { %v1201_v49 = vadd.f32 %v1154_v47, %v1094_v44  ;;  %v1209_v55 = vpack.c.bf16 %v1206_v46, %v1206_v46 }
 0x18b   : > { %v1156_v51 = vpop.f32.mrf.mxu0  ;;  %v1467_v53 = vpop.f32.mrf.mxu1 }
 0x18c   : > { %v1202_v52 = vadd.f32 %v1156_v51, %v1095_v48  ;;  %v1204_v56 = vmax.f32 %v1201_v49, 0.0  ;;  %v1227_v60 = vrot.slane %v1209_v55, %v1589_v7 }
 0x18d   : > { %v1158_v54 = vpop.f32.mrf.mxu0 }
 0x18e   : > { %v1205_v57 = vmax.f32 %v1202_v52, 0.0 }
 0x18f   : > { %v1159_v58 = vpop.f32.mrf.mxu0 }
 0x190   : > { %v1393_v59 = vpack.c.bf16 %v1205_v57, %v1204_v56 }
 0x192   : > { %v1220_v61 = vrot.slane %v1393_v59, %v1589_v7 }
 0x194   : > { %v1228_v62 = vcombine.low %v1220_v61, %v1227_v60 }
 0x196   : > { %1234 = vst.msk [vmem:[%s226_s28] sm:$0x3f] %vm1233_vm14, %v1228_v62 }
 0x197 PF: > { %s13_s14 = sadd.s32 1, %s1529_s14   ;;  %s1728_s12 = smov %s1525_s13 }
 0x198   : > { %p10_p5 = scmp.ge.s32.totalorder %s13_s14, 4   ;;  %s1729_s13 = smov %s1731_s15 }
 0x19a   :  { %12 = sbr.rel (!%p10_p5) target bundleno = 2 (0x2), region = 76 }

// kernel: segnet_decoder_forward.5
= control target key start
LH: loop header
LB: loop body
LE: loop exit
PB: predicated region body
PF: predicated region fallthrough
CT: control target
= control target key end

     0   :  { %v31_v0 = vlaneseq  ;;  %v1455_v1 = vmov 0   ;;  %v1456_v19 = vmov 1.0|1.0   ;;  %vm399_vm14 = vcmask 130048   ;;  %s1457_s24 = smov 32   ;;  %s2277_s2 = inlined_call_operand.vmem [shape: s32[128,1], index: 2, kind: input, shape index: {}]   ;;  %s2278_s1 = inlined_call_operand.vmem [shape: s32[128,16], index: 1, kind: input, shape index: {}]   ;;  %s2279_s0 = inlined_call_operand.vmem [shape: bf16[128,18], index: 0, kind: input, shape index: {}]   ;;  %s2280_s3 = inlined_call_operand.vmem [shape: bf16[128,64], index: 3, kind: output, shape index: {}]  }
   0x1   :  { %1454 = vset.pattern.permute.xlu1 %v1455_v1  ;;  %1453 = vset.pattern.permute.xlu0 %v1455_v1  ;;  %v51_v2 = vld [vmem:[%s2277_s2 + $0x10] sm:$0xff]  ;;  %v49_v3 = vld [vmem:[%s2277_s2] sm:$0xff]  ;;  %v52_v5 = vld [vmem:[%s2277_s2 + $0x18] sm:$0xff] }
   0x2   :  { %73 = vperm.xlu1 %1454, %v51_v2   ;;  %67 = vperm.xlu0 %1453, %v49_v3   ;;  %v339_v4 = vshrl.u32 %v31_v0, 7  ;;  %v50_v6 = vld [vmem:[%s2277_s2 + $0x8] sm:$0xff]  ;;  %v32_v9 = vand.u32 127, %v31_v0  ;;  %v53_v13 = vld [vmem:[%s2277_s2 + $0x20] sm:$0xff]  ;;  %v56_v16 = vld [vmem:[%s2277_s2 + $0x38] sm:$0xff] }
   0x3   :  { %v54_v12 = vld [vmem:[%s2277_s2 + $0x28] sm:$0xff]  ;;  %v55_v17 = vld [vmem:[%s2277_s2 + $0x30] sm:$0xff]  ;;  %v57_v21 = vld [vmem:[%s2277_s2 + $0x40] sm:$0xff] }
   0x4   :  { %v340_v7 = vadd.s32 8, %v339_v4  ;;  %v341_v8 = vmul.u32 2, %v339_v4  ;;  %v58_v20 = vld [vmem:[%s2277_s2 + $0x48] sm:$0xff]  ;;  %v60_v22 = vld [vmem:[%s2277_s2 + $0x58] sm:$0xff]  ;;  %v59_v23 = vld [vmem:[%s2277_s2 + $0x50] sm:$0xff]  ;;  %v1552_v28 = vmul.u32 2, %v32_v9 }
   0x5   :  { %v62_v24 = vld [vmem:[%s2277_s2 + $0x68] sm:$0xff]  ;;  %v61_v25 = vld [vmem:[%s2277_s2 + $0x60] sm:$0xff]  ;;  %v64_v26 = vld [vmem:[%s2277_s2 + $0x78] sm:$0xff] }
   0x6   :  { %76 = vperm.xlu1 %1454, %v52_v5   ;;  %70 = vperm.xlu0 %1453, %v50_v6   ;;  %v342_v10 = vmul.u32 2, %v340_v7  ;;  %v350_v11 = vadd.s32 1, %v341_v8  ;;  %vm343_vm0 = vcmp.eq.s32.totalorder %v32_v9, %v341_v8  ;;  %v63_v27 = vld [vmem:[%s2277_s2 + $0x70] sm:$0xff]  ;;  %v33_v31 = vld [vmem:[%s2278_s1] sm:$0xff]  ;;  %v34_v38 = vld [vmem:[%s2278_s1 + $0x8] sm:$0xff] }
   0x7   :  { %v35_v35 = vld [vmem:[%s2278_s1 + $0x10] sm:$0xff]  ;;  %v36_v39 = vld [vmem:[%s2278_s1 + $0x18] sm:$0xff]  ;;  %v37_v47 = vld [vmem:[%s2278_s1 + $0x20] sm:$0xff] }
   0x8   :  { %v351_v14 = vadd.s32 1, %v342_v10  ;;  %vm352_vm1 = vcmp.eq.s32.totalorder %v32_v9, %v350_v11  ;;  %vm344_vm2 = vcmp.eq.s32.totalorder %v32_v9, %v342_v10  ;;  %v38_v48 = vld [vmem:[%s2278_s1 + $0x28] sm:$0xff]  ;;  %v1591_v51 = vld [vmem:[%s2279_s0] sm:$0xf]  ;;  %v1596_v52 = vld [vmem:[%s2279_s0 + $0x4] sm:$0xf] }
   0x9   :  { %vm1496_vm3 = vmpackc.low %vm344_vm2, %vm343_vm0  ;;  %v1614_v56 = vld [vmem:[%s2279_s0 + $0x8] sm:$0xf]  ;;  %v39_v60 = vld [vmem:[%s2278_s1 + $0x30] sm:$0xff] }
   0xa   :  { %82 = vperm.xlu1 %1454, %v54_v12   ;;  %79 = vperm.xlu0 %1453, %v53_v13   ;;  %vm353_vm4 = vcmp.eq.s32.totalorder %v32_v9, %v351_v14  ;;  %v1626_v61 = vld [vmem:[%s2279_s0 + $0xc] sm:$0xf]  ;;  %v40_v62 = vld [vmem:[%s2278_s1 + $0x38] sm:$0xff] }
   0xb   :  { %vm1506_vm5 = vmpackc.low %vm353_vm4, %vm352_vm1  ;;  %1396 = vmatprep.subr.msk.bf16.mxu1 %vm1496_vm3, %v1456_v19 }
   0xc   :  { %1378 = vmatprep.subr.msk.bf16.mxu0 %vm1506_vm5, %v1456_v19  ;;  %1397 = vmatpush3.bf16.msk.msra.mxu1 %vm1496_vm3, %v1456_v19 }
   0xd   :  { %1379 = vmatpush3.bf16.msk.msra.mxu0 %vm1506_vm5, %v1456_v19  ;;  %1432 = vmatprep.subr.msk.bf16.mxu1 %vm1496_vm3, %v1456_v19 }
   0xe   :  { %88 = vperm.xlu1 %1454, %v56_v16   ;;  %85 = vperm.xlu0 %1453, %v55_v17   ;;  %v41_v16 = vld [vmem:[%s2278_s1 + $0x40] sm:$0xff]  ;;  %v1678_v17 = vld [vmem:[%s2279_s0 + $0x10] sm:$0xf] }
   0xf   :  { %1414 = vmatprep.subr.msk.bf16.mxu0 %vm1506_vm5, %v1456_v19 }
  0x12   :  { %94 = vperm.xlu1 %1454, %v58_v20   ;;  %91 = vperm.xlu0 %1453, %v57_v21   ;;  %v42_v21 = vld [vmem:[%s2278_s1 + $0x48] sm:$0xff] }
  0x16   :  { %100 = vperm.xlu1 %1454, %v60_v22   ;;  %97 = vperm.xlu0 %1453, %v59_v23  }
  0x1a   :  { %106 = vperm.xlu1 %1454, %v62_v24   ;;  %103 = vperm.xlu0 %1453, %v61_v25   ;;  %v1693_v24 = vld [vmem:[%s2279_s0 + $0x14] sm:$0xf] }
  0x1e   :  { %112 = vperm.xlu1 %1454, %v64_v26   ;;  %109 = vperm.xlu0 %1453, %v63_v27   ;;  %v48_v27 = vld [vmem:[%s2278_s1 + $0x78] sm:$0xff] }
  0x7d   :  { %v74_v29 = vpop.permute.xlu1 %73  ;;  %v68_v30 = vpop.permute.xlu0 %67 }
  0x7e   :  { %v114_v32 = vadd.s32 %v68_v30, %v1552_v28  ;;  %v116_v33 = vadd.s32 %v74_v29, %v1552_v28 }
  0x80   :  { %v1559_v34 = vsub.s32 %v33_v31, %v114_v32  ;;  %v1572_v42 = vsub.s32 %v35_v35, %v116_v33 }
  0x81   :  { %v77_v36 = vpop.permute.xlu1 %76  ;;  %v71_v37 = vpop.permute.xlu0 %70 }
  0x82   :  { %v117_v40 = vadd.s32 %v77_v36, %v1552_v28  ;;  %v115_v41 = vadd.s32 %v71_v37, %v1552_v28  ;;  %vm194_vm6 = vcmp.eq.s32.totalorder %v1559_v34, 1  ;;  %vm146_vm7 = vcmp.eq.s32.totalorder %v1559_v34, 0 }
  0x83   :  { %vm1599_vm9 = vmpackc.low %vm194_vm6, %vm194_vm6  ;;  %vm196_vm12 = vcmp.eq.s32.totalorder %v1572_v42, 1  ;;  %vm148_vm0 = vcmp.eq.s32.totalorder %v1572_v42, 0 }
  0x84   :  { %v1574_v43 = vsub.s32 %v34_v38, %v115_v41  ;;  %v1577_v44 = vsub.s32 %v36_v39, %v117_v40  ;;  %vm1606_vm11 = vmpackc.low %vm146_vm7, %vm146_vm7  ;;  %v226_v1 = vsel %vm1599_vm9, %v1591_v51, 0  ;;  %v43_v38 = vld [vmem:[%s2278_s1 + $0x50] sm:$0xff]  ;;  %v1734_v39 = vld [vmem:[%s2279_s0 + $0x18] sm:$0xf] }
  0x85   :  { %v83_v45 = vpop.permute.xlu1 %82  ;;  %v80_v46 = vpop.permute.xlu0 %79  ;;  %v178_v4 = vsel %vm1606_vm11, %v1591_v51, 0  ;;  %vm1647_vm2 = vmpackc.low %vm196_vm12, %vm196_vm12  ;;  %v44_v41 = vld [vmem:[%s2278_s1 + $0x58] sm:$0xff] }
  0x86   :  { %v119_v49 = vadd.s32 %v83_v45, %v1552_v28  ;;  %v118_v50 = vadd.s32 %v80_v46, %v1552_v28  ;;  %vm195_vm8 = vcmp.eq.s32.totalorder %v1574_v43, 1  ;;  %vm147_vm10 = vcmp.eq.s32.totalorder %v1574_v43, 0 }
  0x87   :  { %vm211_vm13 = vmpackc.low %vm195_vm8, %vm195_vm8  ;;  %vm197_vm15 = vcmp.eq.s32.totalorder %v1577_v44, 1  ;;  %vm149_vm4 = vcmp.eq.s32.totalorder %v1577_v44, 0  ;;  %v228_v10 = vsel %vm1647_vm2, %v1614_v56, 0 }
  0x88   :  { %v1604_v54 = vsub.s32 %v37_v47, %v118_v50  ;;  %v1616_v57 = vsub.s32 %v38_v48, %v119_v49  ;;  %v227_v2 = vsel %vm211_vm13, %v1596_v52, 0  ;;  %vm163_vm1 = vmpackc.low %vm147_vm10, %vm147_vm10  ;;  %v1753_v47 = vld [vmem:[%s2279_s0 + $0x1c] sm:$0xf] }
  0x89   :  { %v89_v58 = vpop.permute.xlu1 %88  ;;  %v86_v59 = vpop.permute.xlu0 %85  ;;  %v1206_v3 = vcombine.low %v226_v1, %v227_v2  ;;  %v179_v5 = vsel %vm163_vm1, %v1596_v52, 0  ;;  %vm213_vm6 = vmpackc.low %vm197_vm15, %vm197_vm15  ;;  %v46_v2 = vld [vmem:[%s2278_s1 + $0x68] sm:$0xff] }
  0x8a   :  { %v121_v63 = vadd.s32 %v89_v58, %v1552_v28  ;;  %v120_v0 = vadd.s32 %v86_v59, %v1552_v28  ;;  %v1224_v8 = vcombine.low %v178_v4, %v179_v5  ;;  %vm198_vm7 = vcmp.eq.s32.totalorder %v1604_v54, 1  ;;  %vm1668_vm8 = vmpackc.low %vm148_vm0, %vm148_vm0  ;;  %v1812_v5 = vld [vmem:[%s2279_s0 + $0x24] sm:$0xf] }
  0x8b   :  { %1380 = vmatprep.mubr.msk.bf16.mxu0 %vm399_vm14, %v1206_v3  ;;  %v229_v11 = vsel %vm213_vm6, %v1626_v61, 0  ;;  %vm199_vm9 = vcmp.eq.s32.totalorder %v1616_v57, 1  ;;  %vm165_vm10 = vmpackc.low %vm149_vm4, %vm149_vm4  ;;  %vm150_vm11 = vcmp.eq.s32.totalorder %v1604_v54, 0  ;;  %v180_v25 = vsel %vm1668_vm8, %v1614_v56, 0 }
  0x8c   :  { %v1652_v7 = vsub.s32 %v39_v60, %v120_v0  ;;  %v1658_v9 = vsub.s32 %v40_v62, %v121_v63  ;;  %1398 = vmatprep.mubr.msk.bf16.mxu1 %vm399_vm14, %v1224_v8  ;;  %v1207_v20 = vcombine.low %v228_v10, %v229_v11  ;;  %v181_v26 = vsel %vm165_vm10, %v1626_v61, 0  ;;  %vm1703_vm12 = vmpackc.low %vm198_vm7, %vm198_vm7  ;;  %v45_v62 = vld [vmem:[%s2278_s1 + $0x60] sm:$0xff] }
  0x8d   :  { %v95_v13 = vpop.permute.xlu1 %94  ;;  %v92_v14 = vpop.permute.xlu0 %91  ;;  %vm151_vm13 = vcmp.eq.s32.totalorder %v1616_v57, 0  ;;  %v1225_v29 = vcombine.low %v180_v25, %v181_v26  ;;  %vm215_vm15 = vmpackc.low %vm199_vm9, %vm199_vm9  ;;  %v230_v31 = vsel %vm1703_vm12, %v1678_v17, 0  ;;  %v1793_v63 = vld [vmem:[%s2279_s0 + $0x20] sm:$0xf] }
  0x8e   :  { %v123_v22 = vadd.s32 %v95_v13, %v1552_v28  ;;  %v122_v23 = vadd.s32 %v92_v14, %v1552_v28  ;;  %1381 = vmatmul.mubr.msk.bf16.vlgmr.msra.gmra.mxu0 %vm399_vm14, %v1207_v20  ;;  %vm200_vm0 = vcmp.eq.s32.totalorder %v1652_v7, 1  ;;  %v231_v33 = vsel %vm215_vm15, %v1693_v24, 0  ;;  %vm1724_vm1 = vmpackc.low %vm150_vm11, %vm150_vm11 }
  0x8f   :  { %1415 = vmatpush3.bf16.msk.msra.mxu0 %vm1506_vm5, %v1456_v19  ;;  %vm201_vm5 = vcmp.eq.s32.totalorder %v1658_v9, 1  ;;  %vm152_vm2 = vcmp.eq.s32.totalorder %v1652_v7, 0  ;;  %1399 = vmatmul.mubr.msk.bf16.vlgmr.msra.gmra.mxu1 %vm399_vm14, %v1225_v29  ;;  %v1208_v18 = vcombine.low %v230_v31, %v231_v33  ;;  %vm167_vm4 = vmpackc.low %vm151_vm13, %vm151_vm13  ;;  %v182_v40 = vsel %vm1724_vm1, %v1678_v17, 0  ;;  %v1868_v33 = vld [vmem:[%s2279_s0 + $0x2c] sm:$0xf] }
  0x90   :  { %v1709_v30 = vsub.s32 %v41_v16, %v122_v23  ;;  %v1721_v32 = vsub.s32 %v42_v21, %v123_v22  ;;  %1433 = vmatpush3.bf16.msk.msra.mxu1 %vm1496_vm3, %v1456_v19  ;;  %v183_v48 = vsel %vm167_vm4, %v1693_v24, 0  ;;  %vm1762_vm6 = vmpackc.low %vm200_vm0, %vm200_vm0  ;;  %vm153_vm7 = vcmp.eq.s32.totalorder %v1658_v9, 0  ;;  %v47_v22 = vld [vmem:[%s2278_s1 + $0x70] sm:$0xff]  ;;  %v1849_v23 = vld [vmem:[%s2279_s0 + $0x28] sm:$0xf] }
  0x91   :  { %v101_v36 = vpop.permute.xlu1 %100  ;;  %v98_v37 = vpop.permute.xlu0 %97  ;;  %1384 = vmatprep.mubr.msk.bf16.mxu0 %vm399_vm14, %v1208_v18  ;;  %v1226_v50 = vcombine.low %v182_v40, %v183_v48  ;;  %vm217_vm3 = vmpackc.low %vm201_vm5, %vm201_vm5  ;;  %v232_v15 = vsel %vm1762_vm6, %v1734_v39, 0  ;;  %v1907_v48 = vld [vmem:[%s2279_s0 + $0x34] sm:$0xf] }
  0x92   :  { %v125_v45 = vadd.s32 %v101_v36, %v1552_v28  ;;  %v124_v46 = vadd.s32 %v98_v37, %v1552_v28  ;;  %vm202_vm8 = vcmp.eq.s32.totalorder %v1709_v30, 1  ;;  %v233_v55 = vsel %vm217_vm3, %v1753_v47, 0  ;;  %vm1783_vm9 = vmpackc.low %vm152_vm2, %vm152_vm2 }
  0x93   :  { %vm203_vm10 = vcmp.eq.s32.totalorder %v1721_v32, 1  ;;  %vm154_vm11 = vcmp.eq.s32.totalorder %v1709_v30, 0  ;;  %1402 = vmatprep.mubr.msk.bf16.mxu1 %vm399_vm14, %v1226_v50  ;;  %v1209_v0 = vcombine.low %v232_v15, %v233_v55  ;;  %vm169_vm12 = vmpackc.low %vm153_vm7, %vm153_vm7  ;;  %v184_v1 = vsel %vm1783_vm9, %v1734_v39, 0 }
  0x94   :  { %v1768_v53 = vsub.s32 %v43_v38, %v124_v46  ;;  %v1777_v19 = vsub.s32 %v44_v41, %v125_v45  ;;  %v185_v6 = vsel %vm169_vm12, %v1753_v47, 0  ;;  %vm1818_vm13 = vmpackc.low %vm202_vm8, %vm202_vm8  ;;  %vm155_vm15 = vcmp.eq.s32.totalorder %v1721_v32, 0  ;;  %v1897_v41 = vld [vmem:[%s2279_s0 + $0x30] sm:$0xf] }
  0x95   :  { %v107_v59 = vpop.permute.xlu1 %106  ;;  %v104_v60 = vpop.permute.xlu0 %103  ;;  %v1227_v10 = vcombine.low %v184_v1, %v185_v6  ;;  %vm219_vm0 = vmpackc.low %vm203_vm10, %vm203_vm10  ;;  %v234_v12 = vsel %vm1818_vm13, %v1793_v63, 0  ;;  %vm293_vm10 = vcmp.eq.s32.totalorder %v1577_v44, 33 }
  0x96   :  { %v127_v3 = vadd.s32 %v107_v59, %v1552_v28  ;;  %v126_v4 = vadd.s32 %v104_v60, %v1552_v28  ;;  %1385 = vmatmul.mubr.msk.bf16.gmra.mxu0 %vm399_vm14, %v1209_v0  ;;  %vm204_vm1 = vcmp.eq.s32.totalorder %v1768_v53, 1  ;;  %v235_v14 = vsel %vm219_vm0, %v1812_v5, 0  ;;  %vm1839_vm5 = vmpackc.low %vm154_vm11, %vm154_vm11 }
  0x97   :  { %vm205_vm2 = vcmp.eq.s32.totalorder %v1777_v19, 1  ;;  %vm156_vm4 = vcmp.eq.s32.totalorder %v1768_v53, 0  ;;  %1403 = vmatmul.mubr.msk.bf16.gmra.mxu1 %vm399_vm14, %v1227_v10  ;;  %v1210_v25 = vcombine.low %v234_v12, %v235_v14  ;;  %vm171_vm6 = vmpackc.low %vm155_vm15, %vm155_vm15  ;;  %v186_v26 = vsel %vm1839_vm5, %v1793_v63, 0 }
  0x98   :  { %v1824_v11 = vsub.s32 %v45_v62, %v126_v4  ;;  %v1833_v13 = vsub.s32 %v46_v2, %v127_v3  ;;  %v187_v35 = vsel %vm171_vm6, %v1812_v5, 0  ;;  %vm220_vm7 = vmpackc.low %vm204_vm1, %vm204_vm1  ;;  %vm157_vm3 = vcmp.eq.s32.totalorder %v1777_v19, 0  ;;  %v1942_v62 = vld [vmem:[%s2279_s0 + $0x38] sm:$0xf] }
  0x99   :  { %v113_v20 = vpop.permute.xlu1 %112  ;;  %v110_v21 = vpop.permute.xlu0 %109  ;;  %1388 = vmatprep.mubr.msk.bf16.mxu0 %vm399_vm14, %v1210_v25  ;;  %v1228_v36 = vcombine.low %v186_v26, %v187_v35  ;;  %vm221_vm8 = vmpackc.low %vm205_vm2, %vm205_vm2  ;;  %vm292_vm0 = vcmp.eq.s32.totalorder %v1572_v42, 33  ;;  %vm245_vm1 = vcmp.eq.s32.totalorder %v1577_v44, 32  ;;  %v1969_v44 = vld [vmem:[%s2279_s0 + $0x3c] sm:$0xf] }
  0x9a   :  { %v129_v29 = vadd.s32 %v113_v20, %v1552_v28  ;;  %v128_v31 = vadd.s32 %v110_v21, %v1552_v28  ;;  %v236_v28 = vsel %vm220_vm7, %v1849_v23, 0  ;;  %vm206_vm9 = vcmp.eq.s32.totalorder %v1824_v11, 1  ;;  %vm1890_vm11 = vmpackc.low %vm156_vm4, %vm156_vm4 }
  0x9b   :  { %v237_v18 = vsel %vm221_vm8, %v1868_v33, 0  ;;  %vm207_vm12 = vcmp.eq.s32.totalorder %v1833_v13, 1  ;;  %1406 = vmatprep.mubr.msk.bf16.mxu1 %vm399_vm14, %v1228_v36  ;;  %vm173_vm13 = vmpackc.low %vm157_vm3, %vm157_vm3  ;;  %v188_v46 = vsel %vm1890_vm11, %v1849_v23, 0  ;;  %vm158_vm15 = vcmp.eq.s32.totalorder %v1824_v11, 0 }
  0x9c   :  { %v1876_v37 = vsub.s32 %v47_v22, %v128_v31  ;;  %v1884_v38 = vsub.s32 %v48_v27, %v129_v29  ;;  %v1211_v45 = vcombine.low %v236_v28, %v237_v18  ;;  %v189_v49 = vsel %vm173_vm13, %v1868_v33, 0  ;;  %vm1916_vm5 = vmpackc.low %vm206_vm9, %vm206_vm9 }
  0x9d   :  { %vm159_vm2 = vcmp.eq.s32.totalorder %v1833_v13, 0  ;;  %vm1924_vm4 = vmpackc.low %vm293_vm10, %vm293_vm10  ;;  %v1229_v55 = vcombine.low %v188_v46, %v189_v49  ;;  %v238_v58 = vsel %vm1916_vm5, %v1897_v41, 0  ;;  %vm244_vm3 = vcmp.eq.s32.totalorder %v1572_v42, 32 }
  0x9e   :  { %1389 = vmatmul.mubr.msk.bf16.gmra.mxu0 %vm399_vm14, %v1211_v45  ;;  %vm223_vm6 = vmpackc.low %vm207_vm12, %vm207_vm12  ;;  %vm208_vm7 = vcmp.eq.s32.totalorder %v1876_v37, 1  ;;  %vm209_vm9 = vcmp.eq.s32.totalorder %v1884_v38, 1  ;;  %vm160_vm13 = vcmp.eq.s32.totalorder %v1876_v37, 0 }
  0x9f   :  { %v239_v59 = vsel %vm223_vm6, %v1907_v48, 0  ;;  %vm1935_vm8 = vmpackc.low %vm158_vm15, %vm158_vm15  ;;  %1407 = vmatmul.mubr.msk.bf16.gmra.mxu1 %vm399_vm14, %v1229_v55 }
  0xa0   :  { %vm1948_vm10 = vmpackc.low %vm292_vm0, %vm292_vm0  ;;  %v1212_v2 = vcombine.low %v238_v58, %v239_v59  ;;  %v190_v3 = vsel %vm1935_vm8, %v1897_v41, 0  ;;  %vm161_vm0 = vcmp.eq.s32.totalorder %v1884_v38, 0  ;;  %vm242_vm8 = vcmp.eq.s32.totalorder %v1559_v34, 32 }
  0xa1   :  { %vm1955_vm11 = vmpackc.low %vm245_vm1, %vm245_vm1 }
  0xa2   :  { %vm175_vm12 = vmpackc.low %vm159_vm2, %vm159_vm2  ;;  %1392 = vmatprep.mubr.msk.bf16.mxu0 %vm399_vm14, %v1212_v2  ;;  %vm290_vm2 = vcmp.eq.s32.totalorder %v1559_v34, 33 }
  0xa3   :  { %v191_v4 = vsel %vm175_vm12, %v1907_v48, 0  ;;  %vm224_vm15 = vmpackc.low %vm208_vm7, %vm208_vm7  ;;  %vm291_vm7 = vcmp.eq.s32.totalorder %v1574_v43, 33  ;;  %vm243_vm12 = vcmp.eq.s32.totalorder %v1574_v43, 32  ;;  %v325_v43 = vsel %vm1924_vm4, %v1626_v61, 0 }
  0xa4   :  { %vm1977_vm1 = vmpackc.low %vm244_vm3, %vm244_vm3  ;;  %v1230_v8 = vcombine.low %v190_v3, %v191_v4  ;;  %v240_v10 = vsel %vm224_vm15, %v1942_v62, 0  ;;  %vm296_vm4 = vcmp.eq.s32.totalorder %v1652_v7, 33 }
  0xa5   :  { %vm225_vm5 = vmpackc.low %vm209_vm9, %vm209_vm9 }
  0xa6   :  { %v241_v12 = vsel %vm225_vm5, %v1969_v44, 0  ;;  %vm176_vm6 = vmpackc.low %vm160_vm13, %vm160_vm13  ;;  %1410 = vmatprep.mubr.msk.bf16.mxu1 %vm399_vm14, %v1230_v8  ;;  %vm294_vm13 = vcmp.eq.s32.totalorder %v1604_v54, 33  ;;  %vm295_vm5 = vcmp.eq.s32.totalorder %v1616_v57, 33 }
  0xa7   :  { %v1213_v42 = vcombine.low %v240_v10, %v241_v12  ;;  %vm177_vm3 = vmpackc.low %vm161_vm0, %vm161_vm0  ;;  %v192_v14 = vsel %vm176_vm6, %v1942_v62, 0 }
  0xa8   :  { %v193_v16 = vsel %vm177_vm3, %v1969_v44, 0  ;;  %vm306_vm9 = vmpackc.low %vm290_vm2, %vm290_vm2  ;;  %vm246_vm2 = vcmp.eq.s32.totalorder %v1604_v54, 32  ;;  %vm247_vm3 = vcmp.eq.s32.totalorder %v1616_v57, 32 }
  0xa9   :  { %1393 = vmatmul.mubr.msk.bf16.gmra.mxu0 %vm399_vm14, %v1213_v42  ;;  %v1231_v20 = vcombine.low %v192_v14, %v193_v16  ;;  %vm307_vm15 = vmpackc.low %vm291_vm7, %vm291_vm7  ;;  %v322_v21 = vsel %vm306_vm9, %v1591_v51, 0 }
  0xaa   :  { %v323_v22 = vsel %vm307_vm15, %v1596_v52, 0  ;;  %vm258_vm0 = vmpackc.low %vm242_vm8, %vm242_vm8 }
  0xab   :  { %1411 = vmatmul.mubr.msk.bf16.gmra.mxu1 %vm399_vm14, %v1231_v20  ;;  %v1242_v34 = vcombine.low %v322_v21, %v323_v22  ;;  %vm259_vm6 = vmpackc.low %vm243_vm12, %vm243_vm12  ;;  %v274_v25 = vsel %vm258_vm0, %v1591_v51, 0  ;;  %v324_v51 = vsel %vm1948_vm10, %v1614_v56, 0  ;;  %vm297_vm12 = vcmp.eq.s32.totalorder %v1658_v9, 33 }
  0xac   :  { %v275_v26 = vsel %vm259_vm6, %v1596_v52, 0  ;;  %vm2003_vm7 = vmpackc.low %vm294_vm13, %vm294_vm13  ;;  %v277_v52 = vsel %vm1955_vm11, %v1626_v61, 0  ;;  %v1243_v35 = vcombine.low %v324_v51, %v325_v43  ;;  %vm248_vm10 = vcmp.eq.s32.totalorder %v1652_v7, 32 }
  0xad   :  { %1416 = vmatprep.mubr.msk.bf16.mxu0 %vm399_vm14, %v1242_v34  ;;  %v1260_v29 = vcombine.low %v274_v25, %v275_v26  ;;  %vm311_vm8 = vmpackc.low %vm295_vm5, %vm295_vm5  ;;  %v326_v54 = vsel %vm2003_vm7, %v1678_v17, 0  ;;  %v276_v61 = vsel %vm1977_vm1, %v1614_v56, 0  ;;  %vm249_vm13 = vcmp.eq.s32.totalorder %v1658_v9, 32 }
  0xae   :  { %v327_v57 = vsel %vm311_vm8, %v1693_v24, 0  ;;  %vm2020_vm9 = vmpackc.low %vm246_vm2, %vm246_vm2  ;;  %v1261_v45 = vcombine.low %v276_v61, %v277_v52  ;;  %vm298_vm5 = vcmp.eq.s32.totalorder %v1709_v30, 33  ;;  %vm299_vm6 = vcmp.eq.s32.totalorder %v1721_v32, 33 }
  0xaf   :  { %1434 = vmatprep.mubr.msk.bf16.mxu1 %vm399_vm14, %v1260_v29  ;;  %vm263_vm15 = vmpackc.low %vm247_vm3, %vm247_vm3  ;;  %v278_v36 = vsel %vm2020_vm9, %v1678_v17, 0  ;;  %v1244_v28 = vcombine.low %v326_v54, %v327_v57  ;;  %vm250_vm7 = vcmp.eq.s32.totalorder %v1709_v30, 32  ;;  %vm251_vm8 = vcmp.eq.s32.totalorder %v1721_v32, 32 }
  0xb0   :  { %v279_v18 = vsel %vm263_vm15, %v1693_v24, 0  ;;  %vm2034_vm11 = vmpackc.low %vm296_vm4, %vm296_vm4  ;;  %vm300_vm9 = vcmp.eq.s32.totalorder %v1768_v53, 33  ;;  %vm301_vm15 = vcmp.eq.s32.totalorder %v1777_v19, 33 }
  0xb1   :  { %1417 = vmatmul.mubr.msk.bf16.vlgmr.msra.gmra.mxu0 %vm399_vm14, %v1243_v35  ;;  %vm2040_vm0 = vmpackc.low %vm297_vm12, %vm297_vm12  ;;  %v1262_v56 = vcombine.low %v278_v36, %v279_v18  ;;  %v328_v24 = vsel %vm2034_vm11, %v1734_v39, 0  ;;  %vm252_vm11 = vcmp.eq.s32.totalorder %v1768_v53, 32 }
  0xb2   :  { %1420 = vmatprep.mubr.msk.bf16.mxu0 %vm399_vm14, %v1244_v28  ;;  %vm2046_vm1 = vmpackc.low %vm248_vm10, %vm248_vm10  ;;  %v329_v46 = vsel %vm2040_vm0, %v1753_v47, 0  ;;  %vm253_vm0 = vcmp.eq.s32.totalorder %v1777_v19, 32 }
  0xb3   :  { %1435 = vmatmul.mubr.msk.bf16.vlgmr.msra.gmra.mxu1 %vm399_vm14, %v1261_v45  ;;  %vm2052_vm2 = vmpackc.low %vm249_vm13, %vm249_vm13  ;;  %v280_v30 = vsel %vm2046_vm1, %v1734_v39, 0  ;;  %v1245_v55 = vcombine.low %v328_v24, %v329_v46  ;;  %vm302_vm1 = vcmp.eq.s32.totalorder %v1824_v11, 33 }
  0xb4   :  { %1438 = vmatprep.mubr.msk.bf16.mxu1 %vm399_vm14, %v1262_v56  ;;  %vm314_vm3 = vmpackc.low %vm298_vm5, %vm298_vm5  ;;  %v281_v50 = vsel %vm2052_vm2, %v1753_v47, 0  ;;  %vm303_vm2 = vcmp.eq.s32.totalorder %v1833_v13, 33 }
  0xb5   :  { %vm315_vm4 = vmpackc.low %vm299_vm6, %vm299_vm6  ;;  %v330_v49 = vsel %vm314_vm3, %v1793_v63, 0  ;;  %v1263_v47 = vcombine.low %v280_v30, %v281_v50  ;;  %vm254_vm3 = vcmp.eq.s32.totalorder %v1824_v11, 32 }
  0xb6   :  { %v331_v15 = vsel %vm315_vm4, %v1812_v5, 0  ;;  %vm266_vm12 = vmpackc.low %vm250_vm7, %vm250_vm7  ;;  %vm255_vm4 = vcmp.eq.s32.totalorder %v1833_v13, 32 }
  0xb7   :  { %vm267_vm10 = vmpackc.low %vm251_vm8, %vm251_vm8  ;;  %v282_v32 = vsel %vm266_vm12, %v1793_v63, 0  ;;  %v1246_v58 = vcombine.low %v330_v49, %v331_v15  ;;  %vm304_vm12 = vcmp.eq.s32.totalorder %v1876_v37, 33 }
  0xb8   :  { %v283_v59 = vsel %vm267_vm10, %v1812_v5, 0  ;;  %vm2078_vm13 = vmpackc.low %vm300_vm9, %vm300_vm9  ;;  %vm305_vm10 = vcmp.eq.s32.totalorder %v1884_v38, 33 }
  0xb9   :  { %1421 = vmatmul.mubr.msk.bf16.gmra.mxu0 %vm399_vm14, %v1245_v55  ;;  %vm2084_vm5 = vmpackc.low %vm301_vm15, %vm301_vm15  ;;  %v1264_v53 = vcombine.low %v282_v32, %v283_v59  ;;  %v332_v5 = vsel %vm2078_vm13, %v1849_v23, 0  ;;  %vm256_vm13 = vcmp.eq.s32.totalorder %v1876_v37, 32 }
  0xba   :  { %1424 = vmatprep.mubr.msk.bf16.mxu0 %vm399_vm14, %v1246_v58  ;;  %vm2090_vm6 = vmpackc.low %vm252_vm11, %vm252_vm11  ;;  %v333_v0 = vsel %vm2084_vm5, %v1868_v33, 0  ;;  %vm257_vm5 = vcmp.eq.s32.totalorder %v1884_v38, 32 }
  0xbb   :  { %1439 = vmatmul.mubr.msk.bf16.gmra.mxu1 %vm399_vm14, %v1263_v47  ;;  %vm2096_vm7 = vmpackc.low %vm253_vm0, %vm253_vm0  ;;  %v284_v11 = vsel %vm2090_vm6, %v1849_v23, 0  ;;  %v1247_v4 = vcombine.low %v332_v5, %v333_v0 }
  0xbc   :  { %1442 = vmatprep.mubr.msk.bf16.mxu1 %vm399_vm14, %v1264_v53  ;;  %vm318_vm8 = vmpackc.low %vm302_vm1, %vm302_vm1  ;;  %v285_v2 = vsel %vm2096_vm7, %v1868_v33, 0  ;;  %vm1068_vm7 = vcmask 257024  }
  0xbd   :  { %vm319_vm9 = vmpackc.low %vm303_vm2, %vm303_vm2  ;;  %v334_v1 = vsel %vm318_vm8, %v1897_v41, 0  ;;  %v1265_v23 = vcombine.low %v284_v11, %v285_v2 }
  0xbe   :  { %v335_v3 = vsel %vm319_vm9, %v1907_v48, 0  ;;  %vm270_vm15 = vmpackc.low %vm254_vm3, %vm254_vm3 }
  0xbf   :  { %vm271_vm11 = vmpackc.low %vm255_vm4, %vm255_vm4  ;;  %v286_v13 = vsel %vm270_vm15, %v1897_v41, 0  ;;  %v1248_v6 = vcombine.low %v334_v1, %v335_v3 }
  0xc0   :  { %v287_v8 = vsel %vm271_vm11, %v1907_v48, 0  ;;  %vm320_vm0 = vmpackc.low %vm304_vm12, %vm304_vm12 }
  0xc1   :  { %1425 = vmatmul.mubr.msk.bf16.gmra.mxu0 %vm399_vm14, %v1247_v4  ;;  %vm321_vm1 = vmpackc.low %vm305_vm10, %vm305_vm10  ;;  %v1266_v33 = vcombine.low %v286_v13, %v287_v8  ;;  %v336_v37 = vsel %vm320_vm0, %v1942_v62, 0 }
  0xc2   :  { %1428 = vmatprep.mubr.msk.bf16.mxu0 %vm399_vm14, %v1248_v6  ;;  %vm272_vm6 = vmpackc.low %vm256_vm13, %vm256_vm13  ;;  %v337_v41 = vsel %vm321_vm1, %v1969_v44, 0 }
  0xc3   :  { %1443 = vmatmul.mubr.msk.bf16.gmra.mxu1 %vm399_vm14, %v1265_v23  ;;  %vm273_vm2 = vmpackc.low %vm257_vm5, %vm257_vm5  ;;  %v288_v48 = vsel %vm272_vm6, %v1942_v62, 0  ;;  %v1249_v10 = vcombine.low %v336_v37, %v337_v41 }
  0xc4   :  { %1446 = vmatprep.mubr.msk.bf16.mxu1 %vm399_vm14, %v1266_v33  ;;  %v289_v38 = vsel %vm273_vm2, %v1969_v44, 0 }
  0xc5   :  { %v1267_v12 = vcombine.low %v288_v48, %v289_v38 }
  0xc9   :  { %1429 = vmatmul.mubr.msk.bf16.gmra.mxu0 %vm399_vm14, %v1249_v10 }
  0xcb   :  { %1447 = vmatmul.mubr.msk.bf16.gmra.mxu1 %vm399_vm14, %v1267_v12  ;;  %vm1181_vm14 = vcmask 519424  }
 0x14e   :  { %v1382_v42 = vpop.f32.mrf.mxu0 }
 0x14f   :  { %v1400_v14 = vpop.f32.mrf.mxu1 }
 0x150   :  { %v458_v16 = vpop.f32.mrf.mxu0  ;;  %v628_v20 = vadd.f32 %v1400_v14, %v1382_v42 }
 0x151   :  { %v619_v21 = vpop.f32.mrf.mxu1 }
 0x152   :  { %v1383_v22 = vpop.f32.mrf.mxu0  ;;  %v1312_v34 = vpack.c.bf16 %v628_v20, %v628_v20  ;;  %v620_v43 = vadd.f32 %v619_v21, %v458_v16 }
 0x153   :  { %v1401_v25 = vpop.f32.mrf.mxu1 }
 0x154   :  { %v461_v26 = vpop.f32.mrf.mxu0  ;;  %1071 = vst.msk [vmem:[%s2280_s3 + $0x8] sm:$0xf] %vm1068_vm7, %v1312_v34  ;;  %v1310_v62 = vpack.c.bf16 %v620_v43, %v620_v43  ;;  %v631_v44 = vadd.f32 %v1401_v25, %v1383_v22 }
 0x155   :  { %v622_v27 = vpop.f32.mrf.mxu1 }
 0x156   :  { %v1386_v29 = vpop.f32.mrf.mxu0  ;;  %1069 = vst.msk [vmem:[%s2280_s3] sm:$0xf] %vm1068_vm7, %v1310_v62  ;;  %v1313_v54 = vpack.c.bf16 %v631_v44, %v631_v44  ;;  %v623_v51 = vadd.f32 %v622_v27, %v461_v26 }
 0x157   :  { %v1404_v52 = vpop.f32.mrf.mxu1 }
 0x158   :  { %v474_v57 = vpop.f32.mrf.mxu0  ;;  %1072 = vst.msk [vmem:[%s2280_s3 + $0xc] sm:$0xf] %vm1068_vm7, %v1313_v54  ;;  %v1311_v31 = vpack.c.bf16 %v623_v51, %v623_v51  ;;  %v644_v35 = vadd.f32 %v1404_v52, %v1386_v29 }
 0x159   :  { %v635_v36 = vpop.f32.mrf.mxu1 }
 0x15a   :  { %v1387_v61 = vpop.f32.mrf.mxu0  ;;  %1070 = vst.msk [vmem:[%s2280_s3 + $0x4] sm:$0xf] %vm1068_vm7, %v1311_v31  ;;  %v1316_v28 = vpack.c.bf16 %v644_v35, %v644_v35  ;;  %v636_v18 = vadd.f32 %v635_v36, %v474_v57 }
 0x15b   :  { %v1405_v40 = vpop.f32.mrf.mxu1 }
 0x15c   :  { %v477_v45 = vpop.f32.mrf.mxu0  ;;  %1075 = vst.msk [vmem:[%s2280_s3 + $0x18] sm:$0xf] %vm1068_vm7, %v1316_v28  ;;  %v1314_v17 = vpack.c.bf16 %v636_v18, %v636_v18  ;;  %v647_v56 = vadd.f32 %v1405_v40, %v1387_v61 }
 0x15d   :  { %v638_v7 = vpop.f32.mrf.mxu1 }
 0x15e   :  { %v1390_v9 = vpop.f32.mrf.mxu0  ;;  %1073 = vst.msk [vmem:[%s2280_s3 + $0x10] sm:$0xf] %vm1068_vm7, %v1314_v17  ;;  %v1317_v24 = vpack.c.bf16 %v647_v56, %v647_v56  ;;  %v639_v46 = vadd.f32 %v638_v7, %v477_v45 }
 0x15f   :  { %v1408_v49 = vpop.f32.mrf.mxu1 }
 0x160   :  { %v490_v30 = vpop.f32.mrf.mxu0  ;;  %1076 = vst.msk [vmem:[%s2280_s3 + $0x1c] sm:$0xf] %vm1068_vm7, %v1317_v24  ;;  %v1315_v50 = vpack.c.bf16 %v639_v46, %v639_v46  ;;  %v660_v15 = vadd.f32 %v1408_v49, %v1390_v9 }
 0x161   :  { %v651_v55 = vpop.f32.mrf.mxu1 }
 0x162   :  { %v1391_v32 = vpop.f32.mrf.mxu0  ;;  %1074 = vst.msk [vmem:[%s2280_s3 + $0x14] sm:$0xf] %vm1068_vm7, %v1315_v50  ;;  %v1320_v58 = vpack.c.bf16 %v660_v15, %v660_v15  ;;  %v652_v59 = vadd.f32 %v651_v55, %v490_v30 }
 0x163   :  { %v1409_v39 = vpop.f32.mrf.mxu1 }
 0x164   :  { %v493_v47 = vpop.f32.mrf.mxu0  ;;  %1079 = vst.msk [vmem:[%s2280_s3 + $0x28] sm:$0xf] %vm1068_vm7, %v1320_v58  ;;  %v1318_v60 = vpack.c.bf16 %v652_v59, %v652_v59  ;;  %v663_v53 = vadd.f32 %v1409_v39, %v1391_v32 }
 0x165   :  { %v654_v63 = vpop.f32.mrf.mxu1 }
 0x166   :  { %1077 = vst.msk [vmem:[%s2280_s3 + $0x20] sm:$0xf] %vm1068_vm7, %v1318_v60  ;;  %v1321_v5 = vpack.c.bf16 %v663_v53, %v663_v53  ;;  %v655_v0 = vadd.f32 %v654_v63, %v493_v47 }
 0x168   :  { %1080 = vst.msk [vmem:[%s2280_s3 + $0x2c] sm:$0xf] %vm1068_vm7, %v1321_v5  ;;  %v1319_v2 = vpack.c.bf16 %v655_v0, %v655_v0 }
 0x169   :  { %v1394_v19 = vpop.f32.mrf.mxu0 }
 0x16a   :  { %1078 = vst.msk [vmem:[%s2280_s3 + $0x24] sm:$0xf] %vm1068_vm7, %v1319_v2 }
 0x16b   :  { %v1412_v1 = vpop.f32.mrf.mxu1  ;;  %v506_v11 = vpop.f32.mrf.mxu0 }
 0x16c   :  { %v676_v3 = vadd.f32 %v1412_v1, %v1394_v19 }
 0x16d   :  { %v667_v4 = vpop.f32.mrf.mxu1  ;;  %v1395_v13 = vpop.f32.mrf.mxu0 }
 0x16e   :  { %v1324_v6 = vpack.c.bf16 %v676_v3, %v676_v3  ;;  %v668_v8 = vadd.f32 %v667_v4, %v506_v11 }
 0x16f   :  { %v1413_v23 = vpop.f32.mrf.mxu1  ;;  %v509_v33 = vpop.f32.mrf.mxu0 }
 0x170   :  { %1083 = vst.msk [vmem:[%s2280_s3 + $0x38] sm:$0xf] %vm1068_vm7, %v1324_v6  ;;  %v1322_v37 = vpack.c.bf16 %v668_v8, %v668_v8  ;;  %v679_v41 = vadd.f32 %v1413_v23, %v1395_v13 }
 0x171   :  { %v670_v48 = vpop.f32.mrf.mxu1  ;;  %v1418_v38 = vpop.f32.mrf.mxu0 }
 0x172   :  { %1081 = vst.msk [vmem:[%s2280_s3 + $0x30] sm:$0xf] %vm1068_vm7, %v1322_v37  ;;  %v1325_v10 = vpack.c.bf16 %v679_v41, %v679_v41  ;;  %v671_v12 = vadd.f32 %v670_v48, %v509_v33 }
 0x173   :  { %v1436_v42 = vpop.f32.mrf.mxu1  ;;  %v780_v14 = vpop.f32.mrf.mxu0 }
 0x174   :  { %1084 = vst.msk [vmem:[%s2280_s3 + $0x3c] sm:$0xf] %vm1068_vm7, %v1325_v10  ;;  %v1323_v16 = vpack.c.bf16 %v671_v12, %v671_v12  ;;  %v950_v20 = vadd.f32 %v1436_v42, %v1418_v38 }
 0x175   :  { %v941_v21 = vpop.f32.mrf.mxu1  ;;  %v1419_v22 = vpop.f32.mrf.mxu0 }
 0x176   :  { %1082 = vst.msk [vmem:[%s2280_s3 + $0x34] sm:$0xf] %vm1068_vm7, %v1323_v16  ;;  %v1328_v34 = vpack.c.bf16 %v950_v20, %v950_v20  ;;  %v942_v43 = vadd.f32 %v941_v21, %v780_v14 }
 0x177   :  { %v1437_v25 = vpop.f32.mrf.mxu1  ;;  %v783_v26 = vpop.f32.mrf.mxu0 }
 0x178   :  { %v953_v62 = vadd.f32 %v1437_v25, %v1419_v22  ;;  %1137 = vrot.lane.b32.xlu0 %v1328_v34, %s1457_s24  ;;  %v1326_v29 = vpack.c.bf16 %v942_v43, %v942_v43 }
 0x179   :  { %v944_v44 = vpop.f32.mrf.mxu1  ;;  %v1422_v27 = vpop.f32.mrf.mxu0 }
 0x17a   :  { %v1329_v54 = vpack.c.bf16 %v953_v62, %v953_v62  ;;  %v945_v51 = vadd.f32 %v944_v44, %v783_v26 }
 0x17b   :  { %v1440_v52 = vpop.f32.mrf.mxu1  ;;  %v796_v57 = vpop.f32.mrf.mxu0 }
 0x17c   :  { %v966_v31 = vadd.f32 %v1440_v52, %v1422_v27  ;;  %1139 = vrot.lane.b32.xlu1 %v1329_v54, %s1457_s24  ;;  %1133 = vrot.lane.b32.xlu0 %v1326_v29, %s1457_s24  ;;  %v1327_v61 = vpack.c.bf16 %v945_v51, %v945_v51 }
 0x17d   :  { %v957_v35 = vpop.f32.mrf.mxu1  ;;  %v1423_v36 = vpop.f32.mrf.mxu0 }
 0x17e   :  { %v1332_v28 = vpack.c.bf16 %v966_v31, %v966_v31  ;;  %v958_v18 = vadd.f32 %v957_v35, %v796_v57 }
 0x17f   :  { %v1441_v40 = vpop.f32.mrf.mxu1  ;;  %v799_v45 = vpop.f32.mrf.mxu0 }
 0x180   :  { %v969_v17 = vadd.f32 %v1441_v40, %v1423_v36  ;;  %1135 = vrot.lane.b32.xlu1 %v1327_v61, %s1457_s24  ;;  %1145 = vrot.lane.b32.xlu0 %v1332_v28, %s1457_s24  ;;  %v1330_v9 = vpack.c.bf16 %v958_v18, %v958_v18 }
 0x181   :  { %v960_v56 = vpop.f32.mrf.mxu1  ;;  %v1426_v7 = vpop.f32.mrf.mxu0 }
 0x182   :  { %v1333_v24 = vpack.c.bf16 %v969_v17, %v969_v17  ;;  %v961_v46 = vadd.f32 %v960_v56, %v799_v45 }
 0x183   :  { %v1444_v49 = vpop.f32.mrf.mxu1  ;;  %v812_v30 = vpop.f32.mrf.mxu0 }
 0x184   :  { %v982_v50 = vadd.f32 %v1444_v49, %v1426_v7  ;;  %1147 = vrot.lane.b32.xlu1 %v1333_v24, %s1457_s24  ;;  %1141 = vrot.lane.b32.xlu0 %v1330_v9, %s1457_s24  ;;  %v1331_v32 = vpack.c.bf16 %v961_v46, %v961_v46 }
 0x185   :  { %v973_v15 = vpop.f32.mrf.mxu1  ;;  %v1427_v55 = vpop.f32.mrf.mxu0 }
 0x186   :  { %v1336_v58 = vpack.c.bf16 %v982_v50, %v982_v50  ;;  %v974_v59 = vadd.f32 %v973_v15, %v812_v30 }
 0x187   :  { %v1445_v39 = vpop.f32.mrf.mxu1  ;;  %v815_v47 = vpop.f32.mrf.mxu0 }
 0x188   :  { %v985_v60 = vadd.f32 %v1445_v39, %v1427_v55  ;;  %1143 = vrot.lane.b32.xlu1 %v1331_v32, %s1457_s24  ;;  %1153 = vrot.lane.b32.xlu0 %v1336_v58, %s1457_s24  ;;  %v1334_v19 = vpack.c.bf16 %v974_v59, %v974_v59 }
 0x189   :  { %v976_v53 = vpop.f32.mrf.mxu1  ;;  %v1430_v63 = vpop.f32.mrf.mxu0 }
 0x18a   :  { %v1337_v5 = vpack.c.bf16 %v985_v60, %v985_v60  ;;  %v977_v0 = vadd.f32 %v976_v53, %v815_v47 }
 0x18b   :  { %v1448_v1 = vpop.f32.mrf.mxu1  ;;  %v828_v11 = vpop.f32.mrf.mxu0 }
 0x18c   :  { %1155 = vrot.lane.b32.xlu1 %v1337_v5, %s1457_s24  ;;  %1149 = vrot.lane.b32.xlu0 %v1334_v19, %s1457_s24  ;;  %v1335_v4 = vpack.c.bf16 %v977_v0, %v977_v0  ;;  %v998_v23 = vadd.f32 %v1448_v1, %v1430_v63 }
 0x18d   :  { %v989_v2 = vpop.f32.mrf.mxu1  ;;  %v1431_v3 = vpop.f32.mrf.mxu0 }
 0x18e   :  { %v990_v13 = vadd.f32 %v989_v2, %v828_v11  ;;  %v1340_v48 = vpack.c.bf16 %v998_v23, %v998_v23 }
 0x18f   :  { %v1449_v6 = vpop.f32.mrf.mxu1  ;;  %v831_v8 = vpop.f32.mrf.mxu0 }
 0x190   :  { %v1338_v33 = vpack.c.bf16 %v990_v13, %v990_v13  ;;  %1151 = vrot.lane.b32.xlu1 %v1335_v4, %s1457_s24  ;;  %v1001_v38 = vadd.f32 %v1449_v6, %v1431_v3 }
 0x191   :  { %v992_v37 = vpop.f32.mrf.mxu1 }
 0x192   :  { %v993_v41 = vadd.f32 %v992_v37, %v831_v8  ;;  %1157 = vrot.lane.b32.xlu0 %v1338_v33, %s1457_s24  ;;  %v1341_v12 = vpack.c.bf16 %v1001_v38, %v1001_v38 }
 0x194   :  { %v1339_v10 = vpack.c.bf16 %v993_v41, %v993_v41 }
 0x196   :  { %1159 = vrot.lane.b32.xlu1 %v1339_v10, %s1457_s24  ;;  %1161 = vrot.lane.b32.xlu0 %v1340_v48, %s1457_s24 }
 0x19a   :  { %1163 = vrot.lane.b32.xlu1 %v1341_v12, %s1457_s24 }
 0x1ea   :  { %v1138_v42 = vpop.permute.xlu0 %1137 }
 0x1eb   :  { %1184 = vst.msk [vmem:[%s2280_s3 + $0x8] sm:$0xf] %vm1181_vm14, %v1138_v42 }
 0x1ee   :  { %v1140_v14 = vpop.permute.xlu1 %1139  ;;  %v1134_v16 = vpop.permute.xlu0 %1133 }
 0x1ef   :  { %1185 = vst.msk [vmem:[%s2280_s3 + $0xc] sm:$0xf] %vm1181_vm14, %v1140_v14  ;;  %1182 = vst.msk [vmem:[%s2280_s3] sm:$0xf] %vm1181_vm14, %v1134_v16 }
 0x1f2   :  { %v1136_v20 = vpop.permute.xlu1 %1135  ;;  %v1146_v21 = vpop.permute.xlu0 %1145 }
 0x1f3   :  { %1183 = vst.msk [vmem:[%s2280_s3 + $0x4] sm:$0xf] %vm1181_vm14, %v1136_v20  ;;  %1188 = vst.msk [vmem:[%s2280_s3 + $0x18] sm:$0xf] %vm1181_vm14, %v1146_v21 }
 0x1f6   :  { %v1148_v22 = vpop.permute.xlu1 %1147  ;;  %v1142_v34 = vpop.permute.xlu0 %1141 }
 0x1f7   :  { %1189 = vst.msk [vmem:[%s2280_s3 + $0x1c] sm:$0xf] %vm1181_vm14, %v1148_v22  ;;  %1186 = vst.msk [vmem:[%s2280_s3 + $0x10] sm:$0xf] %vm1181_vm14, %v1142_v34 }
 0x1fa   :  { %v1144_v43 = vpop.permute.xlu1 %1143  ;;  %v1154_v25 = vpop.permute.xlu0 %1153 }
 0x1fb   :  { %1187 = vst.msk [vmem:[%s2280_s3 + $0x14] sm:$0xf] %vm1181_vm14, %v1144_v43  ;;  %1192 = vst.msk [vmem:[%s2280_s3 + $0x28] sm:$0xf] %vm1181_vm14, %v1154_v25 }
 0x1fe   :  { %v1156_v26 = vpop.permute.xlu1 %1155  ;;  %v1150_v62 = vpop.permute.xlu0 %1149 }
 0x1ff   :  { %1193 = vst.msk [vmem:[%s2280_s3 + $0x2c] sm:$0xf] %vm1181_vm14, %v1156_v26  ;;  %1190 = vst.msk [vmem:[%s2280_s3 + $0x20] sm:$0xf] %vm1181_vm14, %v1150_v62 }
 0x202   :  { %v1152_v44 = vpop.permute.xlu1 %1151 }
 0x203   :  { %1191 = vst.msk [vmem:[%s2280_s3 + $0x24] sm:$0xf] %vm1181_vm14, %v1152_v44 }
 0x204   :  { %v1158_v27 = vpop.permute.xlu0 %1157 }
 0x205   :  { %1194 = vst.msk [vmem:[%s2280_s3 + $0x30] sm:$0xf] %vm1181_vm14, %v1158_v27 }
 0x208   :  { %v1160_v29 = vpop.permute.xlu1 %1159  ;;  %v1162_v54 = vpop.permute.xlu0 %1161 }
 0x209   :  { %1195 = vst.msk [vmem:[%s2280_s3 + $0x34] sm:$0xf] %vm1181_vm14, %v1160_v29  ;;  %1196 = vst.msk [vmem:[%s2280_s3 + $0x38] sm:$0xf] %vm1181_vm14, %v1162_v54 }
 0x20c   :  { %v1164_v51 = vpop.permute.xlu1 %1163 }
 0x20d   :  { %1197 = vst.msk [vmem:[%s2280_s3 + $0x3c] sm:$0xf] %vm1181_vm14, %v1164_v51 }

// kernel: segnet_decoder_forward.6
= control target key start
LH: loop header
LB: loop body
LE: loop exit
PB: predicated region body
PF: predicated region fallthrough
CT: control target
= control target key end

     0   :  { %s3190_s12 = smov 0   ;;  %s3192_s13 = smov 0   ;;  %s3825_s0 = inlined_call_operand.vmem [shape: bf16[2,4,1190], index: 0, kind: input, shape index: {}]   ;;  %s3826_s1 = inlined_call_operand.vmem [shape: bf16[9,3,4], index: 1, kind: input, shape index: {}]   ;;  %s3827_s2 = inlined_call_operand.vmem [shape: f32[3,1], index: 2, kind: input, shape index: {}]   ;;  %s3828_s3 = inlined_call_operand.vmem [shape: bf16[2,3,1088], index: 3, kind: output, shape index: {}]  }
   0x1   :  { %s3194_s14 = smov 0  }
   0x2 LB: > { %s25_s15 = sadd.s32 1, %s3152_s13  ;;  %p2921_p0 = scmp.ge.s32.totalorder %s3156_s14, 1  ;;  %s3156_s14 = sphi %s3194_s14, %s13_s14   ;;  %s3152_s13 = sphi %s3192_s13, %s3840_s13   ;;  %s3148_s12 = sphi %s3190_s12, %s3839_s12  }
   0x3   : > { %p27_p1 = scmp.ge.s32.totalorder %s25_s15, 2  ;;  %p169_p2 = scmp.lt.s32.totalorder %s3156_s14, 3 }
   0x5   : > { %s3842_s15 = smov (%p27_p1, %s25_s15), 0  ;;  %p170_p3 = pnand %p2921_p0, %p169_p2 }
   0x6   : > { %p205_p4 = scmp.lt.s32.totalorder (!%p170_p3), %s3148_s12, 1  ;;  %s3160_s20 = smov (!%p170_p3), 127  }
   0x7   : > { %173 = sbr.rel (%p170_p3) target bundleno = 504 (0x1f8), region = 32  ;;  %s3163_s23 = smov (!%p170_p3), 126  }
   0x8   : > { %s3164_s24 = smov (!%p170_p3), 94   ;;  %s3165_s25 = smov (!%p170_p3), 93  }
   0x9   : > { %s3166_s26 = smov (!%p170_p3), 92   ;;  %s3167_s27 = smov (!%p170_p3), 60  }
   0xa   : > { %s3168_s28 = smov (!%p170_p3), 59   ;;  %s3169_s4 = smov (!%p170_p3), 58  }
   0xc   : > { %v245_v0 = vlaneseq  ;;  %v3158_v1 = vmov 1983009808   ;;  %v3159_v3 = vmov 0   ;;  %s3844_s12 = smov (!%p205_p4, %s3148_s12), 1  ;;  %vm286_vm0 = vcmask 1041408  }
   0xd   : > { %v243_v2 = vunpack.c.l.s4 %v3158_v1  ;;  %346 = vmatprep.mubr.bf16.mxu0 %v3159_v3  ;;  %387 = vmatprep.mubr.bf16.mxu1 %v3159_v3  ;;  %s3092_s16 = smul.u32 20, %s3844_s12  ;;  %v231_v20 = vld [vmem:[%s3826_s1] sm:$0x3]  ;;  %vm282_vm1 = vcmask 31744   ;;  %v3161_v25 = vmov 0.0   ;;  %vm3162_vm2 = vmmov 0  }
   0xe   : > { %v246_v4 = vshrl.u32 %v245_v0, 7  ;;  %3130 = vset.pattern.permute.xlu1 %v3159_v3  ;;  %3131 = vset.pattern.permute.xlu0 %v3159_v3  ;;  %vm538_vm3 = vcmask 1039360   ;;  %v2934_v36 = vld [vmem:[%s3826_s1 + $0x2] sm:$0x3]  ;;  %vm810_vm4 = vcmask 1031168   ;;  %vm1082_vm5 = vcmask 769024  }
   0xf   : > { %v244_v5 = vunpack.c.0.s8 %v243_v2  ;;  %s3220_s19 = scalar_lea.vmem %s3825_s0, %s3092_s16  ;;  %v2944_v61 = vld [vmem:[%s3826_s1 + $0x4] sm:$0x3]  ;;  %vm1354_vm6 = vcmask 760832   ;;  %vm1626_vm7 = vcmask 752640   ;;  %vm1901_vm8 = vcmask 490496  }
  0x10   : > { %v228_v7 = vld [vmem:[%s3220_s19] sm:$0xff]  ;;  %v229_v8 = vld [vmem:[%s3220_s19 + $0x8] sm:$0xff]  ;;  %v3288_v24 = vld.sshfl [vmem:[%s3220_s19 + $0x10] sm:$0x33 pattern:$0x76325410] }
  0x11   : > { %v3215_v6 = vsub.s32 %v244_v5, %v246_v4  ;;  %v241_v10 = vcombine.high %v228_v7, %v228_v7  ;;  %v258_v12 = vcombine.high %v229_v8, %v229_v8  ;;  %v312_v26 = vsel %vm286_vm0, %v3288_v24, 0 }
  0x12   : > { %v3352_v27 = vcombine.high %v3288_v24, %v3288_v24  ;;  %vm2176_vm9 = vcmask 482304   ;;  %vm2451_vm10 = vcmask 474112   ;;  %vm2776_vm11 = vsmask.f32 1280 }
  0x13   : > { %v3225_v9 = vrot.slane %v228_v7, %v3215_v6  ;;  %v3228_v11 = vrot.slane %v229_v8, %v3215_v6  ;;  %v3233_v13 = vrot.slane %v241_v10, %v3215_v6  ;;  %v3256_v19 = vrot.slane %v258_v12, %v3215_v6  ;;  %vm3736_vm14 = vmand %vm286_vm0, %vm2776_vm11 }
  0x14   : > { %vm2778_vm12 = vcmask 1043458   ;;  %vm2779_vm13 = vsmask.f32 3328 }
  0x15   : > { %520 = vrot.lane.b32.xlu0 %v3225_v9, %s3160_s20  ;;  %v3237_v14 = vcombine.high %v3225_v9, %v3225_v9  ;;  %v288_v15 = vsel %vm286_vm0, %v3225_v9, 0  ;;  %524 = vrot.lane.b32.xlu1 %v3233_v13, %s3160_s20  ;;  %v3245_v16 = vcombine.high %v3233_v13, %v3233_v13  ;;  %v294_v17 = vsel %vm286_vm0, %v3233_v13, 0  ;;  %vm3740_vm15 = vmand %vm2778_vm12, %vm2779_vm13 }
  0x16   : > { %v3253_v18 = vcombine.high %v3228_v11, %v3228_v11  ;;  %v300_v21 = vsel %vm286_vm0, %v3228_v11, 0  ;;  %v3274_v22 = vcombine.high %v3256_v19, %v3256_v19  ;;  %v306_v23 = vsel %vm286_vm0, %v3256_v19, 0 }
  0x17   : > { %2925 = vmatprep.subr.msk.bf16.mxu0 %vm286_vm0, %v3237_v14  ;;  %2927 = vmatprep.subr.msk.bf16.mxu1 %vm286_vm0, %v3245_v16 }
  0x18   : > { %329 = vmatpush1.bf16.msra.mxu0 %v288_v15  ;;  %370 = vmatpush1.bf16.msra.mxu1 %v294_v17 }
  0x19   : > { %522 = vrot.lane.b32.xlu0 %v3237_v14, %s3160_s20  ;;  %2929 = vmatprep.subr.msk.bf16.mxu0 %vm286_vm0, %v3253_v18 }
  0x1a   : > { %526 = vrot.lane.b32.xlu1 %v3245_v16, %s3160_s20  ;;  %2931 = vmatprep.subr.msk.bf16.mxu1 %vm286_vm0, %v3274_v22 }
  0x1b   : > { %2926 = vmatmul.mubr.msk.bf16.vlgmr.msra.gmra.mxu0 %vm282_vm1, %v231_v20  ;;  %2928 = vmatmul.mubr.msk.bf16.vlgmr.msra.gmra.mxu1 %vm282_vm1, %v231_v20 }
  0x1c   : > { %411 = vmatpush1.bf16.msra.mxu0 %v300_v21  ;;  %428 = vmatprep.mubr.bf16.mxu0 %v3159_v3 }
  0x1d   : > { %528 = vrot.lane.b32.xlu0 %v3228_v11, %s3160_s20  ;;  %469 = vmatprep.mubr.bf16.mxu1 %v3159_v3 }
  0x1e   : > { %530 = vrot.lane.b32.xlu1 %v3253_v18, %s3160_s20  ;;  %452 = vmatpush1.bf16.msra.mxu1 %v306_v23 }
  0x1f   : > { %3038 = vmatprep.subr.bf16.mxu0 %v3161_v25 }
  0x21   : > { %532 = vrot.lane.b32.xlu0 %v3256_v19, %s3160_s20 }
  0x22   : > { %534 = vrot.lane.b32.xlu1 %v3274_v22, %s3160_s20 }
  0x23   : > { %2930 = vmatmul.mubr.msk.bf16.vlgmr.msra.gmra.mxu0 %vm282_vm1, %v231_v20  ;;  %2932 = vmatmul.mubr.msk.bf16.vlgmr.msra.gmra.mxu1 %vm282_vm1, %v231_v20 }
  0x24   : > { %3039 = vmatpush3.bf16.msra.mxu0 %v312_v26  ;;  %3040 = vmatprep.mubr.msk.bf16.mxu0 %vm3162_vm2, %v3161_v25 }
  0x25   : > { %536 = vrot.lane.b32.xlu0 %v3288_v24, %s3160_s20  ;;  %609 = vmatprep.mubr.bf16.mxu1 %v3159_v3 }
  0x26   : > { %792 = vrot.lane.b32.xlu1 %v3225_v9, %s3163_s23 }
  0x29   : > { %794 = vrot.lane.b32.xlu0 %v3237_v14, %s3163_s23 }
  0x2a   : > { %796 = vrot.lane.b32.xlu1 %v3233_v13, %s3163_s23 }
  0x2b   : > { %3041 = vmatmul.mubr.msk.bf16.vlgmr.msra.gmra.mxu0 %vm282_vm1, %v231_v20 }
  0x2c   : > { %650 = vmatprep.mubr.bf16.mxu0 %v3159_v3 }
  0x2d   : > { %798 = vrot.lane.b32.xlu0 %v3245_v16, %s3163_s23 }
  0x2e   : > { %800 = vrot.lane.b32.xlu1 %v3228_v11, %s3163_s23 }
  0x31   : > { %802 = vrot.lane.b32.xlu0 %v3253_v18, %s3163_s23 }
  0x32   : > { %804 = vrot.lane.b32.xlu1 %v3256_v19, %s3163_s23 }
  0x35   : > { %806 = vrot.lane.b32.xlu0 %v3274_v22, %s3163_s23 }
  0x36   : > { %808 = vrot.lane.b32.xlu1 %v3288_v24, %s3163_s23 }
  0x39   : > { %1064 = vrot.lane.b32.xlu0 %v3225_v9, %s3164_s24 }
  0x3a   : > { %1066 = vrot.lane.b32.xlu1 %v3237_v14, %s3164_s24 }
  0x3d   : > { %1068 = vrot.lane.b32.xlu0 %v3233_v13, %s3164_s24 }
  0x3e   : > { %1070 = vrot.lane.b32.xlu1 %v3245_v16, %s3164_s24 }
  0x41   : > { %1072 = vrot.lane.b32.xlu0 %v3228_v11, %s3164_s24 }
  0x42   : > { %1074 = vrot.lane.b32.xlu1 %v3253_v18, %s3164_s24 }
  0x45   : > { %1076 = vrot.lane.b32.xlu0 %v3256_v19, %s3164_s24 }
  0x46   : > { %1078 = vrot.lane.b32.xlu1 %v3274_v22, %s3164_s24 }
  0x49   : > { %1080 = vrot.lane.b32.xlu0 %v3288_v24, %s3164_s24 }
  0x4a   : > { %1336 = vrot.lane.b32.xlu1 %v3225_v9, %s3165_s25 }
  0x4d   : > { %1338 = vrot.lane.b32.xlu0 %v3237_v14, %s3165_s25 }
  0x4e   : > { %1340 = vrot.lane.b32.xlu1 %v3233_v13, %s3165_s25 }
  0x51   : > { %1342 = vrot.lane.b32.xlu0 %v3245_v16, %s3165_s25 }
  0x52   : > { %1344 = vrot.lane.b32.xlu1 %v3228_v11, %s3165_s25 }
  0x55   : > { %1346 = vrot.lane.b32.xlu0 %v3253_v18, %s3165_s25 }
  0x56   : > { %1348 = vrot.lane.b32.xlu1 %v3256_v19, %s3165_s25 }
  0x59   : > { %1350 = vrot.lane.b32.xlu0 %v3274_v22, %s3165_s25 }
  0x5a   : > { %1352 = vrot.lane.b32.xlu1 %v3288_v24, %s3165_s25  ;;  %s3093_s25 = smul.u32 18, %s3844_s12 }
  0x5d   : > { %1608 = vrot.lane.b32.xlu0 %v3225_v9, %s3166_s26 }
  0x5e   : > { %1610 = vrot.lane.b32.xlu1 %v3237_v14, %s3166_s26 }
  0x61   : > { %1612 = vrot.lane.b32.xlu0 %v3233_v13, %s3166_s26 }
  0x62   : > { %1614 = vrot.lane.b32.xlu1 %v3245_v16, %s3166_s26 }
  0x65   : > { %1616 = vrot.lane.b32.xlu0 %v3228_v11, %s3166_s26 }
  0x66   : > { %1618 = vrot.lane.b32.xlu1 %v3253_v18, %s3166_s26 }
  0x69   : > { %1620 = vrot.lane.b32.xlu0 %v3256_v19, %s3166_s26 }
  0x6a   : > { %1622 = vrot.lane.b32.xlu1 %v3274_v22, %s3166_s26 }
  0x6d   : > { %1624 = vrot.lane.b32.xlu0 %v3288_v24, %s3166_s26 }
  0x6e   : > { %1881 = vrot.lane.b32.xlu1 %v3225_v9, %s3167_s27 }
  0x71   : > { %1883 = vrot.lane.b32.xlu0 %v3237_v14, %s3167_s27 }
  0x72   : > { %1885 = vrot.lane.b32.xlu1 %v3233_v13, %s3167_s27 }
  0x75   : > { %1887 = vrot.lane.b32.xlu0 %v3245_v16, %s3167_s27 }
  0x76   : > { %1889 = vrot.lane.b32.xlu1 %v3228_v11, %s3167_s27 }
  0x79   : > { %1891 = vrot.lane.b32.xlu0 %v3253_v18, %s3167_s27 }
  0x7a   : > { %1893 = vrot.lane.b32.xlu1 %v3256_v19, %s3167_s27 }
  0x7d   : > { %1895 = vrot.lane.b32.xlu0 %v3274_v22, %s3167_s27 }
  0x7e   : > { %1897 = vrot.lane.b32.xlu1 %v3288_v24, %s3167_s27 }
  0x81   : > { %1899 = vrot.lane.b32.xlu0 %v3352_v27, %s3167_s27  ;;  %s3780_s27 = scalar_lea.vmem %s3828_s3, %s3093_s25 }
  0x82   : > { %2156 = vrot.lane.b32.xlu1 %v3225_v9, %s3168_s28 }
  0x85   : > { %2158 = vrot.lane.b32.xlu0 %v3237_v14, %s3168_s28 }
  0x86   : > { %2160 = vrot.lane.b32.xlu1 %v3233_v13, %s3168_s28 }
  0x87   : > { %v521_v28 = vpop.permute.xlu0 %520  ;;  %v525_v29 = vpop.permute.xlu1 %524 }
  0x89   : > { %2162 = vrot.lane.b32.xlu0 %v3245_v16, %s3168_s28 }
  0x8a   : > { %2164 = vrot.lane.b32.xlu1 %v3228_v11, %s3168_s28 }
  0x8b   : > { %v523_v30 = vpop.permute.xlu0 %522 }
  0x8c   : > { %v539_v31 = vsel %vm538_vm3, %v521_v28, %v523_v30  ;;  %v540_v32 = vsel %vm538_vm3, %v523_v30, %v525_v29  ;;  %v527_v34 = vpop.permute.xlu1 %526 }
  0x8d   : > { %v551_v33 = vsel %vm286_vm0, %v539_v31, 0  ;;  %2935 = vmatprep.subr.msk.bf16.mxu1 %vm286_vm0, %v540_v32  ;;  %2166 = vrot.lane.b32.xlu0 %v3253_v18, %s3168_s28  ;;  %v541_v35 = vsel %vm538_vm3, %v525_v29, %v527_v34 }
  0x8e   : > { %592 = vmatpush1.bf16.msra.mxu1 %v551_v33  ;;  %2168 = vrot.lane.b32.xlu1 %v3256_v19, %s3168_s28  ;;  %v557_v39 = vsel %vm286_vm0, %v541_v35, 0 }
  0x8f   : > { %v529_v37 = vpop.permute.xlu0 %528 }
  0x90   : > { %v542_v38 = vsel %vm538_vm3, %v527_v34, %v529_v37  ;;  %v531_v40 = vpop.permute.xlu1 %530 }
  0x91   : > { %2937 = vmatprep.subr.msk.bf16.mxu0 %vm286_vm0, %v542_v38  ;;  %2936 = vmatmul.mubr.msk.bf16.vlgmr.msra.gmra.mxu1 %vm282_vm1, %v2934_v36  ;;  %v543_v41 = vsel %vm538_vm3, %v529_v37, %v531_v40 }
  0x92   : > { %633 = vmatpush1.bf16.msra.mxu0 %v557_v39  ;;  %691 = vmatprep.mubr.bf16.mxu1 %v3159_v3  ;;  %v563_v44 = vsel %vm286_vm0, %v543_v41, 0 }
  0x93   : > { %v533_v42 = vpop.permute.xlu0 %532  ;;  %2170 = vrot.lane.b32.xlu0 %v3274_v22, %s3168_s28  ;;  %2172 = vrot.lane.b32.xlu1 %v3288_v24, %s3168_s28 }
  0x94   : > { %v544_v43 = vsel %vm538_vm3, %v531_v40, %v533_v42  ;;  %v535_v45 = vpop.permute.xlu1 %534 }
  0x95   : > { %2938 = vmatmul.mubr.msk.bf16.vlgmr.msra.gmra.mxu0 %vm282_vm1, %v2934_v36  ;;  %2939 = vmatprep.subr.msk.bf16.mxu1 %vm286_vm0, %v544_v43  ;;  %v545_v46 = vsel %vm538_vm3, %v533_v42, %v535_v45 }
  0x96   : > { %674 = vmatpush1.bf16.msra.mxu1 %v563_v44  ;;  %732 = vmatprep.mubr.bf16.mxu0 %v3159_v3  ;;  %v569_v50 = vsel %vm286_vm0, %v545_v46, 0 }
  0x97   : > { %v537_v47 = vpop.permute.xlu0 %536  ;;  %3044 = vmatprep.subr.bf16.mxu1 %v3161_v25  ;;  %2174 = vrot.lane.b32.xlu0 %v3352_v27, %s3168_s28 }
  0x98   : > { %v546_v48 = vsel %vm538_vm3, %v535_v45, %v537_v47  ;;  %v575_v49 = vsel %vm286_vm0, %v537_v47, 0  ;;  %2431 = vrot.lane.b32.xlu1 %v3225_v9, %s3169_s4  ;;  %v793_v51 = vpop.permute.xlu1 %792  ;;  %v232_v9 = vld [vmem:[%s3827_s2] sm:$0x7] }
  0x99   : > { %2941 = vmatprep.subr.msk.bf16.mxu0 %vm286_vm0, %v546_v48  ;;  %2940 = vmatmul.mubr.msk.bf16.vlgmr.msra.gmra.mxu1 %vm282_vm1, %v2934_v36 }
  0x9a   : > { %715 = vmatpush1.bf16.msra.mxu0 %v569_v50  ;;  %3045 = vmatpush3.bf16.msra.mxu1 %v575_v49 }
  0x9b   : > { %v795_v52 = vpop.permute.xlu0 %794  ;;  %3046 = vmatprep.mubr.msk.bf16.mxu1 %vm3162_vm2, %v3161_v25  ;;  %2433 = vrot.lane.b32.xlu0 %v3237_v14, %s3169_s4 }
  0x9c   : > { %v811_v53 = vsel %vm810_vm4, %v793_v51, %v795_v52  ;;  %2435 = vrot.lane.b32.xlu1 %v3233_v13, %s3169_s4  ;;  %v797_v54 = vpop.permute.xlu1 %796 }
  0x9d   : > { %2942 = vmatmul.mubr.msk.bf16.vlgmr.msra.gmra.mxu0 %vm282_vm1, %v2934_v36  ;;  %v812_v55 = vsel %vm810_vm4, %v795_v52, %v797_v54  ;;  %v823_v56 = vsel %vm286_vm0, %v811_v53, 0  ;;  %v2964_v52 = vld [vmem:[%s3826_s1 + $0x8] sm:$0x3] }
  0x9e   : > { %881 = vmatprep.mubr.bf16.mxu0 %v3159_v3  ;;  %2945 = vmatprep.subr.msk.bf16.mxu0 %vm286_vm0, %v812_v55 }
  0x9f   : > { %v799_v57 = vpop.permute.xlu0 %798  ;;  %2437 = vrot.lane.b32.xlu0 %v3245_v16, %s3169_s4  ;;  %864 = vmatpush1.bf16.msra.mxu0 %v823_v56 }
  0xa0   : > { %v813_v58 = vsel %vm810_vm4, %v797_v54, %v799_v57  ;;  %2439 = vrot.lane.b32.xlu1 %v3228_v11, %s3169_s4  ;;  %v801_v59 = vpop.permute.xlu1 %800 }
  0xa1   : > { %3047 = vmatmul.mubr.msk.bf16.vlgmr.msra.gmra.mxu1 %vm282_vm1, %v2934_v36  ;;  %v814_v60 = vsel %vm810_vm4, %v799_v57, %v801_v59  ;;  %v829_v62 = vsel %vm286_vm0, %v813_v58, 0 }
  0xa2   : > { %922 = vmatprep.mubr.bf16.mxu1 %v3159_v3  ;;  %2947 = vmatprep.subr.msk.bf16.mxu1 %vm286_vm0, %v814_v60 }
  0xa3   : > { %v803_v63 = vpop.permute.xlu0 %802  ;;  %2441 = vrot.lane.b32.xlu0 %v3253_v18, %s3169_s4  ;;  %905 = vmatpush1.bf16.msra.mxu1 %v829_v62 }
  0xa4   : > { %v815_v0 = vsel %vm810_vm4, %v801_v59, %v803_v63  ;;  %2443 = vrot.lane.b32.xlu1 %v3256_v19, %s3169_s4  ;;  %v805_v1 = vpop.permute.xlu1 %804 }
  0xa5   : > { %2946 = vmatmul.mubr.msk.bf16.vlgmr.msra.gmra.mxu0 %vm282_vm1, %v2944_v61  ;;  %v816_v2 = vsel %vm810_vm4, %v803_v63, %v805_v1  ;;  %v835_v4 = vsel %vm286_vm0, %v815_v0, 0 }
  0xa6   : > { %963 = vmatprep.mubr.bf16.mxu0 %v3159_v3  ;;  %2949 = vmatprep.subr.msk.bf16.mxu0 %vm286_vm0, %v816_v2 }
  0xa7   : > { %v807_v5 = vpop.permute.xlu0 %806  ;;  %2445 = vrot.lane.b32.xlu0 %v3274_v22, %s3169_s4  ;;  %946 = vmatpush1.bf16.msra.mxu0 %v835_v4 }
  0xa8   : > { %v817_v7 = vsel %vm810_vm4, %v805_v1, %v807_v5  ;;  %2447 = vrot.lane.b32.xlu1 %v3288_v24, %s3169_s4  ;;  %v809_v8 = vpop.permute.xlu1 %808  ;;  %3050 = vmatprep.subr.bf16.mxu0 %v3161_v25 }
  0xa9   : > { %2948 = vmatmul.mubr.msk.bf16.vlgmr.msra.gmra.mxu1 %vm282_vm1, %v2944_v61  ;;  %v818_v10 = vsel %vm810_vm4, %v807_v5, %v809_v8  ;;  %v841_v11 = vsel %vm286_vm0, %v817_v7, 0  ;;  %v847_v12 = vsel %vm286_vm0, %v809_v8, 0  ;;  %vm2786_vm4 = vcmask 1047558  }
  0xaa   : > { %1004 = vmatprep.mubr.bf16.mxu1 %v3159_v3  ;;  %2951 = vmatprep.subr.msk.bf16.mxu1 %vm286_vm0, %v818_v10 }
  0xab   : > { %v1065_v13 = vpop.permute.xlu0 %1064  ;;  %2449 = vrot.lane.b32.xlu0 %v3352_v27, %s3169_s4  ;;  %987 = vmatpush1.bf16.msra.mxu1 %v841_v11  ;;  %v2954_v27 = vld [vmem:[%s3826_s1 + $0x6] sm:$0x3] }
  0xac   : > { %235 = vperm.xlu1 %3130, %v232_v9   ;;  %v1067_v14 = vpop.permute.xlu1 %1066 }
  0xad   : > { %2950 = vmatmul.mubr.msk.bf16.vlgmr.msra.gmra.mxu0 %vm282_vm1, %v2944_v61  ;;  %v1083_v15 = vsel %vm1082_vm5, %v1065_v13, %v1067_v14 }
  0xae   : > { %3051 = vmatpush3.bf16.msra.mxu0 %v847_v12  ;;  %3052 = vmatprep.mubr.msk.bf16.mxu0 %vm3162_vm2, %v3161_v25  ;;  %v1095_v17 = vsel %vm286_vm0, %v1083_v15, 0 }
  0xaf   : > { %v1069_v16 = vpop.permute.xlu0 %1068 }
  0xb0   : > { %v1084_v18 = vsel %vm1082_vm5, %v1067_v14, %v1069_v16  ;;  %v1071_v19 = vpop.permute.xlu1 %1070 }
  0xb1   : > { %2952 = vmatmul.mubr.msk.bf16.vlgmr.msra.gmra.mxu1 %vm282_vm1, %v2944_v61  ;;  %2955 = vmatprep.subr.msk.bf16.mxu1 %vm286_vm0, %v1084_v18  ;;  %v1085_v20 = vsel %vm1082_vm5, %v1069_v16, %v1071_v19  ;;  %v2974_v16 = vld [vmem:[%s3826_s1 + $0xa] sm:$0x3] }
  0xb2   : > { %1136 = vmatpush1.bf16.msra.mxu1 %v1095_v17  ;;  %1153 = vmatprep.mubr.bf16.mxu1 %v3159_v3  ;;  %v1101_v22 = vsel %vm286_vm0, %v1085_v20, 0 }
  0xb3   : > { %v1073_v21 = vpop.permute.xlu0 %1072 }
  0xb4   : > { %v1086_v23 = vsel %vm1082_vm5, %v1071_v19, %v1073_v21  ;;  %v1075_v24 = vpop.permute.xlu1 %1074 }
  0xb5   : > { %3053 = vmatmul.mubr.msk.bf16.vlgmr.msra.gmra.mxu0 %vm282_vm1, %v2944_v61  ;;  %2957 = vmatprep.subr.msk.bf16.mxu0 %vm286_vm0, %v1086_v23  ;;  %v1087_v26 = vsel %vm1082_vm5, %v1073_v21, %v1075_v24 }
  0xb6   : > { %1177 = vmatpush1.bf16.msra.mxu0 %v1101_v22  ;;  %1194 = vmatprep.mubr.bf16.mxu0 %v3159_v3  ;;  %v1107_v29 = vsel %vm286_vm0, %v1087_v26, 0 }
  0xb7   : > { %v1077_v28 = vpop.permute.xlu0 %1076 }
  0xb8   : > { %v1088_v30 = vsel %vm1082_vm5, %v1075_v24, %v1077_v28  ;;  %v1079_v31 = vpop.permute.xlu1 %1078 }
  0xb9   : > { %2956 = vmatmul.mubr.msk.bf16.vlgmr.msra.gmra.mxu1 %vm282_vm1, %v2954_v27  ;;  %2959 = vmatprep.subr.msk.bf16.mxu1 %vm286_vm0, %v1088_v30  ;;  %v1089_v32 = vsel %vm1082_vm5, %v1077_v28, %v1079_v31 }
  0xba   : > { %1218 = vmatpush1.bf16.msra.mxu1 %v1107_v29  ;;  %1235 = vmatprep.mubr.bf16.mxu1 %v3159_v3  ;;  %v1113_v34 = vsel %vm286_vm0, %v1089_v32, 0 }
  0xbb   : > { %v1081_v33 = vpop.permute.xlu0 %1080  ;;  %3056 = vmatprep.subr.bf16.mxu1 %v3161_v25 }
  0xbc   : > { %v1090_v35 = vsel %vm1082_vm5, %v1079_v31, %v1081_v33  ;;  %v1337_v36 = vpop.permute.xlu1 %1336  ;;  %v1119_v37 = vsel %vm286_vm0, %v1081_v33, 0  ;;  %vm2787_vm5 = vsmask.f32 7424 }
  0xbd   : > { %2958 = vmatmul.mubr.msk.bf16.vlgmr.msra.gmra.mxu0 %vm282_vm1, %v2954_v27  ;;  %2961 = vmatprep.subr.msk.bf16.mxu0 %vm286_vm0, %v1090_v35 }
  0xbe   : > { %1259 = vmatpush1.bf16.msra.mxu0 %v1113_v34  ;;  %1276 = vmatprep.mubr.bf16.mxu0 %v3159_v3 }
  0xbf   : > { %v1339_v38 = vpop.permute.xlu0 %1338 }
  0xc0   : > { %v1355_v39 = vsel %vm1354_vm6, %v1337_v36, %v1339_v38  ;;  %v1341_v40 = vpop.permute.xlu1 %1340 }
  0xc1   : > { %2960 = vmatmul.mubr.msk.bf16.vlgmr.msra.gmra.mxu1 %vm282_vm1, %v2954_v27  ;;  %v1356_v41 = vsel %vm1354_vm6, %v1339_v38, %v1341_v40  ;;  %v1367_v42 = vsel %vm286_vm0, %v1355_v39, 0 }
  0xc2   : > { %3057 = vmatpush3.bf16.msra.mxu1 %v1119_v37  ;;  %3058 = vmatprep.mubr.msk.bf16.mxu1 %vm3162_vm2, %v3161_v25 }
  0xc3   : > { %2965 = vmatprep.subr.msk.bf16.mxu0 %vm286_vm0, %v1356_v41  ;;  %v1343_v43 = vpop.permute.xlu0 %1342 }
  0xc4   : > { %v1357_v44 = vsel %vm1354_vm6, %v1341_v40, %v1343_v43  ;;  %v1345_v45 = vpop.permute.xlu1 %1344 }
  0xc5   : > { %2962 = vmatmul.mubr.msk.bf16.vlgmr.msra.gmra.mxu0 %vm282_vm1, %v2954_v27  ;;  %v1358_v46 = vsel %vm1354_vm6, %v1343_v43, %v1345_v45  ;;  %v1373_v47 = vsel %vm286_vm0, %v1357_v44, 0 }
  0xc6   : > { %1408 = vmatpush1.bf16.msra.mxu0 %v1367_v42  ;;  %1425 = vmatprep.mubr.bf16.mxu0 %v3159_v3 }
  0xc7   : > { %2967 = vmatprep.subr.msk.bf16.mxu1 %vm286_vm0, %v1358_v46  ;;  %v1347_v48 = vpop.permute.xlu0 %1346 }
  0xc8   : > { %v1359_v49 = vsel %vm1354_vm6, %v1345_v45, %v1347_v48  ;;  %v1349_v50 = vpop.permute.xlu1 %1348 }
  0xc9   : > { %3059 = vmatmul.mubr.msk.bf16.vlgmr.msra.gmra.mxu1 %vm282_vm1, %v2954_v27  ;;  %v1360_v51 = vsel %vm1354_vm6, %v1347_v48, %v1349_v50  ;;  %v1379_v53 = vsel %vm286_vm0, %v1359_v49, 0 }
  0xca   : > { %1449 = vmatpush1.bf16.msra.mxu1 %v1373_v47  ;;  %1466 = vmatprep.mubr.bf16.mxu1 %v3159_v3 }
  0xcb   : > { %2969 = vmatprep.subr.msk.bf16.mxu0 %vm286_vm0, %v1360_v51  ;;  %v1351_v54 = vpop.permute.xlu0 %1350 }
  0xcc   : > { %v1361_v55 = vsel %vm1354_vm6, %v1349_v50, %v1351_v54  ;;  %v1353_v56 = vpop.permute.xlu1 %1352 }
  0xcd   : > { %2966 = vmatmul.mubr.msk.bf16.vlgmr.msra.gmra.mxu0 %vm282_vm1, %v2964_v52  ;;  %v1362_v57 = vsel %vm1354_vm6, %v1351_v54, %v1353_v56  ;;  %v1385_v58 = vsel %vm286_vm0, %v1361_v55, 0  ;;  %v1391_v61 = vsel %vm286_vm0, %v1353_v56, 0 }
  0xce   : > { %1490 = vmatpush1.bf16.msra.mxu0 %v1379_v53  ;;  %1507 = vmatprep.mubr.bf16.mxu0 %v3159_v3 }
  0xcf   : > { %2971 = vmatprep.subr.msk.bf16.mxu1 %vm286_vm0, %v1362_v57  ;;  %v1609_v59 = vpop.permute.xlu0 %1608  ;;  %3062 = vmatprep.subr.bf16.mxu0 %v3161_v25 }
  0xd0   : > { %v1611_v60 = vpop.permute.xlu1 %1610 }
  0xd1   : > { %2968 = vmatmul.mubr.msk.bf16.vlgmr.msra.gmra.mxu1 %vm282_vm1, %v2964_v52  ;;  %v1627_v63 = vsel %vm1626_vm7, %v1609_v59, %v1611_v60  ;;  %v2984_v59 = vld [vmem:[%s3826_s1 + $0xc] sm:$0x3] }
  0xd2   : > { %1531 = vmatpush1.bf16.msra.mxu1 %v1385_v58  ;;  %1548 = vmatprep.mubr.bf16.mxu1 %v3159_v3  ;;  %v1639_v2 = vsel %vm286_vm0, %v1627_v63, 0 }
  0xd3   : > { %v1613_v62 = vpop.permute.xlu0 %1612 }
  0xd4   : > { %v1628_v0 = vsel %vm1626_vm7, %v1611_v60, %v1613_v62  ;;  %v1615_v1 = vpop.permute.xlu1 %1614 }
  0xd5   : > { %2970 = vmatmul.mubr.msk.bf16.vlgmr.msra.gmra.mxu0 %vm282_vm1, %v2964_v52  ;;  %2975 = vmatprep.subr.msk.bf16.mxu1 %vm286_vm0, %v1628_v0  ;;  %v1629_v5 = vsel %vm1626_vm7, %v1613_v62, %v1615_v1 }
  0xd6   : > { %3063 = vmatpush3.bf16.msra.mxu0 %v1391_v61  ;;  %3064 = vmatprep.mubr.msk.bf16.mxu0 %vm3162_vm2, %v3161_v25  ;;  %v1645_v9 = vsel %vm286_vm0, %v1629_v5, 0 }
  0xd7   : > { %v1617_v4 = vpop.permute.xlu0 %1616 }
  0xd8   : > { %v1630_v7 = vsel %vm1626_vm7, %v1615_v1, %v1617_v4  ;;  %v1619_v8 = vpop.permute.xlu1 %1618 }
  0xd9   : > { %2972 = vmatmul.mubr.msk.bf16.vlgmr.msra.gmra.mxu1 %vm282_vm1, %v2964_v52  ;;  %2977 = vmatprep.subr.msk.bf16.mxu0 %vm286_vm0, %v1630_v7  ;;  %v1631_v12 = vsel %vm1626_vm7, %v1617_v4, %v1619_v8 }
  0xda   : > { %1680 = vmatpush1.bf16.msra.mxu1 %v1639_v2  ;;  %1697 = vmatprep.mubr.bf16.mxu1 %v3159_v3  ;;  %v1651_v18 = vsel %vm286_vm0, %v1631_v12, 0 }
  0xdb   : > { %v1621_v10 = vpop.permute.xlu0 %1620  ;;  %v3533_v11 = vpop.f32.mrf.mxu0 }
  0xdc   : > { %v1632_v13 = vsel %vm1626_vm7, %v1619_v8, %v1621_v10  ;;  %v1623_v14 = vpop.permute.xlu1 %1622  ;;  %v3545_v17 = vpop.f32.mrf.mxu1 }
  0xdd   : > { %3065 = vmatmul.mubr.msk.bf16.vlgmr.msra.gmra.mxu0 %vm282_vm1, %v2964_v52  ;;  %2979 = vmatprep.subr.msk.bf16.mxu1 %vm286_vm0, %v1632_v13  ;;  %v3539_v15 = vpop.f32.mrf.mxu0  ;;  %v1633_v21 = vsel %vm1626_vm7, %v1621_v10, %v1623_v14 }
  0xde   : > { %1721 = vmatpush1.bf16.msra.mxu0 %v1645_v9  ;;  %1738 = vmatprep.mubr.bf16.mxu0 %v3159_v3  ;;  %v3550_v23 = vpop.f32.mrf.mxu1  ;;  %v1657_v28 = vsel %vm286_vm0, %v1633_v21, 0 }
  0xdf   : > { %v1625_v19 = vpop.permute.xlu0 %1624  ;;  %v352_v20 = vpop.f32.mrf.mxu0 }
  0xe0   : > { %v1634_v22 = vsel %vm1626_vm7, %v1623_v14, %v1625_v19  ;;  %v1882_v24 = vpop.permute.xlu1 %1881  ;;  %v393_v27 = vpop.f32.mrf.mxu1  ;;  %v1663_v36 = vsel %vm286_vm0, %v1625_v19, 0  ;;  %vm3783_vm7 = vmand %vm2786_vm4, %vm2787_vm5 }
  0xe1   : > { %2976 = vmatmul.mubr.msk.bf16.vlgmr.msra.gmra.mxu1 %vm282_vm1, %v2974_v16  ;;  %2981 = vmatprep.subr.msk.bf16.mxu0 %vm286_vm0, %v1634_v22  ;;  %v353_v26 = vpop.f32.mrf.mxu0  ;;  %v2994_v27 = vld [vmem:[%s3826_s1 + $0xe] sm:$0x3] }
  0xe2   : > { %1762 = vmatpush1.bf16.msra.mxu1 %v1651_v18  ;;  %1779 = vmatprep.mubr.bf16.mxu1 %v3159_v3  ;;  %v394_v31 = vpop.f32.mrf.mxu1 }
  0xe3   : > { %3068 = vmatprep.subr.bf16.mxu1 %v3161_v25  ;;  %v1884_v29 = vpop.permute.xlu0 %1883  ;;  %v3557_v30 = vpop.f32.mrf.mxu0 }
  0xe4   : > { %v1886_v32 = vpop.permute.xlu1 %1885  ;;  %v3564_v35 = vpop.f32.mrf.mxu1  ;;  %v1902_v39 = vsel %vm1901_vm8, %v1882_v24, %v1884_v29 }
  0xe5   : > { %2978 = vmatmul.mubr.msk.bf16.vlgmr.msra.gmra.mxu0 %vm282_vm1, %v2974_v16  ;;  %v3560_v33 = vpop.f32.mrf.mxu0  ;;  %v1903_v34 = vsel %vm1901_vm8, %v1884_v29, %v1886_v32  ;;  %v1915_v45 = vsel %vm286_vm0, %v1902_v39, 0 }
  0xe6   : > { %1803 = vmatpush1.bf16.msra.mxu0 %v1657_v28  ;;  %1820 = vmatprep.mubr.bf16.mxu0 %v3159_v3  ;;  %v3569_v40 = vpop.f32.mrf.mxu1 }
  0xe7   : > { %2985 = vmatprep.subr.msk.bf16.mxu0 %vm286_vm0, %v1903_v34  ;;  %v1888_v37 = vpop.permute.xlu0 %1887  ;;  %v434_v38 = vpop.f32.mrf.mxu0 }
  0xe8   : > { %v1890_v41 = vpop.permute.xlu1 %1889  ;;  %v475_v44 = vpop.f32.mrf.mxu1  ;;  %v1904_v48 = vsel %vm1901_vm8, %v1886_v32, %v1888_v37 }
  0xe9   : > { %2980 = vmatmul.mubr.msk.bf16.vlgmr.msra.gmra.mxu1 %vm282_vm1, %v2974_v16  ;;  %v435_v42 = vpop.f32.mrf.mxu0  ;;  %v1905_v43 = vsel %vm1901_vm8, %v1888_v37, %v1890_v41  ;;  %v1921_v53 = vsel %vm286_vm0, %v1904_v48, 0 }
  0xea   : > { %3069 = vmatpush3.bf16.msra.mxu1 %v1663_v36  ;;  %3070 = vmatprep.mubr.msk.bf16.mxu1 %vm3162_vm2, %v3161_v25  ;;  %v476_v49 = vpop.f32.mrf.mxu1 }
  0xeb   : > { %2987 = vmatprep.subr.msk.bf16.mxu1 %vm286_vm0, %v1905_v43  ;;  %v1892_v46 = vpop.permute.xlu0 %1891  ;;  %v3577_v47 = vpop.f32.mrf.mxu0 }
  0xec   : > { %v1894_v50 = vpop.permute.xlu1 %1893  ;;  %v1906_v56 = vsel %vm1901_vm8, %v1890_v41, %v1892_v46 }
  0xed   : > { %2982 = vmatmul.mubr.msk.bf16.vlgmr.msra.gmra.mxu0 %vm282_vm1, %v2974_v16  ;;  %v3042_v51 = vpop.f32.mrf.mxu0  ;;  %v1907_v52 = vsel %vm1901_vm8, %v1892_v46, %v1894_v50  ;;  %v1927_v61 = vsel %vm286_vm0, %v1906_v56, 0  ;;  %v3004_v56 = vld [vmem:[%s3826_s1 + $0x10] sm:$0x3] }
  0xee   : > { %1956 = vmatpush1.bf16.msra.mxu0 %v1915_v45  ;;  %1973 = vmatprep.mubr.bf16.mxu0 %v3159_v3 }
  0xef   : > { %2989 = vmatprep.subr.msk.bf16.mxu0 %vm286_vm0, %v1907_v52  ;;  %v1896_v54 = vpop.permute.xlu0 %1895  ;;  %v515_v55 = vpop.f32.mrf.mxu0 }
  0xf0   : > { %v1898_v57 = vpop.permute.xlu1 %1897  ;;  %v1908_v63 = vsel %vm1901_vm8, %v1894_v50, %v1896_v54 }
  0xf1   : > { %3071 = vmatmul.mubr.msk.bf16.vlgmr.msra.gmra.mxu1 %vm282_vm1, %v2974_v16  ;;  %v3043_v58 = vpop.f32.mrf.mxu0  ;;  %v1909_v60 = vsel %vm1901_vm8, %v1896_v54, %v1898_v57  ;;  %v1933_v1 = vsel %vm286_vm0, %v1908_v63, 0 }
  0xf2   : > { %1997 = vmatpush1.bf16.msra.mxu1 %v1921_v53  ;;  %2014 = vmatprep.mubr.bf16.mxu1 %v3159_v3 }
  0xf3   : > { %2991 = vmatprep.subr.msk.bf16.mxu1 %vm286_vm0, %v1909_v60  ;;  %v1900_v62 = vpop.permute.xlu0 %1899 }
  0xf4   : > { %v2157_v0 = vpop.permute.xlu1 %2156  ;;  %v1910_v4 = vsel %vm1901_vm8, %v1898_v57, %v1900_v62 }
  0xf5   : > { %2986 = vmatmul.mubr.msk.bf16.vlgmr.msra.gmra.mxu0 %vm282_vm1, %v2984_v59  ;;  %v1939_v8 = vsel %vm286_vm0, %v1910_v4, 0 }
  0xf6   : > { %2038 = vmatpush1.bf16.msra.mxu0 %v1927_v61  ;;  %2055 = vmatprep.mubr.bf16.mxu0 %v3159_v3 }
  0xf7   : > { %3074 = vmatprep.subr.bf16.mxu0 %v3161_v25  ;;  %v2159_v2 = vpop.permute.xlu0 %2158 }
  0xf8   : > { %v2161_v5 = vpop.permute.xlu1 %2160  ;;  %v2177_v10 = vsel %vm2176_vm9, %v2157_v0, %v2159_v2 }
  0xf9   : > { %2988 = vmatmul.mubr.msk.bf16.vlgmr.msra.gmra.mxu1 %vm282_vm1, %v2984_v59  ;;  %v2178_v7 = vsel %vm2176_vm9, %v2159_v2, %v2161_v5  ;;  %v2190_v14 = vsel %vm286_vm0, %v2177_v10, 0 }
  0xfa   : > { %2079 = vmatpush1.bf16.msra.mxu1 %v1933_v1  ;;  %2096 = vmatprep.mubr.bf16.mxu1 %v3159_v3 }
  0xfb   : > { %2995 = vmatprep.subr.msk.bf16.mxu1 %vm286_vm0, %v2178_v7  ;;  %v2163_v9 = vpop.permute.xlu0 %2162 }
  0xfc   : > { %v2165_v12 = vpop.permute.xlu1 %2164  ;;  %v2179_v18 = vsel %vm2176_vm9, %v2161_v5, %v2163_v9 }
  0xfd   : > { %2990 = vmatmul.mubr.msk.bf16.vlgmr.msra.gmra.mxu0 %vm282_vm1, %v2984_v59  ;;  %v2180_v13 = vsel %vm2176_vm9, %v2163_v9, %v2165_v12  ;;  %v2196_v21 = vsel %vm286_vm0, %v2179_v18, 0 }
  0xfe   : > { %3075 = vmatpush3.bf16.msra.mxu0 %v1939_v8  ;;  %3076 = vmatprep.mubr.msk.bf16.mxu0 %vm3162_vm2, %v3161_v25 }
  0xff   : > { %2997 = vmatprep.subr.msk.bf16.mxu0 %vm286_vm0, %v2180_v13  ;;  %v2167_v16 = vpop.permute.xlu0 %2166 }
 0x100   : > { %v2169_v19 = vpop.permute.xlu1 %2168  ;;  %v2181_v22 = vsel %vm2176_vm9, %v2165_v12, %v2167_v16 }
 0x101   : > { %2992 = vmatmul.mubr.msk.bf16.vlgmr.msra.gmra.mxu1 %vm282_vm1, %v2984_v59  ;;  %v2182_v20 = vsel %vm2176_vm9, %v2167_v16, %v2169_v19  ;;  %v2202_v29 = vsel %vm286_vm0, %v2181_v22, 0 }
 0x102   : > { %2231 = vmatpush1.bf16.msra.mxu1 %v2190_v14  ;;  %2248 = vmatprep.mubr.bf16.mxu1 %v3159_v3 }
 0x103   : > { %2999 = vmatprep.subr.msk.bf16.mxu1 %vm286_vm0, %v2182_v20 }
 0x105   : > { %3077 = vmatmul.mubr.msk.bf16.vlgmr.msra.gmra.mxu0 %vm282_vm1, %v2984_v59  ;;  %v2171_v24 = vpop.permute.xlu0 %2170  ;;  %v2173_v26 = vpop.permute.xlu1 %2172 }
 0x106   : > { %2272 = vmatpush1.bf16.msra.mxu0 %v2196_v21  ;;  %v2184_v28 = vsel %vm2176_vm9, %v2171_v24, %v2173_v26  ;;  %2289 = vmatprep.mubr.bf16.mxu0 %v3159_v3  ;;  %v2183_v31 = vsel %vm2176_vm9, %v2169_v19, %v2171_v24 }
 0x107   : > { %3001 = vmatprep.subr.msk.bf16.mxu0 %vm286_vm0, %v2184_v28  ;;  %v2208_v36 = vsel %vm286_vm0, %v2183_v31, 0 }
 0x109   : > { %2996 = vmatmul.mubr.msk.bf16.vlgmr.msra.gmra.mxu1 %vm282_vm1, %v2994_v27  ;;  %v2175_v32 = vpop.permute.xlu0 %2174 }
 0x10a   : > { %2313 = vmatpush1.bf16.msra.mxu1 %v2202_v29  ;;  %v2432_v34 = vpop.permute.xlu1 %2431  ;;  %2330 = vmatprep.mubr.bf16.mxu1 %v3159_v3  ;;  %v2185_v37 = vsel %vm2176_vm9, %v2173_v26, %v2175_v32  ;;  %vm2796_vm9 = vcmask 517120  }
 0x10b   : > { %3080 = vmatprep.subr.bf16.mxu1 %v3161_v25  ;;  %v2214_v41 = vsel %vm286_vm0, %v2185_v37, 0 }
 0x10d   : > { %2998 = vmatmul.mubr.msk.bf16.vlgmr.msra.gmra.mxu0 %vm282_vm1, %v2994_v27  ;;  %v2434_v38 = vpop.permute.xlu0 %2433 }
 0x10e   : > { %2354 = vmatpush1.bf16.msra.mxu0 %v2208_v36  ;;  %v2436_v39 = vpop.permute.xlu1 %2435  ;;  %2371 = vmatprep.mubr.bf16.mxu0 %v3159_v3  ;;  %v2452_v43 = vsel %vm2451_vm10, %v2432_v34, %v2434_v38 }
 0x10f   : > { %v2453_v42 = vsel %vm2451_vm10, %v2434_v38, %v2436_v39  ;;  %v2465_v46 = vsel %vm286_vm0, %v2452_v43, 0 }
 0x110   : > { %3005 = vmatprep.subr.msk.bf16.mxu0 %vm286_vm0, %v2453_v42 }
 0x111   : > { %3000 = vmatmul.mubr.msk.bf16.vlgmr.msra.gmra.mxu1 %vm282_vm1, %v2994_v27  ;;  %v2438_v44 = vpop.permute.xlu0 %2437 }
 0x112   : > { %3081 = vmatpush3.bf16.msra.mxu1 %v2214_v41  ;;  %v2440_v45 = vpop.permute.xlu1 %2439  ;;  %3082 = vmatprep.mubr.msk.bf16.mxu1 %vm3162_vm2, %v3161_v25  ;;  %v2454_v49 = vsel %vm2451_vm10, %v2436_v39, %v2438_v44 }
 0x113   : > { %v2455_v48 = vsel %vm2451_vm10, %v2438_v44, %v2440_v45  ;;  %v2471_v52 = vsel %vm286_vm0, %v2454_v49, 0 }
 0x114   : > { %3007 = vmatprep.subr.msk.bf16.mxu1 %vm286_vm0, %v2455_v48 }
 0x115   : > { %3002 = vmatmul.mubr.msk.bf16.vlgmr.msra.gmra.mxu0 %vm282_vm1, %v2994_v27  ;;  %v2442_v50 = vpop.permute.xlu0 %2441 }
 0x116   : > { %2506 = vmatpush1.bf16.msra.mxu0 %v2465_v46  ;;  %v2444_v51 = vpop.permute.xlu1 %2443  ;;  %2523 = vmatprep.mubr.bf16.mxu0 %v3159_v3  ;;  %v2456_v54 = vsel %vm2451_vm10, %v2440_v45, %v2442_v50 }
 0x117   : > { %v2457_v53 = vsel %vm2451_vm10, %v2442_v50, %v2444_v51  ;;  %v2477_v58 = vsel %vm286_vm0, %v2456_v54, 0 }
 0x118   : > { %3009 = vmatprep.subr.msk.bf16.mxu0 %vm286_vm0, %v2457_v53 }
 0x119   : > { %3083 = vmatmul.mubr.msk.bf16.vlgmr.msra.gmra.mxu1 %vm282_vm1, %v2994_v27  ;;  %v2446_v55 = vpop.permute.xlu0 %2445 }
 0x11a   : > { %2547 = vmatpush1.bf16.msra.mxu1 %v2471_v52  ;;  %v2448_v57 = vpop.permute.xlu1 %2447  ;;  %2564 = vmatprep.mubr.bf16.mxu1 %v3159_v3  ;;  %v2458_v60 = vsel %vm2451_vm10, %v2444_v51, %v2446_v55 }
 0x11b   : > { %v2459_v59 = vsel %vm2451_vm10, %v2446_v55, %v2448_v57  ;;  %v2483_v62 = vsel %vm286_vm0, %v2458_v60, 0 }
 0x11c   : > { %3011 = vmatprep.subr.msk.bf16.mxu1 %vm286_vm0, %v2459_v59 }
 0x11d   : > { %3006 = vmatmul.mubr.msk.bf16.vlgmr.msra.gmra.mxu0 %vm282_vm1, %v3004_v56  ;;  %v2450_v61 = vpop.permute.xlu0 %2449 }
 0x11e   : > { %2588 = vmatpush1.bf16.msra.mxu0 %v2477_v58  ;;  %2605 = vmatprep.mubr.bf16.mxu0 %v3159_v3  ;;  %v2460_v63 = vsel %vm2451_vm10, %v2448_v57, %v2450_v61  ;;  %vm2797_vm10 = vmand %vm2796_vm9, %vm2776_vm11 }
 0x11f   : > { %3086 = vmatprep.subr.bf16.mxu0 %v3161_v25  ;;  %v2489_v0 = vsel %vm286_vm0, %v2460_v63, 0  ;;  %vm2781_vm0 = vmor %vm3740_vm15, %vm3736_vm14 }
 0x121   : > { %3008 = vmatmul.mubr.msk.bf16.vlgmr.msra.gmra.mxu1 %vm282_vm1, %v3004_v56 }
 0x122   : > { %2629 = vmatpush1.bf16.msra.mxu1 %v2483_v62  ;;  %2646 = vmatprep.mubr.bf16.mxu1 %v3159_v3 }
 0x125   : > { %3010 = vmatmul.mubr.msk.bf16.vlgmr.msra.gmra.mxu0 %vm282_vm1, %v3004_v56 }
 0x126   : > { %3087 = vmatpush3.bf16.msra.mxu0 %v2489_v0  ;;  %3088 = vmatprep.mubr.msk.bf16.mxu0 %vm3162_vm2, %v3161_v25  ;;  %vm2783_vm2 = vsmask.f32 5376 }
 0x127   : > { %v236_v10 = vpop.permute.xlu1 %235 }
 0x128   : > { %v472_v14 = vadd.f32 %v3564_v35, %v236_v10  ;;  %v474_v25 = vadd.f32 %v3569_v40, %v236_v10  ;;  %v513_v22 = vadd.f32 %v3577_v47, %v236_v10  ;;  %v349_v28 = vadd.f32 %v3533_v11, %v236_v10 }
 0x129   : > { %3012 = vmatmul.mubr.msk.bf16.vlgmr.msra.gmra.mxu1 %vm282_vm1, %v3004_v56  ;;  %v351_v35 = vadd.f32 %v3539_v15, %v236_v10  ;;  %v390_v40 = vadd.f32 %v3545_v17, %v236_v10  ;;  %v392_v47 = vadd.f32 %v3550_v23, %v236_v10  ;;  %v431_v46 = vadd.f32 %v3557_v30, %v236_v10 }
 0x12a   : > { %v433_v51 = vadd.f32 %v3560_v33, %v236_v10 }
 0x12d   : > { %3089 = vmatmul.mubr.msk.bf16.vlgmr.msra.gmra.mxu0 %vm282_vm1, %v3004_v56  ;;  %vm2782_vm1 = vcmask 1045508  }
 0x12e   : > { %vm3755_vm3 = vmand %vm2782_vm1, %vm2783_vm2 }
 0x12f   : > { %vm3772_vm6 = vmor %vm3755_vm3, %vm2781_vm0 }
 0x130   : > { %vm2789_vm8 = vmor %vm3783_vm7, %vm3772_vm6 }
 0x151   : > { %v611_v1 = vpop.f32.mrf.mxu1 }
 0x152   : > { %v781_v34 = vadd.f32 %v611_v1, %v349_v28 }
 0x153   : > { %v613_v2 = vpop.f32.mrf.mxu1 }
 0x154   : > { %v782_v38 = vadd.f32 %v613_v2, %v351_v35 }
 0x155   : > { %v615_v4 = vpop.f32.mrf.mxu1  ;;  %v652_v5 = vpop.f32.mrf.mxu0 }
 0x156   : > { %v783_v43 = vadd.f32 %v652_v5, %v390_v40 }
 0x157   : > { %v616_v7 = vpop.f32.mrf.mxu1  ;;  %v654_v8 = vpop.f32.mrf.mxu0 }
 0x158   : > { %v784_v48 = vadd.f32 %v654_v8, %v392_v47 }
 0x159   : > { %v656_v9 = vpop.f32.mrf.mxu0  ;;  %v693_v3 = vpop.f32.mrf.mxu1 }
 0x15a   : > { %v785_v52 = vadd.f32 %v693_v3, %v431_v46 }
 0x15b   : > { %v657_v12 = vpop.f32.mrf.mxu0  ;;  %v695_v13 = vpop.f32.mrf.mxu1 }
 0x15c   : > { %v786_v55 = vadd.f32 %v695_v13, %v433_v51 }
 0x15d   : > { %v697_v16 = vpop.f32.mrf.mxu1  ;;  %v734_v18 = vpop.f32.mrf.mxu0 }
 0x15e   : > { %v787_v19 = vadd.f32 %v734_v18, %v472_v14 }
 0x15f   : > { %v698_v20 = vpop.f32.mrf.mxu1  ;;  %v736_v21 = vpop.f32.mrf.mxu0 }
 0x160   : > { %v788_v24 = vadd.f32 %v736_v21, %v474_v25 }
 0x161   : > { %v738_v26 = vpop.f32.mrf.mxu0  ;;  %v775_v27 = vpop.f32.mrf.mxu1 }
 0x162   : > { %v789_v29 = vadd.f32 %v775_v27, %v513_v22 }
 0x163   : > { %v739_v31 = vpop.f32.mrf.mxu0  ;;  %v3048_v32 = vpop.f32.mrf.mxu1 }
 0x165   : > { %v778_v36 = vpop.f32.mrf.mxu1  ;;  %v883_v37 = vpop.f32.mrf.mxu0 }
 0x166   : > { %v1053_v39 = vadd.f32 %v883_v37, %v781_v34 }
 0x167   : > { %v3049_v41 = vpop.f32.mrf.mxu1  ;;  %v885_v42 = vpop.f32.mrf.mxu0 }
 0x168   : > { %v1054_v44 = vadd.f32 %v885_v42, %v782_v38 }
 0x169   : > { %v887_v45 = vpop.f32.mrf.mxu0  ;;  %v924_v11 = vpop.f32.mrf.mxu1 }
 0x16a   : > { %v1055_v49 = vadd.f32 %v924_v11, %v783_v43 }
 0x16b   : > { %v888_v50 = vpop.f32.mrf.mxu0  ;;  %v926_v15 = vpop.f32.mrf.mxu1 }
 0x16c   : > { %v1056_v53 = vadd.f32 %v926_v15, %v784_v48 }
 0x16d   : > { %v928_v17 = vpop.f32.mrf.mxu1  ;;  %v965_v54 = vpop.f32.mrf.mxu0 }
 0x16e   : > { %v1057_v56 = vadd.f32 %v965_v54, %v785_v52 }
 0x16f   : > { %v929_v57 = vpop.f32.mrf.mxu1  ;;  %v967_v23 = vpop.f32.mrf.mxu0 }
 0x170   : > { %v1058_v58 = vadd.f32 %v967_v23, %v786_v55 }
 0x171   : > { %v969_v59 = vpop.f32.mrf.mxu0  ;;  %v1006_v60 = vpop.f32.mrf.mxu1 }
 0x172   : > { %v1059_v61 = vadd.f32 %v1006_v60, %v787_v19 }
 0x173   : > { %v970_v62 = vpop.f32.mrf.mxu0  ;;  %v1008_v30 = vpop.f32.mrf.mxu1 }
 0x174   : > { %v1060_v63 = vadd.f32 %v1008_v30, %v788_v24 }
 0x175   : > { %v1010_v0 = vpop.f32.mrf.mxu1  ;;  %v1047_v1 = vpop.f32.mrf.mxu0 }
 0x176   : > { %v1061_v2 = vadd.f32 %v1047_v1, %v789_v29 }
 0x177   : > { %v1011_v4 = vpop.f32.mrf.mxu1  ;;  %v3054_v33 = vpop.f32.mrf.mxu0 }
 0x179   : > { %v1050_v5 = vpop.f32.mrf.mxu0  ;;  %v1155_v7 = vpop.f32.mrf.mxu1 }
 0x17a   : > { %v1325_v8 = vadd.f32 %v1155_v7, %v1053_v39 }
 0x17b   : > { %v3055_v9 = vpop.f32.mrf.mxu0  ;;  %v1157_v3 = vpop.f32.mrf.mxu1 }
 0x17c   : > { %v1326_v10 = vadd.f32 %v1157_v3, %v1054_v44 }
 0x17d   : > { %v1159_v12 = vpop.f32.mrf.mxu1  ;;  %v1196_v13 = vpop.f32.mrf.mxu0 }
 0x17e   : > { %v1327_v14 = vadd.f32 %v1196_v13, %v1055_v49 }
 0x17f   : > { %v1160_v16 = vpop.f32.mrf.mxu1  ;;  %v1198_v18 = vpop.f32.mrf.mxu0 }
 0x180   : > { %v1328_v25 = vadd.f32 %v1198_v18, %v1056_v53 }
 0x181   : > { %v1200_v19 = vpop.f32.mrf.mxu0  ;;  %v1237_v20 = vpop.f32.mrf.mxu1 }
 0x182   : > { %v1329_v21 = vadd.f32 %v1237_v20, %v1057_v56 }
 0x183   : > { %v1201_v22 = vpop.f32.mrf.mxu0  ;;  %v1239_v24 = vpop.f32.mrf.mxu1 }
 0x184   : > { %v1330_v26 = vadd.f32 %v1239_v24, %v1058_v58 }
 0x185   : > { %v1241_v27 = vpop.f32.mrf.mxu1  ;;  %v1278_v28 = vpop.f32.mrf.mxu0 }
 0x186   : > { %v1331_v29 = vadd.f32 %v1278_v28, %v1059_v61 }
 0x187   : > { %v1242_v31 = vpop.f32.mrf.mxu1  ;;  %v1280_v32 = vpop.f32.mrf.mxu0 }
 0x188   : > { %v1332_v34 = vadd.f32 %v1280_v32, %v1060_v63 }
 0x189   : > { %v1282_v35 = vpop.f32.mrf.mxu0  ;;  %v1319_v36 = vpop.f32.mrf.mxu1 }
 0x18a   : > { %v1333_v37 = vadd.f32 %v1319_v36, %v1061_v2 }
 0x18b   : > { %v1283_v38 = vpop.f32.mrf.mxu0  ;;  %v3060_v40 = vpop.f32.mrf.mxu1 }
 0x18d   : > { %v1322_v39 = vpop.f32.mrf.mxu1  ;;  %v1427_v41 = vpop.f32.mrf.mxu0 }
 0x18e   : > { %v3683_v42 = vadd.f32 %v1427_v41, %v1325_v8 }
 0x18f   : > { %v3061_v47 = vpop.f32.mrf.mxu1  ;;  %v1429_v43 = vpop.f32.mrf.mxu0 }
 0x190   : > { %v3685_v44 = vadd.f32 %v1429_v43, %v1326_v10 }
 0x191   : > { %v1431_v45 = vpop.f32.mrf.mxu0  ;;  %v1468_v11 = vpop.f32.mrf.mxu1 }
 0x192   : > { %v3687_v46 = vadd.f32 %v1468_v11, %v1327_v14 }
 0x193   : > { %v1432_v48 = vpop.f32.mrf.mxu0  ;;  %v1470_v49 = vpop.f32.mrf.mxu1 }
 0x194   : > { %v3689_v50 = vadd.f32 %v1470_v49, %v1328_v25 }
 0x195   : > { %v1472_v15 = vpop.f32.mrf.mxu1  ;;  %v1509_v51 = vpop.f32.mrf.mxu0 }
 0x196   : > { %v3691_v52 = vadd.f32 %v1509_v51, %v1329_v21 }
 0x197   : > { %v1473_v53 = vpop.f32.mrf.mxu1  ;;  %v1511_v17 = vpop.f32.mrf.mxu0 }
 0x198   : > { %v3693_v54 = vadd.f32 %v1511_v17, %v1330_v26 }
 0x199   : > { %v1513_v55 = vpop.f32.mrf.mxu0  ;;  %v1550_v56 = vpop.f32.mrf.mxu1 }
 0x19a   : > { %v3695_v57 = vadd.f32 %v1550_v56, %v1331_v29 }
 0x19b   : > { %v1514_v23 = vpop.f32.mrf.mxu0  ;;  %v1552_v58 = vpop.f32.mrf.mxu1 }
 0x19c   : > { %v3697_v59 = vadd.f32 %v1552_v58, %v1332_v34 }
 0x19d   : > { %v1554_v60 = vpop.f32.mrf.mxu1  ;;  %v1591_v61 = vpop.f32.mrf.mxu0 }
 0x19e   : > { %v3699_v62 = vadd.f32 %v1591_v61, %v1333_v37 }
 0x19f   : > { %v1555_v30 = vpop.f32.mrf.mxu1  ;;  %v3066_v63 = vpop.f32.mrf.mxu0 }
 0x1a1   : > { %v1594_v0 = vpop.f32.mrf.mxu0  ;;  %v1699_v1 = vpop.f32.mrf.mxu1 }
 0x1a3   : > { %v3067_v2 = vpop.f32.mrf.mxu0  ;;  %v1701_v4 = vpop.f32.mrf.mxu1 }
 0x1a5   : > { %v1703_v33 = vpop.f32.mrf.mxu1  ;;  %v1740_v5 = vpop.f32.mrf.mxu0 }
 0x1a6   : > { %v1869_v33 = vadd.f32 %v1699_v1, %v3683_v42 }
 0x1a7   : > { %v1704_v7 = vpop.f32.mrf.mxu1  ;;  %v3701_v8 = vpop.f32.mrf.mxu0 }
 0x1a8   : > { %v1872_v42 = vadd.f32 %v3701_v8, %v3689_v50 }
 0x1a9   : > { %v1744_v9 = vpop.f32.mrf.mxu0  ;;  %v3703_v3 = vpop.f32.mrf.mxu1 }
 0x1ab   : > { %v1745_v10 = vpop.f32.mrf.mxu0  ;;  %v3705_v12 = vpop.f32.mrf.mxu1 }
 0x1ac   : > { %v1870_v10 = vadd.f32 %v1701_v4, %v3685_v44  ;;  %v1873_v44 = vadd.f32 %v3703_v3, %v3691_v52  ;;  %v1874_v50 = vadd.f32 %v3705_v12, %v3693_v54 }
 0x1ad   : > { %v1785_v13 = vpop.f32.mrf.mxu1  ;;  %v3707_v14 = vpop.f32.mrf.mxu0 }
 0x1af   : > { %v1786_v16 = vpop.f32.mrf.mxu1  ;;  %v3709_v18 = vpop.f32.mrf.mxu0 }
 0x1b1   : > { %v1826_v25 = vpop.f32.mrf.mxu0  ;;  %v3711_v19 = vpop.f32.mrf.mxu1 }
 0x1b3   : > { %v1827_v20 = vpop.f32.mrf.mxu0  ;;  %v3072_v21 = vpop.f32.mrf.mxu1 }
 0x1b4   : > { %v1871_v20 = vadd.f32 %v1740_v5, %v3687_v46 }
 0x1b5   : > { %v1866_v22 = vpop.f32.mrf.mxu1  ;;  %v1975_v24 = vpop.f32.mrf.mxu0 }
 0x1b6   : > { %v2145_v13 = vadd.f32 %v1975_v24, %v1869_v33 }
 0x1b7   : > { %v3073_v26 = vpop.f32.mrf.mxu1  ;;  %v1977_v27 = vpop.f32.mrf.mxu0 }
 0x1b8   : > { %v2146_v21 = vadd.f32 %v1977_v27, %v1870_v10 }
 0x1b9   : > { %v1979_v28 = vpop.f32.mrf.mxu0  ;;  %v2016_v29 = vpop.f32.mrf.mxu1 }
 0x1ba   : > { %v2147_v1 = vadd.f32 %v2016_v29, %v1871_v20 }
 0x1bb   : > { %v1980_v31 = vpop.f32.mrf.mxu0  ;;  %v2018_v32 = vpop.f32.mrf.mxu1 }
 0x1bc   : > { %v2148_v5 = vadd.f32 %v2018_v32, %v1872_v42  ;;  %v1875_v32 = vadd.f32 %v3707_v14, %v3695_v57  ;;  %v1876_v57 = vadd.f32 %v3709_v18, %v3697_v59 }
 0x1bd   : > { %v2020_v34 = vpop.f32.mrf.mxu1  ;;  %v2057_v35 = vpop.f32.mrf.mxu0 }
 0x1be   : > { %v2149_v8 = vadd.f32 %v2057_v35, %v1873_v44 }
 0x1bf   : > { %v2021_v36 = vpop.f32.mrf.mxu1  ;;  %v3713_v37 = vpop.f32.mrf.mxu0 }
 0x1c0   : > { %v2150_v54 = vadd.f32 %v3713_v37, %v1874_v50  ;;  %v2793_v50 = vld [vmem:[%s3780_s27 + $0x8] sm:$0xff] }
 0x1c1   : > { %v2061_v38 = vpop.f32.mrf.mxu0  ;;  %v3715_v40 = vpop.f32.mrf.mxu1 }
 0x1c2   : > { %v2151_v14 = vadd.f32 %v3715_v40, %v1875_v32 }
 0x1c3   : > { %v2062_v39 = vpop.f32.mrf.mxu0  ;;  %v3717_v41 = vpop.f32.mrf.mxu1 }
 0x1c5   : > { %v2102_v47 = vpop.f32.mrf.mxu1  ;;  %v3719_v43 = vpop.f32.mrf.mxu0 }
 0x1c7   : > { %v2103_v45 = vpop.f32.mrf.mxu1  ;;  %v3078_v11 = vpop.f32.mrf.mxu0 }
 0x1c9   : > { %v2142_v48 = vpop.f32.mrf.mxu0  ;;  %v2250_v49 = vpop.f32.mrf.mxu1 }
 0x1ca   : > { %v2420_v22 = vadd.f32 %v2250_v49, %v2145_v13 }
 0x1cb   : > { %v3079_v15 = vpop.f32.mrf.mxu0  ;;  %v2252_v51 = vpop.f32.mrf.mxu1 }
 0x1cc   : > { %v2421_v31 = vadd.f32 %v2252_v51, %v2146_v21 }
 0x1cd   : > { %v2254_v53 = vpop.f32.mrf.mxu1  ;;  %v2291_v17 = vpop.f32.mrf.mxu0 }
 0x1ce   : > { %v2422_v27 = vadd.f32 %v2291_v17, %v2147_v1 }
 0x1cf   : > { %v2255_v55 = vpop.f32.mrf.mxu1  ;;  %v2293_v56 = vpop.f32.mrf.mxu0 }
 0x1d0   : > { %v2423_v29 = vadd.f32 %v2293_v56, %v2148_v5 }
 0x1d1   : > { %v2295_v23 = vpop.f32.mrf.mxu0  ;;  %v2332_v58 = vpop.f32.mrf.mxu1 }
 0x1d2   : > { %v2424_v12 = vadd.f32 %v2332_v58, %v2149_v8  ;;  %v1877_v23 = vadd.f32 %v3711_v19, %v3699_v62  ;;  %v2152_v58 = vadd.f32 %v3717_v41, %v1876_v57  ;;  %v2798_v8 = vld [vmem:[%s3780_s27 + $0x10] sm:$0x3] }
 0x1d3   : > { %v2296_v60 = vpop.f32.mrf.mxu0  ;;  %v2334_v61 = vpop.f32.mrf.mxu1 }
 0x1d4   : > { %v2425_v17 = vadd.f32 %v2334_v61, %v2150_v54  ;;  %v2153_v19 = vadd.f32 %v3719_v43, %v1877_v23  ;;  %v2790_v43 = vld [vmem:[%s3780_s27] sm:$0xff] }
 0x1d5   : > { %v2336_v30 = vpop.f32.mrf.mxu1  ;;  %v3721_v63 = vpop.f32.mrf.mxu0 }
 0x1d6   : > { %v2426_v18 = vadd.f32 %v3721_v63, %v2151_v14 }
 0x1d7   : > { %v2337_v0 = vpop.f32.mrf.mxu1  ;;  %v3723_v2 = vpop.f32.mrf.mxu0 }
 0x1d8   : > { %v2427_v41 = vadd.f32 %v3723_v2, %v2152_v58 }
 0x1d9   : > { %v2377_v7 = vpop.f32.mrf.mxu0  ;;  %v3726_v9 = vpop.f32.mrf.mxu1 }
 0x1da   : > { %v2428_v2 = vadd.f32 %v3726_v9, %v2153_v19 }
 0x1db   : > { %v2378_v16 = vpop.f32.mrf.mxu0  ;;  %v3084_v25 = vpop.f32.mrf.mxu1 }
 0x1dd   : > { %v2417_v26 = vpop.f32.mrf.mxu1  ;;  %v2525_v28 = vpop.f32.mrf.mxu0 }
 0x1de   : > { %v2695_v34 = vadd.f32 %v2525_v28, %v2420_v22 }
 0x1df   : > { %v3085_v4 = vpop.f32.mrf.mxu1  ;;  %v2527_v24 = vpop.f32.mrf.mxu0 }
 0x1e0   : > { %v2696_v36 = vadd.f32 %v2527_v24, %v2421_v31  ;;  %v2704_v39 = vmax.f32 %v2695_v34, 0.0 }
 0x1e1   : > { %v2529_v52 = vpop.f32.mrf.mxu0  ;;  %v2566_v3 = vpop.f32.mrf.mxu1 }
 0x1e2   : > { %v2705_v47 = vmax.f32 %v2696_v36, 0.0  ;;  %v2697_v45 = vadd.f32 %v2566_v3, %v2422_v27 }
 0x1e3   : > { %v2530_v11 = vpop.f32.mrf.mxu0  ;;  %v2568_v48 = vpop.f32.mrf.mxu1 }
 0x1e4   : > { %v3014_v35 = vpack.c.bf16 %v2705_v47, %v2704_v39  ;;  %v2698_v49 = vadd.f32 %v2568_v48, %v2423_v29  ;;  %v2706_v37 = vmax.f32 %v2697_v45, 0.0 }
 0x1e5   : > { %v2570_v51 = vpop.f32.mrf.mxu1  ;;  %v2607_v53 = vpop.f32.mrf.mxu0 }
 0x1e6   : > { %v2707_v55 = vmax.f32 %v2698_v49, 0.0  ;;  %v2699_v56 = vadd.f32 %v2607_v53, %v2424_v12  ;;  %v2739_v0 = vrot.slane %v3014_v35, %v3215_v6 }
 0x1e7   : > { %v2571_v60 = vpop.f32.mrf.mxu1  ;;  %v2609_v30 = vpop.f32.mrf.mxu0 }
 0x1e8   : > { %v3015_v40 = vpack.c.bf16 %v2707_v55, %v2706_v37  ;;  %v2700_v61 = vadd.f32 %v2609_v30, %v2425_v17  ;;  %v2708_v10 = vmax.f32 %v2699_v56, 0.0 }
 0x1e9   : > { %v2611_v63 = vpop.f32.mrf.mxu0  ;;  %v2648_v33 = vpop.f32.mrf.mxu1 }
 0x1ea   : > { %v2746_v7 = vrot.slane %v3015_v40, %v3215_v6  ;;  %v2709_v13 = vmax.f32 %v2700_v61, 0.0  ;;  %v2701_v16 = vadd.f32 %v2648_v33, %v2426_v18 }
 0x1eb   : > { %v2612_v25 = vpop.f32.mrf.mxu0  ;;  %v2650_v20 = vpop.f32.mrf.mxu1 }
 0x1ec   : > { %v2747_v21 = vcombine.low %v2739_v0, %v2746_v7  ;;  %v3016_v22 = vpack.c.bf16 %v2709_v13, %v2708_v10  ;;  %v2702_v26 = vadd.f32 %v2650_v20, %v2427_v41  ;;  %v2710_v1 = vmax.f32 %v2701_v16, 0.0 }
 0x1ed   : > { %v2652_v28 = vpop.f32.mrf.mxu1  ;;  %v2689_v42 = vpop.f32.mrf.mxu0 }
 0x1ee   : > { %v2711_v31 = vmax.f32 %v2702_v26, 0.0  ;;  %v2703_v34 = vadd.f32 %v2689_v42, %v2428_v2  ;;  %v2791_v44 = vsel %vm2789_vm8, %v2747_v21, %v2790_v43  ;;  %v2756_v27 = vrot.slane %v3016_v22, %v3215_v6 }
 0x1ef   : > { %2792 = vst [vmem:[%s3780_s27] sm:$0xff] %v2791_v44  ;;  %v2653_v4 = vpop.f32.mrf.mxu1  ;;  %v3090_v24 = vpop.f32.mrf.mxu0 }
 0x1f0   : > { %v3017_v9 = vpack.c.bf16 %v2711_v31, %v2710_v1  ;;  %v2712_v46 = vmax.f32 %v2703_v34, 0.0 }
 0x1f1   : > { %v2692_v5 = vpop.f32.mrf.mxu0 }
 0x1f2   : > { %v2763_v36 = vrot.slane %v3017_v9, %v3215_v6  ;;  %v2721_v38 = vpack.c.bf16 %v2712_v46, %v2712_v46 }
 0x1f3   : > { %v3091_v52 = vpop.f32.mrf.mxu0 }
 0x1f4   : > { %v2764_v3 = vcombine.low %v2756_v27, %v2763_v36  ;;  %v2771_v29 = vrot.slane %v2721_v38, %v3215_v6 }
 0x1f6   : > { %v2794_v39 = vsel %vm2789_vm8, %v2764_v3, %v2793_v50  ;;  %v2799_v47 = vsel %vm2797_vm10, %v2771_v29, %v2798_v8 }
 0x1f7   : > { %2795 = vst [vmem:[%s3780_s27 + $0x8] sm:$0xff] %v2794_v39  ;;  %2800 = vst [vmem:[%s3780_s27 + $0x10] sm:$0x3] %v2799_v47 }
 0x1f8 PF: > { %s13_s14 = sadd.s32 1, %s3156_s14   ;;  %s3839_s12 = smov %s3152_s13 }
 0x1f9   : > { %p10_p5 = scmp.ge.s32.totalorder %s13_s14, 4   ;;  %s3840_s13 = smov %s3842_s15 }
 0x1fb   :  { %12 = sbr.rel (!%p10_p5) target bundleno = 2 (0x2), region = 76 }

// kernel: segnet_decoder_forward.7
= control target key start
LH: loop header
LB: loop body
LE: loop exit
PB: predicated region body
PF: predicated region fallthrough
CT: control target
= control target key end

     0   :  { %v39_v0 = vlaneseq  ;;  %v1883_v1 = vmov 0   ;;  %v1884_v26 = vmov 1.0|1.0   ;;  %s1885_s6 = smov 64   ;;  %s3168_s2 = inlined_call_operand.vmem [shape: s32[192,1], index: 2, kind: input, shape index: {}]   ;;  %s3169_s1 = inlined_call_operand.vmem [shape: s32[192,32], index: 1, kind: input, shape index: {}]   ;;  %s3170_s0 = inlined_call_operand.vmem [shape: bf16[192,34], index: 0, kind: input, shape index: {}]   ;;  %s3171_s3 = inlined_call_operand.vmem [shape: f32[192,128], index: 3, kind: output, shape index: {}]  }
   0x1   :  { %1882 = vset.pattern.permute.xlu1 %v1883_v1  ;;  %1881 = vset.pattern.permute.xlu0 %v1883_v1  ;;  %v67_v2 = vld [vmem:[%s3168_s2 + $0x10] sm:$0xff]  ;;  %v65_v3 = vld [vmem:[%s3168_s2] sm:$0xff]  ;;  %v68_v5 = vld [vmem:[%s3168_s2 + $0x18] sm:$0xff] }
   0x2   :  { %97 = vperm.xlu1 %1882, %v67_v2   ;;  %91 = vperm.xlu0 %1881, %v65_v3   ;;  %v499_v4 = vshrl.u32 %v39_v0, 7  ;;  %v66_v6 = vld [vmem:[%s3168_s2 + $0x8] sm:$0xff]  ;;  %v69_v13 = vld [vmem:[%s3168_s2 + $0x20] sm:$0xff]  ;;  %v1924_v14 = vand.u32 127, %v39_v0  ;;  %v72_v23 = vld [vmem:[%s3168_s2 + $0x38] sm:$0xff] }
   0x3   :  { %v70_v12 = vld [vmem:[%s3168_s2 + $0x28] sm:$0xff]  ;;  %v71_v24 = vld [vmem:[%s3168_s2 + $0x30] sm:$0xff]  ;;  %v73_v31 = vld [vmem:[%s3168_s2 + $0x40] sm:$0xff] }
   0x4   :  { %v501_v7 = vadd.s32 16, %v499_v4  ;;  %v502_v8 = vadd.s32 24, %v499_v4  ;;  %v500_v9 = vadd.s32 8, %v499_v4  ;;  %v503_v15 = vmul.u32 2, %v499_v4  ;;  %v74_v30 = vld [vmem:[%s3168_s2 + $0x48] sm:$0xff]  ;;  %v76_v32 = vld [vmem:[%s3168_s2 + $0x58] sm:$0xff] }
   0x5   :  { %v75_v33 = vld [vmem:[%s3168_s2 + $0x50] sm:$0xff]  ;;  %v78_v34 = vld [vmem:[%s3168_s2 + $0x68] sm:$0xff]  ;;  %v77_v35 = vld [vmem:[%s3168_s2 + $0x60] sm:$0xff]  ;;  %v2047_v46 = vmul.u32 2, %v1924_v14 }
   0x6   :  { %100 = vperm.xlu1 %1882, %v68_v5   ;;  %94 = vperm.xlu0 %1881, %v66_v6   ;;  %v505_v10 = vmul.u32 2, %v501_v7  ;;  %v506_v11 = vmul.u32 2, %v502_v8  ;;  %v521_v21 = vadd.s32 1, %v503_v15  ;;  %vm507_vm7 = vcmp.eq.s32.totalorder %v1924_v14, %v503_v15  ;;  %v80_v36 = vld [vmem:[%s3168_s2 + $0x78] sm:$0xff]  ;;  %v79_v37 = vld [vmem:[%s3168_s2 + $0x70] sm:$0xff]  ;;  %v82_v38 = vld [vmem:[%s3168_s2 + $0x88] sm:$0xff] }
   0x7   :  { %v504_v16 = vmul.u32 2, %v500_v9  ;;  %v81_v39 = vld [vmem:[%s3168_s2 + $0x80] sm:$0xff]  ;;  %v84_v40 = vld [vmem:[%s3168_s2 + $0x98] sm:$0xff]  ;;  %v83_v41 = vld [vmem:[%s3168_s2 + $0x90] sm:$0xff] }
   0x8   :  { %v523_v17 = vadd.s32 1, %v505_v10  ;;  %v524_v18 = vadd.s32 1, %v506_v11  ;;  %vm1927_vm0 = vcmp.eq.s32.totalorder %v1924_v14, %v505_v10  ;;  %vm1932_vm1 = vcmp.eq.s32.totalorder %v1924_v14, %v506_v11  ;;  %v86_v42 = vld [vmem:[%s3168_s2 + $0xa8] sm:$0xff]  ;;  %v85_v43 = vld [vmem:[%s3168_s2 + $0xa0] sm:$0xff]  ;;  %v88_v44 = vld [vmem:[%s3168_s2 + $0xb8] sm:$0xff] }
   0x9   :  { %v522_v22 = vadd.s32 1, %v504_v16  ;;  %vm525_vm5 = vcmp.eq.s32.totalorder %v1924_v14, %v521_v21  ;;  %vm508_vm8 = vcmp.eq.s32.totalorder %v1924_v14, %v504_v16  ;;  %vm1959_vm9 = vmpackc.low %vm1932_vm1, %vm1927_vm0  ;;  %v87_v45 = vld [vmem:[%s3168_s2 + $0xb0] sm:$0xff]  ;;  %v41_v49 = vld [vmem:[%s3169_s1] sm:$0xff] }
   0xa   :  { %106 = vperm.xlu1 %1882, %v70_v12   ;;  %103 = vperm.xlu0 %1881, %v69_v13   ;;  %vm527_vm2 = vcmp.eq.s32.totalorder %v1924_v14, %v523_v17  ;;  %vm528_vm3 = vcmp.eq.s32.totalorder %v1924_v14, %v524_v18  ;;  %vm1973_vm11 = vmpackc.low %vm508_vm8, %vm507_vm7  ;;  %v43_v53 = vld [vmem:[%s3169_s1 + $0x10] sm:$0xff]  ;;  %v42_v56 = vld [vmem:[%s3169_s1 + $0x8] sm:$0xff] }
   0xb   :  { %vm1944_vm4 = vmpackc.low %vm528_vm3, %vm527_vm2  ;;  %vm526_vm6 = vcmp.eq.s32.totalorder %v1924_v14, %v522_v22  ;;  %1794 = vmatprep.subr.msk.bf16.mxu1 %vm1959_vm9, %v1884_v26  ;;  %v44_v57 = vld [vmem:[%s3169_s1 + $0x18] sm:$0xff]  ;;  %v45_v1 = vld [vmem:[%s3169_s1 + $0x20] sm:$0xff] }
   0xc   :  { %1766 = vmatprep.subr.msk.bf16.mxu0 %vm1944_vm4, %v1884_v26  ;;  %vm1969_vm10 = vmpackc.low %vm526_vm6, %vm525_vm5  ;;  %1795 = vmatpush3.bf16.msk.msra.mxu1 %vm1959_vm9, %v1884_v26  ;;  %v46_v2 = vld [vmem:[%s3169_s1 + $0x28] sm:$0xff]  ;;  %v2086_v5 = vld [vmem:[%s3170_s0] sm:$0xf]  ;;  %vm599_vm5 = vcmask 261120  }
   0xd   :  { %1767 = vmatpush3.bf16.msk.msra.mxu0 %vm1944_vm4, %v1884_v26  ;;  %1796 = vmatprep.subr.msk.bf16.mxu1 %vm1973_vm11, %v1884_v26  ;;  %v2091_v6 = vld [vmem:[%s3170_s0 + $0x4] sm:$0xf]  ;;  %v2109_v10 = vld [vmem:[%s3170_s0 + $0x8] sm:$0xf]  ;;  %v47_v14 = vld [vmem:[%s3169_s1 + $0x30] sm:$0xff] }
   0xe   :  { %112 = vperm.xlu1 %1882, %v72_v23   ;;  %109 = vperm.xlu0 %1881, %v71_v24   ;;  %v2121_v15 = vld [vmem:[%s3170_s0 + $0xc] sm:$0xf]  ;;  %v48_v16 = vld [vmem:[%s3169_s1 + $0x38] sm:$0xff]  ;;  %v57_v7 = vld [vmem:[%s3169_s1 + $0x80] sm:$0xff] }
   0xf   :  { %1768 = vmatprep.subr.msk.bf16.mxu0 %vm1969_vm10, %v1884_v26 }
  0x10   :  { %1797 = vmatpush3.bf16.msk.msra.mxu1 %vm1973_vm11, %v1884_v26 }
  0x11   :  { %1769 = vmatpush3.bf16.msk.msra.mxu0 %vm1969_vm10, %v1884_v26  ;;  %1850 = vmatprep.subr.msk.bf16.mxu1 %vm1959_vm9, %v1884_v26 }
  0x12   :  { %118 = vperm.xlu1 %1882, %v74_v30   ;;  %115 = vperm.xlu0 %1881, %v73_v31  }
  0x13   :  { %1822 = vmatprep.subr.msk.bf16.mxu0 %vm1944_vm4, %v1884_v26 }
  0x16   :  { %124 = vperm.xlu1 %1882, %v76_v32   ;;  %121 = vperm.xlu0 %1881, %v75_v33  }
  0x1a   :  { %130 = vperm.xlu1 %1882, %v78_v34   ;;  %127 = vperm.xlu0 %1881, %v77_v35  }
  0x1e   :  { %136 = vperm.xlu1 %1882, %v80_v36   ;;  %133 = vperm.xlu0 %1881, %v79_v37  }
  0x22   :  { %142 = vperm.xlu1 %1882, %v82_v38   ;;  %139 = vperm.xlu0 %1881, %v81_v39   ;;  %v49_v38 = vld [vmem:[%s3169_s1 + $0x40] sm:$0xff]  ;;  %v2173_v39 = vld [vmem:[%s3170_s0 + $0x10] sm:$0xf] }
  0x26   :  { %148 = vperm.xlu1 %1882, %v84_v40   ;;  %145 = vperm.xlu0 %1881, %v83_v41   ;;  %v50_v41 = vld [vmem:[%s3169_s1 + $0x48] sm:$0xff] }
  0x2a   :  { %154 = vperm.xlu1 %1882, %v86_v42   ;;  %151 = vperm.xlu0 %1881, %v85_v43  }
  0x2e   :  { %160 = vperm.xlu1 %1882, %v88_v44   ;;  %157 = vperm.xlu0 %1881, %v87_v45   ;;  %v2188_v44 = vld [vmem:[%s3170_s0 + $0x14] sm:$0xf] }
  0x7d   :  { %v98_v47 = vpop.permute.xlu1 %97  ;;  %v92_v48 = vpop.permute.xlu0 %91 }
  0x7e   :  { %v162_v50 = vadd.s32 %v92_v48, %v2047_v46  ;;  %v164_v51 = vadd.s32 %v98_v47, %v2047_v46  ;;  %v56_v48 = vld [vmem:[%s3169_s1 + $0x78] sm:$0xff] }
  0x80   :  { %v2054_v52 = vsub.s32 %v41_v49, %v162_v50  ;;  %v2067_v60 = vsub.s32 %v43_v53, %v164_v51 }
  0x81   :  { %v101_v54 = vpop.permute.xlu1 %100  ;;  %v95_v55 = vpop.permute.xlu0 %94 }
  0x82   :  { %v165_v58 = vadd.s32 %v101_v54, %v2047_v46  ;;  %v163_v59 = vadd.s32 %v95_v55, %v2047_v46  ;;  %vm282_vm12 = vcmp.eq.s32.totalorder %v2054_v52, 1  ;;  %vm210_vm13 = vcmp.eq.s32.totalorder %v2054_v52, 0 }
  0x83   :  { %vm2094_vm15 = vmpackc.low %vm282_vm12, %vm282_vm12  ;;  %vm284_vm2 = vcmp.eq.s32.totalorder %v2067_v60, 1  ;;  %vm212_vm7 = vcmp.eq.s32.totalorder %v2067_v60, 0 }
  0x84   :  { %v2069_v61 = vsub.s32 %v42_v56, %v163_v59  ;;  %v2072_v62 = vsub.s32 %v44_v57, %v165_v58  ;;  %vm2101_vm1 = vmpackc.low %vm210_vm13, %vm210_vm13  ;;  %v330_v19 = vsel %vm2094_vm15, %v2086_v5, 0  ;;  %v51_v58 = vld [vmem:[%s3169_s1 + $0x50] sm:$0xff]  ;;  %v2229_v59 = vld [vmem:[%s3170_s0 + $0x18] sm:$0xf] }
  0x85   :  { %v107_v63 = vpop.permute.xlu1 %106  ;;  %v104_v0 = vpop.permute.xlu0 %103  ;;  %v258_v22 = vsel %vm2101_vm1, %v2086_v5, 0  ;;  %vm2142_vm12 = vmpackc.low %vm284_vm2, %vm284_vm2 }
  0x86   :  { %v167_v3 = vadd.s32 %v107_v63, %v2047_v46  ;;  %v166_v4 = vadd.s32 %v104_v0, %v2047_v46  ;;  %vm283_vm14 = vcmp.eq.s32.totalorder %v2069_v61, 1  ;;  %vm211_vm0 = vcmp.eq.s32.totalorder %v2069_v61, 0  ;;  %v52_v0 = vld [vmem:[%s3169_s1 + $0x58] sm:$0xff] }
  0x87   :  { %vm307_vm3 = vmpackc.low %vm283_vm14, %vm283_vm14  ;;  %vm285_vm6 = vcmp.eq.s32.totalorder %v2072_v62, 1  ;;  %vm213_vm13 = vcmp.eq.s32.totalorder %v2072_v62, 0  ;;  %v332_v33 = vsel %vm2142_vm12, %v2109_v10, 0 }
  0x88   :  { %v2099_v8 = vsub.s32 %v45_v1, %v166_v4  ;;  %v2111_v11 = vsub.s32 %v46_v2, %v167_v3  ;;  %v331_v20 = vsel %vm307_vm3, %v2091_v6, 0  ;;  %vm235_vm8 = vmpackc.low %vm211_vm0, %vm211_vm0  ;;  %v2248_v3 = vld [vmem:[%s3170_s0 + $0x1c] sm:$0xf] }
  0x89   :  { %v113_v12 = vpop.permute.xlu1 %112  ;;  %v110_v13 = vpop.permute.xlu0 %109  ;;  %v1598_v21 = vcombine.low %v330_v19, %v331_v20  ;;  %v259_v23 = vsel %vm235_vm8, %v2091_v6, 0  ;;  %vm309_vm14 = vmpackc.low %vm285_vm6, %vm285_vm6  ;;  %v53_v19 = vld [vmem:[%s3169_s1 + $0x60] sm:$0xff] }
  0x8a   :  { %v169_v17 = vadd.s32 %v113_v12, %v2047_v46  ;;  %v168_v18 = vadd.s32 %v110_v13, %v2047_v46  ;;  %v1626_v31 = vcombine.low %v258_v22, %v259_v23  ;;  %vm286_vm15 = vcmp.eq.s32.totalorder %v2099_v8, 1  ;;  %vm2163_vm0 = vmpackc.low %vm212_vm7, %vm212_vm7  ;;  %v2294_v20 = vld [vmem:[%s3170_s0 + $0x20] sm:$0xf]  ;;  %v54_v23 = vld [vmem:[%s3169_s1 + $0x68] sm:$0xff] }
  0x8b   :  { %1770 = vmatprep.mubr.msk.bf16.mxu0 %vm599_vm5, %v1598_v21  ;;  %v333_v34 = vsel %vm309_vm14, %v2121_v15, 0  ;;  %vm287_vm1 = vcmp.eq.s32.totalorder %v2111_v11, 1  ;;  %vm237_vm2 = vmpackc.low %vm213_vm13, %vm213_vm13  ;;  %vm214_vm3 = vcmp.eq.s32.totalorder %v2099_v8, 0  ;;  %v260_v45 = vsel %vm2163_vm0, %v2109_v10, 0 }
  0x8c   :  { %v2147_v30 = vsub.s32 %v47_v14, %v168_v18  ;;  %v2153_v32 = vsub.s32 %v48_v16, %v169_v17  ;;  %1798 = vmatprep.mubr.msk.bf16.mxu1 %vm599_vm5, %v1626_v31  ;;  %v1599_v40 = vcombine.low %v332_v33, %v333_v34  ;;  %v261_v47 = vsel %vm237_vm2, %v2121_v15, 0  ;;  %vm2198_vm6 = vmpackc.low %vm286_vm15, %vm286_vm15  ;;  %v2316_v31 = vld [vmem:[%s3170_s0 + $0x24] sm:$0xf]  ;;  %v58_v16 = vld [vmem:[%s3169_s1 + $0x88] sm:$0xff] }
  0x8d   :  { %v119_v36 = vpop.permute.xlu1 %118  ;;  %v116_v37 = vpop.permute.xlu0 %115  ;;  %vm215_vm7 = vcmp.eq.s32.totalorder %v2111_v11, 0  ;;  %v1627_v49 = vcombine.low %v260_v45, %v261_v47  ;;  %vm311_vm8 = vmpackc.low %vm287_vm1, %vm287_vm1  ;;  %v334_v51 = vsel %vm2198_vm6, %v2173_v39, 0 }
  0x8e   :  { %v171_v42 = vadd.s32 %v119_v36, %v2047_v46  ;;  %v170_v43 = vadd.s32 %v116_v37, %v2047_v46  ;;  %1771 = vmatmul.mubr.msk.bf16.vlgmr.msra.gmra.mxu0 %vm599_vm5, %v1599_v40  ;;  %vm288_vm12 = vcmp.eq.s32.totalorder %v2147_v30, 1  ;;  %v335_v54 = vsel %vm311_vm8, %v2188_v44, 0  ;;  %vm2219_vm13 = vmpackc.low %vm214_vm3, %vm214_vm3 }
  0x8f   :  { %1823 = vmatpush3.bf16.msk.msra.mxu0 %vm1944_vm4, %v1884_v26  ;;  %vm289_vm4 = vcmp.eq.s32.totalorder %v2153_v32, 1  ;;  %vm216_vm14 = vcmp.eq.s32.totalorder %v2147_v30, 0  ;;  %1799 = vmatmul.mubr.msk.bf16.vlgmr.msra.gmra.mxu1 %vm599_vm5, %v1627_v49  ;;  %v1600_v25 = vcombine.low %v334_v51, %v335_v54  ;;  %vm239_vm15 = vmpackc.low %vm215_vm7, %vm215_vm7  ;;  %v262_v63 = vsel %vm2219_vm13, %v2173_v39, 0  ;;  %v2375_v54 = vld [vmem:[%s3170_s0 + $0x2c] sm:$0xf] }
  0x90   :  { %v2204_v50 = vsub.s32 %v49_v38, %v170_v43  ;;  %v2216_v53 = vsub.s32 %v50_v41, %v171_v42  ;;  %1824 = vmatprep.subr.msk.bf16.mxu0 %vm1969_vm10, %v1884_v26  ;;  %1851 = vmatpush3.bf16.msk.msra.mxu1 %vm1959_vm9, %v1884_v26  ;;  %v263_v4 = vsel %vm239_vm15, %v2188_v44, 0  ;;  %vm2260_vm0 = vmpackc.low %vm288_vm12, %vm288_vm12  ;;  %vm217_vm1 = vcmp.eq.s32.totalorder %v2153_v32, 0  ;;  %v55_v42 = vld [vmem:[%s3169_s1 + $0x70] sm:$0xff]  ;;  %v2356_v43 = vld [vmem:[%s3170_s0 + $0x28] sm:$0xf] }
  0x91   :  { %v125_v56 = vpop.permute.xlu1 %124  ;;  %v122_v57 = vpop.permute.xlu0 %121  ;;  %1774 = vmatprep.mubr.msk.bf16.mxu0 %vm599_vm5, %v1600_v25  ;;  %v1628_v9 = vcombine.low %v262_v63, %v263_v4  ;;  %vm313_vm9 = vmpackc.low %vm289_vm4, %vm289_vm4  ;;  %v336_v27 = vsel %vm2260_vm0, %v2229_v59, 0  ;;  %1852 = vmatprep.subr.msk.bf16.mxu1 %vm1973_vm11, %v1884_v26 }
  0x92   :  { %v173_v1 = vadd.s32 %v125_v56, %v2047_v46  ;;  %v172_v2 = vadd.s32 %v122_v57, %v2047_v46  ;;  %vm290_vm2 = vcmp.eq.s32.totalorder %v2204_v50, 1  ;;  %v337_v14 = vsel %vm313_vm9, %v2248_v3, 0  ;;  %vm2284_vm3 = vmpackc.low %vm216_vm14, %vm216_vm14 }
  0x93   :  { %vm291_vm6 = vcmp.eq.s32.totalorder %v2216_v53, 1  ;;  %vm218_vm7 = vcmp.eq.s32.totalorder %v2204_v50, 0  ;;  %1825 = vmatpush3.bf16.msk.msra.mxu0 %vm1969_vm10, %v1884_v26  ;;  %1802 = vmatprep.mubr.msk.bf16.mxu1 %vm599_vm5, %v1628_v9  ;;  %v1601_v21 = vcombine.low %v336_v27, %v337_v14  ;;  %vm241_vm8 = vmpackc.low %vm217_vm1, %vm217_vm1  ;;  %v264_v22 = vsel %vm2284_vm3, %v2229_v59, 0  ;;  %v2412_v9 = vld [vmem:[%s3170_s0 + $0x30] sm:$0xf] }
  0x94   :  { %v2266_v12 = vsub.s32 %v51_v58, %v172_v2  ;;  %v2278_v13 = vsub.s32 %v52_v0, %v173_v1  ;;  %v265_v33 = vsel %vm241_vm8, %v2248_v3, 0  ;;  %vm2322_vm10 = vmpackc.low %vm290_vm2, %vm290_vm2  ;;  %vm219_vm12 = vcmp.eq.s32.totalorder %v2216_v53, 0  ;;  %1853 = vmatpush3.bf16.msk.msra.mxu1 %vm1973_vm11, %v1884_v26  ;;  %v59_v26 = vld [vmem:[%s3169_s1 + $0x90] sm:$0xff] }
  0x95   :  { %v131_v17 = vpop.permute.xlu1 %130  ;;  %v128_v18 = vpop.permute.xlu0 %127  ;;  %v1629_v35 = vcombine.low %v264_v22, %v265_v33  ;;  %vm315_vm13 = vmpackc.low %vm291_vm6, %vm291_vm6  ;;  %v338_v37 = vsel %vm2322_vm10, %v2294_v20, 0 }
  0x96   :  { %v175_v24 = vadd.s32 %v131_v17, %v2047_v46  ;;  %v174_v28 = vadd.s32 %v128_v18, %v2047_v46  ;;  %1775 = vmatmul.mubr.msk.bf16.gmra.mxu0 %vm599_vm5, %v1601_v21  ;;  %vm292_vm4 = vcmp.eq.s32.totalorder %v2266_v12, 1  ;;  %v339_v29 = vsel %vm315_vm13, %v2316_v31, 0  ;;  %vm2346_vm11 = vmpackc.low %vm218_vm7, %vm218_vm7 }
  0x97   :  { %vm293_vm14 = vcmp.eq.s32.totalorder %v2278_v13, 1  ;;  %vm220_vm15 = vcmp.eq.s32.totalorder %v2266_v12, 0  ;;  %1803 = vmatmul.mubr.msk.bf16.gmra.mxu1 %vm599_vm5, %v1629_v35  ;;  %v1602_v45 = vcombine.low %v338_v37, %v339_v29  ;;  %vm243_vm0 = vmpackc.low %vm219_vm12, %vm219_vm12  ;;  %v266_v47 = vsel %vm2346_vm11, %v2294_v20, 0 }
  0x98   :  { %v2331_v36 = vsub.s32 %v53_v19, %v174_v28  ;;  %v2340_v38 = vsub.s32 %v54_v23, %v175_v24  ;;  %v267_v55 = vsel %vm243_vm0, %v2316_v31, 0  ;;  %vm2381_vm1 = vmpackc.low %vm292_vm4, %vm292_vm4  ;;  %vm221_vm9 = vcmp.eq.s32.totalorder %v2278_v13, 0  ;;  %v2431_v19 = vld [vmem:[%s3170_s0 + $0x34] sm:$0xf] }
  0x99   :  { %v137_v40 = vpop.permute.xlu1 %136  ;;  %v134_v41 = vpop.permute.xlu0 %133  ;;  %1778 = vmatprep.mubr.msk.bf16.mxu0 %vm599_vm5, %v1602_v45  ;;  %v1630_v57 = vcombine.low %v266_v47, %v267_v55  ;;  %vm317_vm2 = vmpackc.low %vm293_vm14, %vm293_vm14  ;;  %v340_v25 = vsel %vm2381_vm1, %v2356_v43, 0  ;;  %v60_v45 = vld [vmem:[%s3169_s1 + $0x98] sm:$0xff] }
  0x9a   :  { %v177_v49 = vadd.s32 %v137_v40, %v2047_v46  ;;  %v176_v51 = vadd.s32 %v134_v41, %v2047_v46  ;;  %vm294_vm3 = vcmp.eq.s32.totalorder %v2331_v36, 1  ;;  %v341_v0 = vsel %vm317_vm2, %v2375_v54, 0  ;;  %vm2402_vm6 = vmpackc.low %vm220_vm15, %vm220_vm15  ;;  %v2468_v40 = vld [vmem:[%s3170_s0 + $0x38] sm:$0xf] }
  0x9b   :  { %vm295_vm7 = vcmp.eq.s32.totalorder %v2340_v38, 1  ;;  %vm222_vm8 = vcmp.eq.s32.totalorder %v2331_v36, 0  ;;  %1806 = vmatprep.mubr.msk.bf16.mxu1 %vm599_vm5, %v1630_v57  ;;  %v1603_v27 = vcombine.low %v340_v25, %v341_v0  ;;  %vm245_vm10 = vmpackc.low %vm221_vm9, %vm221_vm9  ;;  %v268_v14 = vsel %vm2402_vm6, %v2356_v43, 0 }
  0x9c   :  { %v2387_v58 = vsub.s32 %v55_v42, %v176_v51  ;;  %v2396_v63 = vsub.s32 %v56_v48, %v177_v49  ;;  %v269_v21 = vsel %vm245_vm10, %v2375_v54, 0  ;;  %vm2437_vm12 = vmpackc.low %vm294_vm3, %vm294_vm3  ;;  %vm223_vm13 = vcmp.eq.s32.totalorder %v2340_v38, 0  ;;  %v2487_v49 = vld [vmem:[%s3170_s0 + $0x3c] sm:$0xf] }
  0x9d   :  { %v143_v2 = vpop.permute.xlu1 %142  ;;  %v140_v4 = vpop.permute.xlu0 %139  ;;  %v1631_v23 = vcombine.low %v268_v14, %v269_v21  ;;  %vm319_vm4 = vmpackc.low %vm295_vm7, %vm295_vm7  ;;  %v342_v28 = vsel %vm2437_vm12, %v2412_v9, 0  ;;  %v2524_v14 = vld [vmem:[%s3170_s0 + $0x40] sm:$0xf] }
  0x9e   :  { %v179_v17 = vadd.s32 %v143_v2, %v2047_v46  ;;  %v178_v18 = vadd.s32 %v140_v4, %v2047_v46  ;;  %1779 = vmatmul.mubr.msk.bf16.gmra.mxu0 %vm599_vm5, %v1603_v27  ;;  %vm296_vm11 = vcmp.eq.s32.totalorder %v2387_v58, 1  ;;  %v343_v34 = vsel %vm319_vm4, %v2431_v19, 0  ;;  %vm2458_vm14 = vmpackc.low %vm222_vm8, %vm222_vm8  ;;  %v61_v27 = vld [vmem:[%s3169_s1 + $0xa0] sm:$0xff] }
  0x9f   :  { %vm297_vm15 = vcmp.eq.s32.totalorder %v2396_v63, 1  ;;  %vm224_vm0 = vcmp.eq.s32.totalorder %v2387_v58, 0  ;;  %1807 = vmatmul.mubr.msk.bf16.gmra.mxu1 %vm599_vm5, %v1631_v23  ;;  %v1604_v41 = vcombine.low %v342_v28, %v343_v34  ;;  %vm247_vm1 = vmpackc.low %vm223_vm13, %vm223_vm13  ;;  %v270_v42 = vsel %vm2458_vm14, %v2412_v9, 0  ;;  %v2543_v23 = vld [vmem:[%s3170_s0 + $0x44] sm:$0xf] }
  0xa0   :  { %v2443_v24 = vsub.s32 %v57_v7, %v178_v18  ;;  %v2452_v33 = vsub.s32 %v58_v16, %v179_v17  ;;  %v271_v51 = vsel %vm247_vm1, %v2431_v19, 0  ;;  %vm2493_vm9 = vmpackc.low %vm296_vm11, %vm296_vm11  ;;  %vm225_vm2 = vcmp.eq.s32.totalorder %v2396_v63, 0  ;;  %v62_v18 = vld [vmem:[%s3169_s1 + $0xa8] sm:$0xff] }
  0xa1   :  { %v149_v37 = vpop.permute.xlu1 %148  ;;  %v146_v29 = vpop.permute.xlu0 %145  ;;  %1782 = vmatprep.mubr.msk.bf16.mxu0 %vm599_vm5, %v1604_v41  ;;  %v1632_v56 = vcombine.low %v270_v42, %v271_v51  ;;  %vm321_vm3 = vmpackc.low %vm297_vm15, %vm297_vm15  ;;  %v344_v25 = vsel %vm2493_vm9, %v2468_v40, 0  ;;  %v2580_v51 = vld [vmem:[%s3170_s0 + $0x48] sm:$0xf] }
  0xa2   :  { %v181_v47 = vadd.s32 %v149_v37, %v2047_v46  ;;  %v180_v48 = vadd.s32 %v146_v29, %v2047_v46  ;;  %vm298_vm6 = vcmp.eq.s32.totalorder %v2443_v24, 1  ;;  %v345_v1 = vsel %vm321_vm3, %v2487_v49, 0  ;;  %vm2514_vm7 = vmpackc.low %vm224_vm0, %vm224_vm0 }
  0xa3   :  { %vm299_vm8 = vcmp.eq.s32.totalorder %v2452_v33, 1  ;;  %vm226_vm10 = vcmp.eq.s32.totalorder %v2443_v24, 0  ;;  %1810 = vmatprep.mubr.msk.bf16.mxu1 %vm599_vm5, %v1632_v56  ;;  %v1605_v16 = vcombine.low %v344_v25, %v345_v1  ;;  %vm249_vm12 = vmpackc.low %vm225_vm2, %vm225_vm2  ;;  %v272_v17 = vsel %vm2514_vm7, %v2468_v40, 0  ;;  %v64_v25 = vld [vmem:[%s3169_s1 + $0xb8] sm:$0xff] }
  0xa4   :  { %v2499_v57 = vsub.s32 %v59_v26, %v180_v48  ;;  %v2508_v0 = vsub.s32 %v60_v45, %v181_v47  ;;  %v273_v28 = vsel %vm249_vm12, %v2487_v49, 0  ;;  %vm2549_vm13 = vmpackc.low %vm298_vm6, %vm298_vm6  ;;  %vm227_vm4 = vcmp.eq.s32.totalorder %v2452_v33, 0  ;;  %v63_v48 = vld [vmem:[%s3169_s1 + $0xb0] sm:$0xff] }
  0xa5   :  { %v155_v4 = vpop.permute.xlu1 %154  ;;  %v152_v7 = vpop.permute.xlu0 %151  ;;  %v1633_v35 = vcombine.low %v272_v17, %v273_v28  ;;  %vm323_vm11 = vmpackc.low %vm299_vm8, %vm299_vm8  ;;  %v346_v29 = vsel %vm2549_vm13, %v2524_v14, 0  ;;  %vm429_vm8 = vcmp.eq.s32.totalorder %v2072_v62, 65 }
  0xa6   :  { %v183_v21 = vadd.s32 %v155_v4, %v2047_v46  ;;  %v182_v22 = vadd.s32 %v152_v7, %v2047_v46  ;;  %1783 = vmatmul.mubr.msk.bf16.gmra.mxu0 %vm599_vm5, %v1605_v16  ;;  %vm300_vm14 = vcmp.eq.s32.totalorder %v2499_v57, 1  ;;  %v347_v41 = vsel %vm323_vm11, %v2543_v23, 0  ;;  %vm2570_vm15 = vmpackc.low %vm226_vm10, %vm226_vm10  ;;  %v2599_v4 = vld [vmem:[%s3170_s0 + $0x4c] sm:$0xf] }
  0xa7   :  { %vm301_vm0 = vcmp.eq.s32.totalorder %v2508_v0, 1  ;;  %vm228_vm1 = vcmp.eq.s32.totalorder %v2499_v57, 0  ;;  %1811 = vmatmul.mubr.msk.bf16.gmra.mxu1 %vm599_vm5, %v1633_v35  ;;  %v1606_v55 = vcombine.low %v346_v29, %v347_v41  ;;  %vm251_vm9 = vmpackc.low %vm227_vm4, %vm227_vm4  ;;  %v274_v56 = vsel %vm2570_vm15, %v2524_v14, 0  ;;  %v2638_v35 = vld [vmem:[%s3170_s0 + $0x54] sm:$0xf] }
  0xa8   :  { %v2555_v37 = vsub.s32 %v61_v27, %v182_v22  ;;  %v2564_v26 = vsub.s32 %v62_v18, %v183_v21  ;;  %v275_v7 = vsel %vm251_vm9, %v2543_v23, 0  ;;  %vm324_vm2 = vmpackc.low %vm300_vm14, %vm300_vm14  ;;  %vm229_vm3 = vcmp.eq.s32.totalorder %v2508_v0, 0  ;;  %v2628_v22 = vld [vmem:[%s3170_s0 + $0x50] sm:$0xf] }
  0xa9   :  { %v161_v45 = vpop.permute.xlu1 %160  ;;  %v158_v47 = vpop.permute.xlu0 %157  ;;  %1786 = vmatprep.mubr.msk.bf16.mxu0 %vm599_vm5, %v1606_v55  ;;  %v1634_v27 = vcombine.low %v274_v56, %v275_v7  ;;  %vm325_vm6 = vmpackc.low %vm301_vm0, %vm301_vm0  ;;  %vm428_vm11 = vcmp.eq.s32.totalorder %v2067_v60, 65  ;;  %vm357_vm14 = vcmp.eq.s32.totalorder %v2072_v62, 64  ;;  %v2673_v56 = vld [vmem:[%s3170_s0 + $0x58] sm:$0xf]  ;;  %v2700_v62 = vld [vmem:[%s3170_s0 + $0x5c] sm:$0xf] }
  0xaa   :  { %v185_v1 = vadd.s32 %v161_v45, %v2047_v46  ;;  %v184_v2 = vadd.s32 %v158_v47, %v2047_v46  ;;  %v348_v46 = vsel %vm324_vm2, %v2580_v51, 0  ;;  %vm302_vm7 = vcmp.eq.s32.totalorder %v2555_v37, 1  ;;  %vm2621_vm10 = vmpackc.low %vm228_vm1, %vm228_vm1 }
  0xab   :  { %v349_v18 = vsel %vm325_vm6, %v2599_v4, 0  ;;  %vm303_vm12 = vcmp.eq.s32.totalorder %v2564_v26, 1  ;;  %1814 = vmatprep.mubr.msk.bf16.mxu1 %vm599_vm5, %v1634_v27  ;;  %vm253_vm13 = vmpackc.low %vm229_vm3, %vm229_vm3  ;;  %v276_v34 = vsel %vm2621_vm10, %v2580_v51, 0  ;;  %vm230_vm4 = vcmp.eq.s32.totalorder %v2555_v37, 0 }
  0xac   :  { %v2607_v16 = vsub.s32 %v63_v48, %v184_v2  ;;  %v2615_v17 = vsub.s32 %v64_v25, %v185_v1  ;;  %v1607_v28 = vcombine.low %v348_v46, %v349_v18  ;;  %v277_v29 = vsel %vm253_vm13, %v2599_v4, 0  ;;  %vm2647_vm15 = vmpackc.low %vm302_vm7, %vm302_vm7 }
  0xad   :  { %vm231_vm0 = vcmp.eq.s32.totalorder %v2564_v26, 0  ;;  %vm2655_vm1 = vmpackc.low %vm429_vm8, %vm429_vm8  ;;  %v1635_v45 = vcombine.low %v276_v34, %v277_v29  ;;  %v350_v47 = vsel %vm2647_vm15, %v2628_v22, 0  ;;  %vm356_vm3 = vcmp.eq.s32.totalorder %v2067_v60, 64 }
  0xae   :  { %1787 = vmatmul.mubr.msk.bf16.gmra.mxu0 %vm599_vm5, %v1607_v28  ;;  %vm327_vm9 = vmpackc.low %vm303_vm12, %vm303_vm12  ;;  %vm304_vm2 = vcmp.eq.s32.totalorder %v2607_v16, 1  ;;  %vm305_vm7 = vcmp.eq.s32.totalorder %v2615_v17, 1  ;;  %vm232_vm13 = vcmp.eq.s32.totalorder %v2607_v16, 0 }
  0xaf   :  { %v351_v48 = vsel %vm327_vm9, %v2638_v35, 0  ;;  %vm2666_vm6 = vmpackc.low %vm230_vm4, %vm230_vm4  ;;  %1815 = vmatmul.mubr.msk.bf16.gmra.mxu1 %vm599_vm5, %v1635_v45 }
  0xb0   :  { %vm2679_vm8 = vmpackc.low %vm428_vm11, %vm428_vm11  ;;  %v1608_v2 = vcombine.low %v350_v47, %v351_v48  ;;  %v278_v7 = vsel %vm2666_vm6, %v2628_v22, 0  ;;  %vm233_vm11 = vcmp.eq.s32.totalorder %v2615_v17, 0  ;;  %vm354_vm6 = vcmp.eq.s32.totalorder %v2054_v52, 64 }
  0xb1   :  { %vm2686_vm10 = vmpackc.low %vm357_vm14, %vm357_vm14 }
  0xb2   :  { %vm255_vm12 = vmpackc.low %vm231_vm0, %vm231_vm0  ;;  %1790 = vmatprep.mubr.msk.bf16.mxu0 %vm599_vm5, %v1608_v2  ;;  %vm426_vm0 = vcmp.eq.s32.totalorder %v2054_v52, 65 }
  0xb3   :  { %v279_v27 = vsel %vm255_vm12, %v2638_v35, 0  ;;  %vm328_vm4 = vmpackc.low %vm304_vm2, %vm304_vm2  ;;  %vm427_vm2 = vcmp.eq.s32.totalorder %v2069_v61, 65  ;;  %vm355_vm12 = vcmp.eq.s32.totalorder %v2069_v61, 64  ;;  %v477_v61 = vsel %vm2655_vm1, %v2121_v15, 0 }
  0xb4   :  { %vm2708_vm14 = vmpackc.low %vm356_vm3, %vm356_vm3  ;;  %v1636_v18 = vcombine.low %v278_v7, %v279_v27  ;;  %v352_v21 = vsel %vm328_vm4, %v2673_v56, 0  ;;  %vm432_vm1 = vcmp.eq.s32.totalorder %v2147_v30, 65 }
  0xb5   :  { %vm329_vm15 = vmpackc.low %vm305_vm7, %vm305_vm7 }
  0xb6   :  { %v353_v28 = vsel %vm329_vm15, %v2700_v62, 0  ;;  %vm256_vm9 = vmpackc.low %vm232_vm13, %vm232_vm13  ;;  %1818 = vmatprep.mubr.msk.bf16.mxu1 %vm599_vm5, %v1636_v18  ;;  %vm430_vm13 = vcmp.eq.s32.totalorder %v2099_v8, 65  ;;  %vm431_vm15 = vcmp.eq.s32.totalorder %v2111_v11, 65 }
  0xb7   :  { %v1609_v60 = vcombine.low %v352_v21, %v353_v28  ;;  %vm257_vm3 = vmpackc.low %vm233_vm11, %vm233_vm11  ;;  %v280_v34 = vsel %vm256_vm9, %v2673_v56, 0 }
  0xb8   :  { %v281_v29 = vsel %vm257_vm3, %v2700_v62, 0  ;;  %vm450_vm7 = vmpackc.low %vm426_vm0, %vm426_vm0  ;;  %vm358_vm0 = vcmp.eq.s32.totalorder %v2099_v8, 64  ;;  %vm359_vm3 = vcmp.eq.s32.totalorder %v2111_v11, 64 }
  0xb9   :  { %1791 = vmatmul.mubr.msk.bf16.gmra.mxu0 %vm599_vm5, %v1609_v60  ;;  %v1637_v41 = vcombine.low %v280_v34, %v281_v29  ;;  %vm451_vm4 = vmpackc.low %vm427_vm2, %vm427_vm2  ;;  %v474_v45 = vsel %vm450_vm7, %v2086_v5, 0 }
  0xba   :  { %v475_v47 = vsel %vm451_vm4, %v2091_v6, 0  ;;  %vm378_vm11 = vmpackc.low %vm354_vm6, %vm354_vm6 }
  0xbb   :  { %1819 = vmatmul.mubr.msk.bf16.gmra.mxu1 %vm599_vm5, %v1637_v41  ;;  %v1654_v52 = vcombine.low %v474_v45, %v475_v47  ;;  %vm379_vm9 = vmpackc.low %vm355_vm12, %vm355_vm12  ;;  %v402_v48 = vsel %vm378_vm11, %v2086_v5, 0  ;;  %v476_v5 = vsel %vm2679_vm8, %v2109_v10, 0  ;;  %vm433_vm12 = vcmp.eq.s32.totalorder %v2153_v32, 65 }
  0xbc   :  { %v403_v55 = vsel %vm379_vm9, %v2091_v6, 0  ;;  %vm2734_vm2 = vmpackc.low %vm430_vm13, %vm430_vm13  ;;  %v405_v6 = vsel %vm2686_vm10, %v2121_v15, 0  ;;  %v1655_v27 = vcombine.low %v476_v5, %v477_v61  ;;  %vm360_vm8 = vcmp.eq.s32.totalorder %v2147_v30, 64 }
  0xbd   :  { %1826 = vmatprep.mubr.msk.bf16.mxu0 %vm599_vm5, %v1654_v52  ;;  %v1682_v7 = vcombine.low %v402_v48, %v403_v55  ;;  %vm455_vm6 = vmpackc.low %vm431_vm15, %vm431_vm15  ;;  %v478_v8 = vsel %vm2734_vm2, %v2173_v39, 0  ;;  %v404_v15 = vsel %vm2708_vm14, %v2109_v10, 0  ;;  %vm361_vm13 = vcmp.eq.s32.totalorder %v2153_v32, 64 }
  0xbe   :  { %v479_v11 = vsel %vm455_vm6, %v2188_v44, 0  ;;  %vm2751_vm7 = vmpackc.low %vm358_vm0, %vm358_vm0  ;;  %v1683_v28 = vcombine.low %v404_v15, %v405_v6  ;;  %vm434_vm15 = vcmp.eq.s32.totalorder %v2204_v50, 65  ;;  %vm435_vm9 = vcmp.eq.s32.totalorder %v2216_v53, 65 }
  0xbf   :  { %1854 = vmatprep.mubr.msk.bf16.mxu1 %vm599_vm5, %v1682_v7  ;;  %vm383_vm4 = vmpackc.low %vm359_vm3, %vm359_vm3  ;;  %v406_v25 = vsel %vm2751_vm7, %v2173_v39, 0  ;;  %v1656_v1 = vcombine.low %v478_v8, %v479_v11  ;;  %vm362_vm2 = vcmp.eq.s32.totalorder %v2204_v50, 64  ;;  %vm363_vm6 = vcmp.eq.s32.totalorder %v2216_v53, 64 }
  0xc0   :  { %v407_v18 = vsel %vm383_vm4, %v2188_v44, 0  ;;  %vm2765_vm10 = vmpackc.low %vm432_vm1, %vm432_vm1  ;;  %vm436_vm7 = vcmp.eq.s32.totalorder %v2266_v12, 65  ;;  %vm437_vm4 = vcmp.eq.s32.totalorder %v2278_v13, 65 }
  0xc1   :  { %1827 = vmatmul.mubr.msk.bf16.vlgmr.msra.gmra.mxu0 %vm599_vm5, %v1655_v27  ;;  %vm2771_vm11 = vmpackc.low %vm433_vm12, %vm433_vm12  ;;  %v1684_v10 = vcombine.low %v406_v25, %v407_v18  ;;  %v480_v44 = vsel %vm2765_vm10, %v2229_v59, 0  ;;  %vm364_vm10 = vcmp.eq.s32.totalorder %v2266_v12, 64 }
  0xc2   :  { %1830 = vmatprep.mubr.msk.bf16.mxu0 %vm599_vm5, %v1656_v1  ;;  %vm2777_vm14 = vmpackc.low %vm360_vm8, %vm360_vm8  ;;  %v481_v46 = vsel %vm2771_vm11, %v2248_v3, 0  ;;  %vm365_vm11 = vcmp.eq.s32.totalorder %v2278_v13, 64 }
  0xc3   :  { %1855 = vmatmul.mubr.msk.bf16.vlgmr.msra.gmra.mxu1 %vm599_vm5, %v1683_v28  ;;  %vm2783_vm0 = vmpackc.low %vm361_vm13, %vm361_vm13  ;;  %v408_v50 = vsel %vm2777_vm14, %v2229_v59, 0  ;;  %v1657_v41 = vcombine.low %v480_v44, %v481_v46  ;;  %vm438_vm14 = vcmp.eq.s32.totalorder %v2331_v36, 65 }
  0xc4   :  { %1858 = vmatprep.mubr.msk.bf16.mxu1 %vm599_vm5, %v1684_v10  ;;  %vm458_vm3 = vmpackc.low %vm434_vm15, %vm434_vm15  ;;  %v409_v34 = vsel %vm2783_vm0, %v2248_v3, 0  ;;  %vm439_vm0 = vcmp.eq.s32.totalorder %v2340_v38, 65 }
  0xc5   :  { %vm459_vm1 = vmpackc.low %vm435_vm9, %vm435_vm9  ;;  %v482_v60 = vsel %vm458_vm3, %v2294_v20, 0  ;;  %v1685_v3 = vcombine.low %v408_v50, %v409_v34  ;;  %vm366_vm3 = vcmp.eq.s32.totalorder %v2331_v36, 64 }
  0xc6   :  { %v483_v29 = vsel %vm459_vm1, %v2316_v31, 0  ;;  %vm386_vm12 = vmpackc.low %vm362_vm2, %vm362_vm2  ;;  %vm367_vm1 = vcmp.eq.s32.totalorder %v2340_v38, 64 }
  0xc7   :  { %vm387_vm8 = vmpackc.low %vm363_vm6, %vm363_vm6  ;;  %v410_v53 = vsel %vm386_vm12, %v2294_v20, 0  ;;  %v1658_v45 = vcombine.low %v482_v60, %v483_v29  ;;  %vm440_vm12 = vcmp.eq.s32.totalorder %v2387_v58, 65 }
  0xc8   :  { %v411_v47 = vsel %vm387_vm8, %v2316_v31, 0  ;;  %vm2809_vm13 = vmpackc.low %vm436_vm7, %vm436_vm7  ;;  %vm441_vm8 = vcmp.eq.s32.totalorder %v2396_v63, 65 }
  0xc9   :  { %1831 = vmatmul.mubr.msk.bf16.gmra.mxu0 %vm599_vm5, %v1657_v41  ;;  %vm2815_vm15 = vmpackc.low %vm437_vm4, %vm437_vm4  ;;  %v1686_v12 = vcombine.low %v410_v53, %v411_v47  ;;  %v484_v31 = vsel %vm2809_vm13, %v2356_v43, 0  ;;  %vm368_vm13 = vcmp.eq.s32.totalorder %v2387_v58, 64 }
  0xca   :  { %1834 = vmatprep.mubr.msk.bf16.mxu0 %vm599_vm5, %v1658_v45  ;;  %vm2821_vm9 = vmpackc.low %vm364_vm10, %vm364_vm10  ;;  %v485_v61 = vsel %vm2815_vm15, %v2375_v54, 0  ;;  %vm369_vm15 = vcmp.eq.s32.totalorder %v2396_v63, 64 }
  0xcb   :  { %1859 = vmatmul.mubr.msk.bf16.gmra.mxu1 %vm599_vm5, %v1685_v3  ;;  %vm2827_vm2 = vmpackc.low %vm365_vm11, %vm365_vm11  ;;  %v412_v36 = vsel %vm2821_vm9, %v2356_v43, 0  ;;  %v1659_v7 = vcombine.low %v484_v31, %v485_v61  ;;  %vm442_vm9 = vcmp.eq.s32.totalorder %v2443_v24, 65 }
  0xcc   :  { %1862 = vmatprep.mubr.msk.bf16.mxu1 %vm599_vm5, %v1686_v12  ;;  %vm462_vm6 = vmpackc.low %vm438_vm14, %vm438_vm14  ;;  %v413_v55 = vsel %vm2827_vm2, %v2375_v54, 0  ;;  %vm443_vm2 = vcmp.eq.s32.totalorder %v2452_v33, 65 }
  0xcd   :  { %vm463_vm7 = vmpackc.low %vm439_vm0, %vm439_vm0  ;;  %v486_v48 = vsel %vm462_vm6, %v2412_v9, 0  ;;  %v1687_v54 = vcombine.low %v412_v36, %v413_v55  ;;  %vm370_vm6 = vcmp.eq.s32.totalorder %v2443_v24, 64 }
  0xce   :  { %v487_v2 = vsel %vm463_vm7, %v2431_v19, 0  ;;  %vm390_vm4 = vmpackc.low %vm366_vm3, %vm366_vm3  ;;  %vm371_vm7 = vcmp.eq.s32.totalorder %v2452_v33, 64 }
  0xcf   :  { %vm391_vm10 = vmpackc.low %vm367_vm1, %vm367_vm1  ;;  %v414_v38 = vsel %vm390_vm4, %v2412_v9, 0  ;;  %v1660_v8 = vcombine.low %v486_v48, %v487_v2  ;;  %vm444_vm4 = vcmp.eq.s32.totalorder %v2499_v57, 65 }
  0xd0   :  { %v415_v5 = vsel %vm391_vm10, %v2431_v19, 0  ;;  %vm2853_vm11 = vmpackc.low %vm440_vm12, %vm440_vm12  ;;  %vm445_vm10 = vcmp.eq.s32.totalorder %v2508_v0, 65 }
  0xd1   :  { %1835 = vmatmul.mubr.msk.bf16.gmra.mxu0 %vm599_vm5, %v1659_v7  ;;  %vm2859_vm14 = vmpackc.low %vm441_vm8, %vm441_vm8  ;;  %v1688_v58 = vcombine.low %v414_v38, %v415_v5  ;;  %v488_v19 = vsel %vm2853_vm11, %v2468_v40, 0  ;;  %vm372_vm11 = vcmp.eq.s32.totalorder %v2499_v57, 64 }
  0xd2   :  { %1838 = vmatprep.mubr.msk.bf16.mxu0 %vm599_vm5, %v1660_v8  ;;  %vm2865_vm0 = vmpackc.low %vm368_vm13, %vm368_vm13  ;;  %v489_v11 = vsel %vm2859_vm14, %v2487_v49, 0  ;;  %vm373_vm14 = vcmp.eq.s32.totalorder %v2508_v0, 64 }
  0xd3   :  { %1863 = vmatmul.mubr.msk.bf16.gmra.mxu1 %vm599_vm5, %v1687_v54  ;;  %vm2871_vm3 = vmpackc.low %vm369_vm15, %vm369_vm15  ;;  %v416_v24 = vsel %vm2865_vm0, %v2468_v40, 0  ;;  %v1661_v15 = vcombine.low %v488_v19, %v489_v11  ;;  %vm446_vm0 = vcmp.eq.s32.totalorder %v2555_v37, 65 }
  0xd4   :  { %1866 = vmatprep.mubr.msk.bf16.mxu1 %vm599_vm5, %v1688_v58  ;;  %vm466_vm1 = vmpackc.low %vm442_vm9, %vm442_vm9  ;;  %v417_v27 = vsel %vm2871_vm3, %v2487_v49, 0  ;;  %vm447_vm3 = vcmp.eq.s32.totalorder %v2564_v26, 65 }
  0xd5   :  { %vm467_vm12 = vmpackc.low %vm443_vm2, %vm443_vm2  ;;  %v490_v42 = vsel %vm466_vm1, %v2524_v14, 0  ;;  %v1689_v49 = vcombine.low %v416_v24, %v417_v27  ;;  %vm374_vm1 = vcmp.eq.s32.totalorder %v2555_v37, 64 }
  0xd6   :  { %v491_v25 = vsel %vm467_vm12, %v2543_v23, 0  ;;  %vm394_vm8 = vmpackc.low %vm370_vm6, %vm370_vm6  ;;  %vm375_vm12 = vcmp.eq.s32.totalorder %v2564_v26, 64 }
  0xd7   :  { %vm395_vm13 = vmpackc.low %vm371_vm7, %vm371_vm7  ;;  %v418_v33 = vsel %vm394_vm8, %v2524_v14, 0  ;;  %v1662_v1 = vcombine.low %v490_v42, %v491_v25  ;;  %vm448_vm8 = vcmp.eq.s32.totalorder %v2607_v16, 65 }
  0xd8   :  { %v419_v18 = vsel %vm395_vm13, %v2543_v23, 0  ;;  %vm2897_vm15 = vmpackc.low %vm444_vm4, %vm444_vm4  ;;  %vm449_vm13 = vcmp.eq.s32.totalorder %v2615_v17, 65 }
  0xd9   :  { %1839 = vmatmul.mubr.msk.bf16.gmra.mxu0 %vm599_vm5, %v1661_v15  ;;  %vm2903_vm9 = vmpackc.low %vm445_vm10, %vm445_vm10  ;;  %v1690_v57 = vcombine.low %v418_v33, %v419_v18  ;;  %v492_v23 = vsel %vm2897_vm15, %v2580_v51, 0  ;;  %vm376_vm15 = vcmp.eq.s32.totalorder %v2607_v16, 64 }
  0xda   :  { %1842 = vmatprep.mubr.msk.bf16.mxu0 %vm599_vm5, %v1662_v1  ;;  %vm2909_vm2 = vmpackc.low %vm372_vm11, %vm372_vm11  ;;  %v493_v28 = vsel %vm2903_vm9, %v2599_v4, 0  ;;  %vm377_vm9 = vcmp.eq.s32.totalorder %v2615_v17, 64 }
  0xdb   :  { %1867 = vmatmul.mubr.msk.bf16.gmra.mxu1 %vm599_vm5, %v1689_v49  ;;  %vm2915_vm6 = vmpackc.low %vm373_vm14, %vm373_vm14  ;;  %v420_v37 = vsel %vm2909_vm2, %v2580_v51, 0  ;;  %v1663_v32 = vcombine.low %v492_v23, %v493_v28 }
  0xdc   :  { %1870 = vmatprep.mubr.msk.bf16.mxu1 %vm599_vm5, %v1690_v57  ;;  %vm470_vm7 = vmpackc.low %vm446_vm0, %vm446_vm0  ;;  %v421_v10 = vsel %vm2915_vm6, %v2599_v4, 0  ;;  %vm1440_vm6 = vcmask 523264  }
  0xdd   :  { %vm471_vm4 = vmpackc.low %vm447_vm3, %vm447_vm3  ;;  %v494_v39 = vsel %vm470_vm7, %v2628_v22, 0  ;;  %v1691_v51 = vcombine.low %v420_v37, %v421_v10 }
  0xde   :  { %v495_v30 = vsel %vm471_vm4, %v2638_v35, 0  ;;  %vm398_vm10 = vmpackc.low %vm374_vm1, %vm374_vm1 }
  0xdf   :  { %vm399_vm11 = vmpackc.low %vm375_vm12, %vm375_vm12  ;;  %v422_v26 = vsel %vm398_vm10, %v2628_v22, 0  ;;  %v1664_v44 = vcombine.low %v494_v39, %v495_v30 }
  0xe0   :  { %v423_v46 = vsel %vm399_vm11, %v2638_v35, 0  ;;  %vm472_vm14 = vmpackc.low %vm448_vm8, %vm448_vm8 }
  0xe1   :  { %1843 = vmatmul.mubr.msk.bf16.gmra.mxu0 %vm599_vm5, %v1663_v32  ;;  %vm473_vm0 = vmpackc.low %vm449_vm13, %vm449_vm13  ;;  %v1692_v4 = vcombine.low %v422_v26, %v423_v46  ;;  %v496_v16 = vsel %vm472_vm14, %v2673_v56, 0 }
  0xe2   :  { %1846 = vmatprep.mubr.msk.bf16.mxu0 %vm599_vm5, %v1664_v44  ;;  %vm400_vm2 = vmpackc.low %vm376_vm15, %vm376_vm15  ;;  %v497_v22 = vsel %vm473_vm0, %v2700_v62, 0 }
  0xe3   :  { %1871 = vmatmul.mubr.msk.bf16.gmra.mxu1 %vm599_vm5, %v1691_v51  ;;  %vm401_vm3 = vmpackc.low %vm377_vm9, %vm377_vm9  ;;  %v424_v35 = vsel %vm400_vm2, %v2673_v56, 0  ;;  %v1665_v60 = vcombine.low %v496_v16, %v497_v22 }
  0xe4   :  { %1874 = vmatprep.mubr.msk.bf16.mxu1 %vm599_vm5, %v1692_v4  ;;  %v425_v17 = vsel %vm401_vm3, %v2700_v62, 0 }
  0xe5   :  { %v1693_v50 = vcombine.low %v424_v35, %v425_v17 }
  0xe9   :  { %1847 = vmatmul.mubr.msk.bf16.gmra.mxu0 %vm599_vm5, %v1665_v60 }
  0xeb   :  { %1875 = vmatmul.mubr.msk.bf16.gmra.mxu1 %vm599_vm5, %v1693_v50  ;;  %vm1561_vm5 = vcmask 1048064  }
 0x14e   :  { %v1772_v34 = vpop.f32.mrf.mxu0 }
 0x14f   :  { %v1800_v29 = vpop.f32.mrf.mxu1 }
 0x150   :  { %v670_v41 = vpop.f32.mrf.mxu0  ;;  %v904_v53 = vadd.f32 %v1800_v29, %v1772_v34 }
 0x151   :  { %v895_v45 = vpop.f32.mrf.mxu1 }
 0x152   :  { %v1773_v47 = vpop.f32.mrf.mxu0  ;;  %1443 = vst.msk [vmem:[%s3171_s3 + $0x10] sm:$0xff] %vm1440_vm6, %v904_v53  ;;  %v896_v56 = vadd.f32 %v895_v45, %v670_v41 }
 0x153   :  { %v1801_v62 = vpop.f32.mrf.mxu1 }
 0x154   :  { %v673_v59 = vpop.f32.mrf.mxu0  ;;  %1441 = vst.msk [vmem:[%s3171_s3] sm:$0xff] %vm1440_vm6, %v896_v56  ;;  %v907_v3 = vadd.f32 %v1801_v62, %v1773_v47 }
 0x155   :  { %v898_v52 = vpop.f32.mrf.mxu1 }
 0x156   :  { %v1776_v12 = vpop.f32.mrf.mxu0  ;;  %1444 = vst.msk [vmem:[%s3171_s3 + $0x18] sm:$0xff] %vm1440_vm6, %v907_v3  ;;  %v899_v20 = vadd.f32 %v898_v52, %v673_v59 }
 0x157   :  { %v1804_v13 = vpop.f32.mrf.mxu1 }
 0x158   :  { %v686_v31 = vpop.f32.mrf.mxu0  ;;  %1442 = vst.msk [vmem:[%s3171_s3 + $0x8] sm:$0xff] %vm1440_vm6, %v899_v20  ;;  %v920_v61 = vadd.f32 %v1804_v13, %v1776_v12 }
 0x159   :  { %v911_v48 = vpop.f32.mrf.mxu1 }
 0x15a   :  { %v1777_v36 = vpop.f32.mrf.mxu0  ;;  %1447 = vst.msk [vmem:[%s3171_s3 + $0x30] sm:$0xff] %vm1440_vm6, %v920_v61  ;;  %v912_v55 = vadd.f32 %v911_v48, %v686_v31 }
 0x15b   :  { %v1805_v2 = vpop.f32.mrf.mxu1 }
 0x15c   :  { %v689_v7 = vpop.f32.mrf.mxu0  ;;  %1445 = vst.msk [vmem:[%s3171_s3 + $0x20] sm:$0xff] %vm1440_vm6, %v912_v55  ;;  %v923_v38 = vadd.f32 %v1805_v2, %v1777_v36 }
 0x15d   :  { %v914_v8 = vpop.f32.mrf.mxu1 }
 0x15e   :  { %v1780_v5 = vpop.f32.mrf.mxu0  ;;  %1448 = vst.msk [vmem:[%s3171_s3 + $0x38] sm:$0xff] %vm1440_vm6, %v923_v38  ;;  %v915_v43 = vadd.f32 %v914_v8, %v689_v7 }
 0x15f   :  { %v1808_v54 = vpop.f32.mrf.mxu1 }
 0x160   :  { %v702_v6 = vpop.f32.mrf.mxu0  ;;  %1446 = vst.msk [vmem:[%s3171_s3 + $0x28] sm:$0xff] %vm1440_vm6, %v915_v43  ;;  %v936_v58 = vadd.f32 %v1808_v54, %v1780_v5 }
 0x161   :  { %v927_v9 = vpop.f32.mrf.mxu1 }
 0x162   :  { %v1781_v63 = vpop.f32.mrf.mxu0  ;;  %1451 = vst.msk [vmem:[%s3171_s3 + $0x50] sm:$0xff] %vm1440_vm6, %v936_v58  ;;  %v928_v19 = vadd.f32 %v927_v9, %v702_v6 }
 0x163   :  { %v1809_v11 = vpop.f32.mrf.mxu1 }
 0x164   :  { %v705_v42 = vpop.f32.mrf.mxu0  ;;  %1449 = vst.msk [vmem:[%s3171_s3 + $0x40] sm:$0xff] %vm1440_vm6, %v928_v19  ;;  %v939_v24 = vadd.f32 %v1809_v11, %v1781_v63 }
 0x165   :  { %v930_v27 = vpop.f32.mrf.mxu1 }
 0x166   :  { %v1784_v25 = vpop.f32.mrf.mxu0  ;;  %1452 = vst.msk [vmem:[%s3171_s3 + $0x58] sm:$0xff] %vm1440_vm6, %v939_v24  ;;  %v931_v15 = vadd.f32 %v930_v27, %v705_v42 }
 0x167   :  { %v1812_v33 = vpop.f32.mrf.mxu1 }
 0x168   :  { %v718_v1 = vpop.f32.mrf.mxu0  ;;  %1450 = vst.msk [vmem:[%s3171_s3 + $0x48] sm:$0xff] %vm1440_vm6, %v931_v15  ;;  %v952_v18 = vadd.f32 %v1812_v33, %v1784_v25 }
 0x169   :  { %v943_v40 = vpop.f32.mrf.mxu1 }
 0x16a   :  { %v1785_v49 = vpop.f32.mrf.mxu0  ;;  %1455 = vst.msk [vmem:[%s3171_s3 + $0x70] sm:$0xff] %vm1440_vm6, %v952_v18  ;;  %v944_v21 = vadd.f32 %v943_v40, %v718_v1 }
 0x16b   :  { %v1813_v57 = vpop.f32.mrf.mxu1 }
 0x16c   :  { %v721_v14 = vpop.f32.mrf.mxu0  ;;  %1453 = vst.msk [vmem:[%s3171_s3 + $0x60] sm:$0xff] %vm1440_vm6, %v944_v21  ;;  %v955_v0 = vadd.f32 %v1813_v57, %v1785_v49 }
 0x16d   :  { %v946_v23 = vpop.f32.mrf.mxu1 }
 0x16e   :  { %v1788_v28 = vpop.f32.mrf.mxu0  ;;  %1456 = vst.msk [vmem:[%s3171_s3 + $0x78] sm:$0xff] %vm1440_vm6, %v955_v0  ;;  %v947_v39 = vadd.f32 %v946_v23, %v721_v14 }
 0x16f   :  { %v1816_v37 = vpop.f32.mrf.mxu1 }
 0x170   :  { %v734_v10 = vpop.f32.mrf.mxu0  ;;  %1454 = vst.msk [vmem:[%s3171_s3 + $0x68] sm:$0xff] %vm1440_vm6, %v947_v39  ;;  %v968_v30 = vadd.f32 %v1816_v37, %v1788_v28 }
 0x171   :  { %v959_v32 = vpop.f32.mrf.mxu1 }
 0x172   :  { %v1789_v26 = vpop.f32.mrf.mxu0  ;;  %1459 = vst.msk [vmem:[%s3171_s3 + $0x90] sm:$0xff] %vm1440_vm6, %v968_v30  ;;  %v960_v44 = vadd.f32 %v959_v32, %v734_v10 }
 0x173   :  { %v1817_v46 = vpop.f32.mrf.mxu1 }
 0x174   :  { %v737_v51 = vpop.f32.mrf.mxu0  ;;  %1457 = vst.msk [vmem:[%s3171_s3 + $0x80] sm:$0xff] %vm1440_vm6, %v960_v44  ;;  %v971_v4 = vadd.f32 %v1817_v46, %v1789_v26 }
 0x175   :  { %v962_v16 = vpop.f32.mrf.mxu1 }
 0x176   :  { %1460 = vst.msk [vmem:[%s3171_s3 + $0x98] sm:$0xff] %vm1440_vm6, %v971_v4  ;;  %v963_v35 = vadd.f32 %v962_v16, %v737_v51 }
 0x178   :  { %1458 = vst.msk [vmem:[%s3171_s3 + $0x88] sm:$0xff] %vm1440_vm6, %v963_v35 }
 0x179   :  { %v1792_v22 = vpop.f32.mrf.mxu0 }
 0x17b   :  { %v1820_v17 = vpop.f32.mrf.mxu1  ;;  %v750_v60 = vpop.f32.mrf.mxu0 }
 0x17c   :  { %v984_v50 = vadd.f32 %v1820_v17, %v1792_v22 }
 0x17d   :  { %v975_v34 = vpop.f32.mrf.mxu1  ;;  %v1793_v29 = vpop.f32.mrf.mxu0 }
 0x17e   :  { %1463 = vst.msk [vmem:[%s3171_s3 + $0xb0] sm:$0xff] %vm1440_vm6, %v984_v50  ;;  %v976_v41 = vadd.f32 %v975_v34, %v750_v60 }
 0x17f   :  { %v1821_v53 = vpop.f32.mrf.mxu1  ;;  %v753_v45 = vpop.f32.mrf.mxu0 }
 0x180   :  { %1461 = vst.msk [vmem:[%s3171_s3 + $0xa0] sm:$0xff] %vm1440_vm6, %v976_v41  ;;  %v987_v47 = vadd.f32 %v1821_v53, %v1793_v29 }
 0x181   :  { %v978_v56 = vpop.f32.mrf.mxu1  ;;  %v1828_v62 = vpop.f32.mrf.mxu0 }
 0x182   :  { %1464 = vst.msk [vmem:[%s3171_s3 + $0xb8] sm:$0xff] %vm1440_vm6, %v987_v47  ;;  %v979_v59 = vadd.f32 %v978_v56, %v753_v45 }
 0x183   :  { %v1856_v3 = vpop.f32.mrf.mxu1  ;;  %v1120_v52 = vpop.f32.mrf.mxu0 }
 0x184   :  { %1462 = vst.msk [vmem:[%s3171_s3 + $0xa8] sm:$0xff] %vm1440_vm6, %v979_v59  ;;  %v1354_v12 = vadd.f32 %v1856_v3, %v1828_v62 }
 0x185   :  { %v1345_v20 = vpop.f32.mrf.mxu1  ;;  %v1829_v13 = vpop.f32.mrf.mxu0 }
 0x186   :  { %1493 = vrot.lane.b32.xlu0 %v1354_v12, %s1885_s6  ;;  %v1346_v48 = vadd.f32 %v1345_v20, %v1120_v52 }
 0x187   :  { %v1857_v31 = vpop.f32.mrf.mxu1  ;;  %v1123_v61 = vpop.f32.mrf.mxu0 }
 0x188   :  { %v1357_v36 = vadd.f32 %v1857_v31, %v1829_v13 }
 0x189   :  { %v1348_v55 = vpop.f32.mrf.mxu1  ;;  %v1832_v2 = vpop.f32.mrf.mxu0 }
 0x18a   :  { %1495 = vrot.lane.b32.xlu1 %v1357_v36, %s1885_s6  ;;  %1489 = vrot.lane.b32.xlu0 %v1346_v48, %s1885_s6  ;;  %v1349_v8 = vadd.f32 %v1348_v55, %v1123_v61 }
 0x18b   :  { %v1860_v7 = vpop.f32.mrf.mxu1  ;;  %v1136_v38 = vpop.f32.mrf.mxu0 }
 0x18c   :  { %v1370_v5 = vadd.f32 %v1860_v7, %v1832_v2 }
 0x18d   :  { %v1361_v43 = vpop.f32.mrf.mxu1  ;;  %v1833_v54 = vpop.f32.mrf.mxu0 }
 0x18e   :  { %1491 = vrot.lane.b32.xlu1 %v1349_v8, %s1885_s6  ;;  %1501 = vrot.lane.b32.xlu0 %v1370_v5, %s1885_s6  ;;  %v1362_v9 = vadd.f32 %v1361_v43, %v1136_v38 }
 0x18f   :  { %v1861_v6 = vpop.f32.mrf.mxu1  ;;  %v1139_v58 = vpop.f32.mrf.mxu0 }
 0x190   :  { %v1373_v63 = vadd.f32 %v1861_v6, %v1833_v54 }
 0x191   :  { %v1364_v19 = vpop.f32.mrf.mxu1  ;;  %v1836_v11 = vpop.f32.mrf.mxu0 }
 0x192   :  { %1503 = vrot.lane.b32.xlu1 %v1373_v63, %s1885_s6  ;;  %1497 = vrot.lane.b32.xlu0 %v1362_v9, %s1885_s6  ;;  %v1365_v27 = vadd.f32 %v1364_v19, %v1139_v58 }
 0x193   :  { %v1864_v42 = vpop.f32.mrf.mxu1  ;;  %v1152_v24 = vpop.f32.mrf.mxu0 }
 0x194   :  { %v1386_v25 = vadd.f32 %v1864_v42, %v1836_v11 }
 0x195   :  { %v1377_v15 = vpop.f32.mrf.mxu1  ;;  %v1837_v33 = vpop.f32.mrf.mxu0 }
 0x196   :  { %1499 = vrot.lane.b32.xlu1 %v1365_v27, %s1885_s6  ;;  %1509 = vrot.lane.b32.xlu0 %v1386_v25, %s1885_s6  ;;  %v1378_v40 = vadd.f32 %v1377_v15, %v1152_v24 }
 0x197   :  { %v1865_v1 = vpop.f32.mrf.mxu1  ;;  %v1155_v18 = vpop.f32.mrf.mxu0 }
 0x198   :  { %v1389_v49 = vadd.f32 %v1865_v1, %v1837_v33 }
 0x199   :  { %v1380_v21 = vpop.f32.mrf.mxu1  ;;  %v1840_v57 = vpop.f32.mrf.mxu0 }
 0x19a   :  { %1511 = vrot.lane.b32.xlu1 %v1389_v49, %s1885_s6  ;;  %1505 = vrot.lane.b32.xlu0 %v1378_v40, %s1885_s6  ;;  %v1381_v23 = vadd.f32 %v1380_v21, %v1155_v18 }
 0x19b   :  { %v1868_v14 = vpop.f32.mrf.mxu1  ;;  %v1168_v0 = vpop.f32.mrf.mxu0 }
 0x19c   :  { %v1402_v28 = vadd.f32 %v1868_v14, %v1840_v57 }
 0x19d   :  { %v1393_v39 = vpop.f32.mrf.mxu1  ;;  %v1841_v37 = vpop.f32.mrf.mxu0 }
 0x19e   :  { %1507 = vrot.lane.b32.xlu1 %v1381_v23, %s1885_s6  ;;  %1517 = vrot.lane.b32.xlu0 %v1402_v28, %s1885_s6  ;;  %v1394_v32 = vadd.f32 %v1393_v39, %v1168_v0 }
 0x19f   :  { %v1869_v10 = vpop.f32.mrf.mxu1  ;;  %v1171_v30 = vpop.f32.mrf.mxu0 }
 0x1a0   :  { %v1405_v26 = vadd.f32 %v1869_v10, %v1841_v37 }
 0x1a1   :  { %v1396_v44 = vpop.f32.mrf.mxu1  ;;  %v1844_v46 = vpop.f32.mrf.mxu0 }
 0x1a2   :  { %1519 = vrot.lane.b32.xlu1 %v1405_v26, %s1885_s6  ;;  %1513 = vrot.lane.b32.xlu0 %v1394_v32, %s1885_s6  ;;  %v1397_v16 = vadd.f32 %v1396_v44, %v1171_v30 }
 0x1a3   :  { %v1872_v51 = vpop.f32.mrf.mxu1  ;;  %v1184_v4 = vpop.f32.mrf.mxu0 }
 0x1a4   :  { %v1418_v22 = vadd.f32 %v1872_v51, %v1844_v46 }
 0x1a5   :  { %v1409_v35 = vpop.f32.mrf.mxu1  ;;  %v1845_v17 = vpop.f32.mrf.mxu0 }
 0x1a6   :  { %1515 = vrot.lane.b32.xlu1 %v1397_v16, %s1885_s6  ;;  %1525 = vrot.lane.b32.xlu0 %v1418_v22, %s1885_s6  ;;  %v1410_v34 = vadd.f32 %v1409_v35, %v1184_v4 }
 0x1a7   :  { %v1873_v60 = vpop.f32.mrf.mxu1  ;;  %v1187_v50 = vpop.f32.mrf.mxu0 }
 0x1a8   :  { %v1421_v29 = vadd.f32 %v1873_v60, %v1845_v17 }
 0x1a9   :  { %v1412_v41 = vpop.f32.mrf.mxu1  ;;  %v1848_v53 = vpop.f32.mrf.mxu0 }
 0x1aa   :  { %1527 = vrot.lane.b32.xlu1 %v1421_v29, %s1885_s6  ;;  %1521 = vrot.lane.b32.xlu0 %v1410_v34, %s1885_s6  ;;  %v1413_v56 = vadd.f32 %v1412_v41, %v1187_v50 }
 0x1ab   :  { %v1876_v45 = vpop.f32.mrf.mxu1  ;;  %v1200_v47 = vpop.f32.mrf.mxu0 }
 0x1ac   :  { %v1434_v13 = vadd.f32 %v1876_v45, %v1848_v53 }
 0x1ad   :  { %v1425_v62 = vpop.f32.mrf.mxu1  ;;  %v1849_v59 = vpop.f32.mrf.mxu0 }
 0x1ae   :  { %v1426_v3 = vadd.f32 %v1425_v62, %v1200_v47  ;;  %1523 = vrot.lane.b32.xlu1 %v1413_v56, %s1885_s6 }
 0x1af   :  { %v1877_v52 = vpop.f32.mrf.mxu1  ;;  %v1203_v12 = vpop.f32.mrf.mxu0 }
 0x1b0   :  { %1529 = vrot.lane.b32.xlu0 %v1426_v3, %s1885_s6  ;;  %v1437_v61 = vadd.f32 %v1877_v52, %v1849_v59 }
 0x1b1   :  { %v1428_v20 = vpop.f32.mrf.mxu1 }
 0x1b2   :  { %v1429_v31 = vadd.f32 %v1428_v20, %v1203_v12 }
 0x1b4   :  { %1531 = vrot.lane.b32.xlu1 %v1429_v31, %s1885_s6  ;;  %1533 = vrot.lane.b32.xlu0 %v1434_v13, %s1885_s6 }
 0x1b8   :  { %1535 = vrot.lane.b32.xlu1 %v1437_v61, %s1885_s6 }
 0x1f8   :  { %v1494_v48 = vpop.permute.xlu0 %1493 }
 0x1f9   :  { %1564 = vst.msk [vmem:[%s3171_s3 + $0x10] sm:$0xff] %vm1561_vm5, %v1494_v48 }
 0x1fc   :  { %v1496_v36 = vpop.permute.xlu1 %1495  ;;  %v1490_v55 = vpop.permute.xlu0 %1489 }
 0x1fd   :  { %1565 = vst.msk [vmem:[%s3171_s3 + $0x18] sm:$0xff] %vm1561_vm5, %v1496_v36  ;;  %1562 = vst.msk [vmem:[%s3171_s3] sm:$0xff] %vm1561_vm5, %v1490_v55 }
 0x200   :  { %v1492_v2 = vpop.permute.xlu1 %1491  ;;  %v1502_v7 = vpop.permute.xlu0 %1501 }
 0x201   :  { %1563 = vst.msk [vmem:[%s3171_s3 + $0x8] sm:$0xff] %vm1561_vm5, %v1492_v2  ;;  %1568 = vst.msk [vmem:[%s3171_s3 + $0x30] sm:$0xff] %vm1561_vm5, %v1502_v7 }
 0x204   :  { %v1504_v38 = vpop.permute.xlu1 %1503  ;;  %v1498_v8 = vpop.permute.xlu0 %1497 }
 0x205   :  { %1569 = vst.msk [vmem:[%s3171_s3 + $0x38] sm:$0xff] %vm1561_vm5, %v1504_v38  ;;  %1566 = vst.msk [vmem:[%s3171_s3 + $0x20] sm:$0xff] %vm1561_vm5, %v1498_v8 }
 0x208   :  { %v1500_v5 = vpop.permute.xlu1 %1499  ;;  %v1510_v43 = vpop.permute.xlu0 %1509 }
 0x209   :  { %1567 = vst.msk [vmem:[%s3171_s3 + $0x28] sm:$0xff] %vm1561_vm5, %v1500_v5  ;;  %1572 = vst.msk [vmem:[%s3171_s3 + $0x50] sm:$0xff] %vm1561_vm5, %v1510_v43 }
 0x20c   :  { %v1512_v54 = vpop.permute.xlu1 %1511  ;;  %v1506_v6 = vpop.permute.xlu0 %1505 }
 0x20d   :  { %1573 = vst.msk [vmem:[%s3171_s3 + $0x58] sm:$0xff] %vm1561_vm5, %v1512_v54  ;;  %1570 = vst.msk [vmem:[%s3171_s3 + $0x40] sm:$0xff] %vm1561_vm5, %v1506_v6 }
 0x210   :  { %v1508_v58 = vpop.permute.xlu1 %1507  ;;  %v1518_v9 = vpop.permute.xlu0 %1517 }
 0x211   :  { %1571 = vst.msk [vmem:[%s3171_s3 + $0x48] sm:$0xff] %vm1561_vm5, %v1508_v58  ;;  %1576 = vst.msk [vmem:[%s3171_s3 + $0x70] sm:$0xff] %vm1561_vm5, %v1518_v9 }
 0x214   :  { %v1520_v63 = vpop.permute.xlu1 %1519  ;;  %v1514_v19 = vpop.permute.xlu0 %1513 }
 0x215   :  { %1577 = vst.msk [vmem:[%s3171_s3 + $0x78] sm:$0xff] %vm1561_vm5, %v1520_v63  ;;  %1574 = vst.msk [vmem:[%s3171_s3 + $0x60] sm:$0xff] %vm1561_vm5, %v1514_v19 }
 0x218   :  { %v1516_v11 = vpop.permute.xlu1 %1515  ;;  %v1526_v42 = vpop.permute.xlu0 %1525 }
 0x219   :  { %1575 = vst.msk [vmem:[%s3171_s3 + $0x68] sm:$0xff] %vm1561_vm5, %v1516_v11  ;;  %1580 = vst.msk [vmem:[%s3171_s3 + $0x90] sm:$0xff] %vm1561_vm5, %v1526_v42 }
 0x21c   :  { %v1528_v24 = vpop.permute.xlu1 %1527  ;;  %v1522_v27 = vpop.permute.xlu0 %1521 }
 0x21d   :  { %1581 = vst.msk [vmem:[%s3171_s3 + $0x98] sm:$0xff] %vm1561_vm5, %v1528_v24  ;;  %1578 = vst.msk [vmem:[%s3171_s3 + $0x80] sm:$0xff] %vm1561_vm5, %v1522_v27 }
 0x220   :  { %v1524_v25 = vpop.permute.xlu1 %1523 }
 0x221   :  { %1579 = vst.msk [vmem:[%s3171_s3 + $0x88] sm:$0xff] %vm1561_vm5, %v1524_v25 }
 0x222   :  { %v1530_v15 = vpop.permute.xlu0 %1529 }
 0x223   :  { %1582 = vst.msk [vmem:[%s3171_s3 + $0xa0] sm:$0xff] %vm1561_vm5, %v1530_v15 }
 0x226   :  { %v1532_v33 = vpop.permute.xlu1 %1531  ;;  %v1534_v1 = vpop.permute.xlu0 %1533 }
 0x227   :  { %1583 = vst.msk [vmem:[%s3171_s3 + $0xa8] sm:$0xff] %vm1561_vm5, %v1532_v33  ;;  %1584 = vst.msk [vmem:[%s3171_s3 + $0xb0] sm:$0xff] %vm1561_vm5, %v1534_v1 }
 0x22a   :  { %v1536_v18 = vpop.permute.xlu1 %1535 }
 0x22b   :  { %1585 = vst.msk [vmem:[%s3171_s3 + $0xb8] sm:$0xff] %vm1561_vm5, %v1536_v18 }

</bundles_post_ra>
